<compile_context>
chip_gen: v7x
topology: tpu7x:2x2x1
jax: 0.10.0
libtpu: 0.0.40
codegen_flags: <defaults>
</compile_context>

<pallas_src>
import jax
import jax.numpy as jnp
from jax.experimental import pallas as pl
from jax.experimental.pallas import tpu as pltpu

B, S, D = 2, 8, 32          # batch, seq, d_model
NUM_HEADS = 4
DK = D // NUM_HEADS
D_FF = 64
N_LAYERS = 4
EPS = 1e-6                  # LayerNorm eps (Annotated-Transformer style)


def _layer_norm(v, g, b):
    mu = jnp.mean(v, axis=-1, keepdims=True)
    var = jnp.mean((v - mu) ** 2, axis=-1, keepdims=True)
    return (v - mu) * jax.lax.rsqrt(var + EPS) * g + b


def encoder_kernel(x_ref, ln1g_ref, ln1b_ref, wqkv_ref, bqkv_ref,
                   wo_ref, bo_ref, ln2g_ref, ln2b_ref,
                   w1_ref, b1_ref, w2_ref, b2_ref,
                   o_ref, ctx_ref):
    x = x_ref[...]                                   # (B*S, D), stays in vregs/VMEM
    scale = 1.0 / jnp.sqrt(jnp.float32(DK))

    for l in range(N_LAYERS):                        # static unroll over layers
        # ---- sublayer 1: x + SelfAttention(LayerNorm(x)) ----
        h = _layer_norm(x, ln1g_ref[l], ln1b_ref[l])
        qkv = jnp.dot(h, wqkv_ref[l],
                      preferred_element_type=jnp.float32) + bqkv_ref[l]  # (B*S, 3D)
        q = qkv[:, 0 * D:1 * D]
        k = qkv[:, 1 * D:2 * D]
        v = qkv[:, 2 * D:3 * D]

        # TODO(synk): mask is None in this forward; a non-None mask would add a
        # jnp.where on the per-head scores below.
        for b in range(B):                           # static, 2 batch elements
            r0, r1 = b * S, (b + 1) * S
            qb, kb, vb = q[r0:r1], k[r0:r1], v[r0:r1]
            for hd in range(NUM_HEADS):              # static, 4 heads
                c0, c1 = hd * DK, (hd + 1) * DK
                qi, ki, vi = qb[:, c0:c1], kb[:, c0:c1], vb[:, c0:c1]
                s = jnp.dot(qi, ki.T,
                            preferred_element_type=jnp.float32) * scale   # (S, S)
                s = s - jnp.max(s, axis=-1, keepdims=True)
                p = jnp.exp(s)
                p = p * pl.reciprocal(jnp.sum(p, axis=-1, keepdims=True),
                                      approx=True)
                # write head context into its static column slice (no concat)
                ctx_ref[r0:r1, c0:c1] = jnp.dot(
                    p, vi, preferred_element_type=jnp.float32)

        attn_out = jnp.dot(ctx_ref[...], wo_ref[l],
                           preferred_element_type=jnp.float32) + bo_ref[l]
        x = x + attn_out

        # ---- sublayer 2: x + FFN(LayerNorm(x)) ----
        h2 = _layer_norm(x, ln2g_ref[l], ln2b_ref[l])
        ff = jnp.maximum(
            jnp.dot(h2, w1_ref[l], preferred_element_type=jnp.float32) + b1_ref[l],
            0.0)
        ff = jnp.dot(ff, w2_ref[l], preferred_element_type=jnp.float32) + b2_ref[l]
        x = x + ff

    o_ref[...] = x


_STACKED = ["ln1_g", "ln1_b", "wqkv", "bqkv", "wo", "bo",
            "ln2_g", "ln2_b", "w1", "b1", "w2", "b2"]


def _stack_params(params):
    """Fuse Wq/Wk/Wv per layer and stack all layers along a leading axis."""
    fused = []
    for p in params:
        fused.append({
            "ln1_g": p["ln1_g"], "ln1_b": p["ln1_b"],
            "wqkv": jnp.concatenate([p["wq"], p["wk"], p["wv"]], axis=1),
            "bqkv": jnp.concatenate([p["bq"], p["bk"], p["bv"]], axis=1),
            "wo": p["wo"], "bo": p["bo"],
            "ln2_g": p["ln2_g"], "ln2_b": p["ln2_b"],
            "w1": p["w1"], "b1": p["b1"],
            "w2": p["w2"], "b2": p["b2"],
        })
    return {n: jnp.stack([f[n] for f in fused], axis=0) for n in _STACKED}


@jax.jit
def encoder_forward(x, stacked):
    x2d = x.reshape(B * S, D)
    args = [stacked[n] for n in _STACKED]
    vmem = pl.BlockSpec(memory_space=pltpu.MemorySpace.VMEM)
    out = pl.pallas_call(
        encoder_kernel,
        out_shape=jax.ShapeDtypeStruct((B * S, D), jnp.float32),
        in_specs=[vmem] * (1 + len(args)),
        out_specs=vmem,
        scratch_shapes=[pltpu.VMEM((B * S, D), jnp.float32)],
    )(x2d, *args)
    return out.reshape(B, S, D)


# ---------------- pure-JAX reference (for correctness check) ----------------
def _ref_layer(x, p):
    def ln(v, g, b):
        mu = v.mean(-1, keepdims=True)
        var = ((v - mu) ** 2).mean(-1, keepdims=True)
        return (v - mu) / jnp.sqrt(var + EPS) * g + b
    h = ln(x, p["ln1_g"][0], p["ln1_b"][0])
    q = h @ p["wq"] + p["bq"][0]
    k = h @ p["wk"] + p["bk"][0]
    v = h @ p["wv"] + p["bv"][0]
    qh = q.reshape(B, S, NUM_HEADS, DK).transpose(0, 2, 1, 3)
    kh = k.reshape(B, S, NUM_HEADS, DK).transpose(0, 2, 1, 3)
    vh = v.reshape(B, S, NUM_HEADS, DK).transpose(0, 2, 1, 3)
    s = jnp.einsum("bhqd,bhkd->bhqk", qh, kh) / jnp.sqrt(jnp.float32(DK))
    a = jax.nn.softmax(s, axis=-1)
    c = jnp.einsum("bhqk,bhkd->bhqd", a, vh).transpose(0, 2, 1, 3).reshape(B, S, D)
    x = x + (c @ p["wo"] + p["bo"][0])
    h2 = ln(x, p["ln2_g"][0], p["ln2_b"][0])
    ff = jnp.maximum(h2 @ p["w1"] + p["b1"][0], 0.0) @ p["w2"] + p["b2"][0]
    return x + ff


def _ref_encoder(x, params):
    for p in params:
        x = _ref_layer(x, p)
    return x


# ---------------- deterministic parameter init ----------------
def init_params(key):
    keys = jax.random.split(key, 6)

    def nrm(k, shape, scale=0.05):
        return jax.random.normal(k, shape, jnp.float32) * scale

    layer = {
        "ln1_g": jnp.ones((1, D), jnp.float32),
        "ln1_b": jnp.zeros((1, D), jnp.float32),
        "wq": nrm(keys[0], (D, D)), "bq": jnp.zeros((1, D), jnp.float32),
        "wk": nrm(keys[1], (D, D)), "bk": jnp.zeros((1, D), jnp.float32),
        "wv": nrm(keys[2], (D, D)), "bv": jnp.zeros((1, D), jnp.float32),
        "wo": nrm(keys[3], (D, D)), "bo": jnp.zeros((1, D), jnp.float32),
        "ln2_g": jnp.ones((1, D), jnp.float32),
        "ln2_b": jnp.zeros((1, D), jnp.float32),
        "w1": nrm(keys[4], (D, D_FF)), "b1": jnp.zeros((1, D_FF), jnp.float32),
        "w2": nrm(keys[5], (D_FF, D)), "b2": jnp.zeros((1, D), jnp.float32),
    }
    # clones() deep-copies one layer N times -> identical initial weights.
    return [dict(layer) for _ in range(N_LAYERS)]


if __name__ == "__main__":
    key = jax.random.PRNGKey(0)
    k_x, k_p = jax.random.split(key)
    x = jax.random.normal(k_x, (B, S, D), jnp.float32)
    params = init_params(k_p)
    stacked = _stack_params(params)

    out = encoder_forward(x, stacked)
    out = jax.block_until_ready(out)

    ref = _ref_encoder(x, params)
    assert out.shape == (B, S, D)
    assert jnp.all(jnp.isfinite(out))
    # tolerance covers the approx-reciprocal softmax denominator (EUP path)
    assert jnp.allclose(out, ref, atol=1e-3, rtol=1e-3), \
        float(jnp.max(jnp.abs(out - ref)))

    print("KERNEL_OK")
</pallas_src>

<mosaic_0001>
module attributes {stable_mosaic.version = 11 : i64} {
  func.func @encoder_kernel(%arg0: memref<16x32xf32, #tpu.memory_space<vmem>>, %arg1: memref<4x1x32xf32, #tpu.memory_space<vmem>>, %arg2: memref<4x1x32xf32, #tpu.memory_space<vmem>>, %arg3: memref<4x32x96xf32, #tpu.memory_space<vmem>>, %arg4: memref<4x1x96xf32, #tpu.memory_space<vmem>>, %arg5: memref<4x32x32xf32, #tpu.memory_space<vmem>>, %arg6: memref<4x1x32xf32, #tpu.memory_space<vmem>>, %arg7: memref<4x1x32xf32, #tpu.memory_space<vmem>>, %arg8: memref<4x1x32xf32, #tpu.memory_space<vmem>>, %arg9: memref<4x32x64xf32, #tpu.memory_space<vmem>>, %arg10: memref<4x1x64xf32, #tpu.memory_space<vmem>>, %arg11: memref<4x64x32xf32, #tpu.memory_space<vmem>>, %arg12: memref<4x1x32xf32, #tpu.memory_space<vmem>>, %arg13: memref<16x32xf32, #tpu.memory_space<vmem>>, %arg14: memref<16x32xf32, #tpu.memory_space<vmem>>) attributes {dimension_semantics = [], scalar_prefetch = 0 : i64, scratch_operands = 1 : i64, tpu.core_type = #tpu.core_type<tc>} {
    %c0 = arith.constant 0 : index
    %c0_0 = arith.constant 0 : index
    %0 = vector.load %arg0[%c0, %c0_0] : memref<16x32xf32, #tpu.memory_space<vmem>>, vector<16x32xf32>
    %cst = arith.constant 8.000000e+00 : f32
    %1 = math.sqrt %cst : f32
    %cst_1 = arith.constant 1.000000e+00 : f32
    %2 = arith.divf %cst_1, %1 : f32
    %c0_2 = arith.constant 0 : index
    %c0_3 = arith.constant 0 : index
    %c0_4 = arith.constant 0 : index
    %3 = vector.load %arg1[%c0_2, %c0_3, %c0_4] : memref<4x1x32xf32, #tpu.memory_space<vmem>>, vector<1x1x32xf32>
    %4 = vector.shape_cast %3 : vector<1x1x32xf32> to vector<1x32xf32>
    %c0_5 = arith.constant 0 : index
    %c0_6 = arith.constant 0 : index
    %c0_7 = arith.constant 0 : index
    %5 = vector.load %arg2[%c0_5, %c0_6, %c0_7] : memref<4x1x32xf32, #tpu.memory_space<vmem>>, vector<1x1x32xf32>
    %6 = vector.shape_cast %5 : vector<1x1x32xf32> to vector<1x32xf32>
    %cst_8 = arith.constant dense<0.000000e+00> : vector<16xf32>
    %7 = vector.multi_reduction <add>, %0, %cst_8 [1] : vector<16x32xf32> to vector<16xf32>
    %8 = vector.shape_cast %7 : vector<16xf32> to vector<16x1xf32>
    %cst_9 = arith.constant 3.200000e+01 : f32
    %9 = vector.broadcast %cst_9 : f32 to vector<16x1xf32>
    %10 = arith.divf %8, %9 : vector<16x1xf32>
    %11 = vector.broadcast %10 : vector<16x1xf32> to vector<16x32xf32>
    %12 = arith.subf %0, %11 : vector<16x32xf32>
    %13 = arith.mulf %12, %12 : vector<16x32xf32>
    %cst_10 = arith.constant dense<0.000000e+00> : vector<16xf32>
    %14 = vector.multi_reduction <add>, %13, %cst_10 [1] : vector<16x32xf32> to vector<16xf32>
    %15 = vector.shape_cast %14 : vector<16xf32> to vector<16x1xf32>
    %cst_11 = arith.constant 3.200000e+01 : f32
    %16 = vector.broadcast %cst_11 : f32 to vector<16x1xf32>
    %17 = arith.divf %15, %16 : vector<16x1xf32>
    %18 = vector.broadcast %10 : vector<16x1xf32> to vector<16x32xf32>
    %19 = arith.subf %0, %18 : vector<16x32xf32>
    %cst_12 = arith.constant 9.99999997E-7 : f32
    %20 = vector.broadcast %cst_12 : f32 to vector<16x1xf32>
    %21 = arith.addf %17, %20 : vector<16x1xf32>
    %22 = math.rsqrt %21 : vector<16x1xf32>
    %23 = vector.broadcast %22 : vector<16x1xf32> to vector<16x32xf32>
    %24 = arith.mulf %19, %23 : vector<16x32xf32>
    %25 = vector.broadcast %4 : vector<1x32xf32> to vector<16x32xf32>
    %26 = arith.mulf %24, %25 : vector<16x32xf32>
    %27 = vector.broadcast %6 : vector<1x32xf32> to vector<16x32xf32>
    %28 = arith.addf %26, %27 : vector<16x32xf32>
    %c0_13 = arith.constant 0 : index
    %c0_14 = arith.constant 0 : index
    %c0_15 = arith.constant 0 : index
    %29 = vector.load %arg3[%c0_13, %c0_14, %c0_15] : memref<4x32x96xf32, #tpu.memory_space<vmem>>, vector<1x32x96xf32>
    %30 = vector.shape_cast %29 : vector<1x32x96xf32> to vector<32x96xf32>
    %cst_16 = arith.constant dense<0.000000e+00> : vector<16x96xf32>
    %31 = tpu.matmul %28, %30, %cst_16 {dimension_numbers = #tpu.dot_dimension_numbers<[1], [0], [0], [1], [0, 0, 1, 1], [], []>} : vector<16x32xf32>, vector<32x96xf32>, vector<16x96xf32> -> vector<16x96xf32>
    %c0_17 = arith.constant 0 : index
    %c0_18 = arith.constant 0 : index
    %c0_19 = arith.constant 0 : index
    %32 = vector.load %arg4[%c0_17, %c0_18, %c0_19] : memref<4x1x96xf32, #tpu.memory_space<vmem>>, vector<1x1x96xf32>
    %33 = vector.shape_cast %32 : vector<1x1x96xf32> to vector<1x96xf32>
    %34 = vector.broadcast %33 : vector<1x96xf32> to vector<16x96xf32>
    %35 = arith.addf %31, %34 : vector<16x96xf32>
    %36 = vector.extract_strided_slice %35 {offsets = [0, 0], sizes = [16, 32], strides = [1, 1]} : vector<16x96xf32> to vector<16x32xf32>
    %37 = vector.extract_strided_slice %35 {offsets = [0, 32], sizes = [16, 32], strides = [1, 1]} : vector<16x96xf32> to vector<16x32xf32>
    %38 = vector.extract_strided_slice %35 {offsets = [0, 64], sizes = [16, 32], strides = [1, 1]} : vector<16x96xf32> to vector<16x32xf32>
    %39 = vector.extract_strided_slice %36 {offsets = [0, 0], sizes = [8, 32], strides = [1, 1]} : vector<16x32xf32> to vector<8x32xf32>
    %40 = vector.extract_strided_slice %37 {offsets = [0, 0], sizes = [8, 32], strides = [1, 1]} : vector<16x32xf32> to vector<8x32xf32>
    %41 = vector.extract_strided_slice %38 {offsets = [0, 0], sizes = [8, 32], strides = [1, 1]} : vector<16x32xf32> to vector<8x32xf32>
    %42 = vector.extract_strided_slice %39 {offsets = [0, 0], sizes = [8, 8], strides = [1, 1]} : vector<8x32xf32> to vector<8x8xf32>
    %43 = vector.extract_strided_slice %40 {offsets = [0, 0], sizes = [8, 8], strides = [1, 1]} : vector<8x32xf32> to vector<8x8xf32>
    %44 = vector.extract_strided_slice %41 {offsets = [0, 0], sizes = [8, 8], strides = [1, 1]} : vector<8x32xf32> to vector<8x8xf32>
    %45 = tpu.transpose %43, [1, 0] : vector<8x8xf32> -> vector<8x8xf32>
    %cst_20 = arith.constant dense<0.000000e+00> : vector<8x8xf32>
    %46 = tpu.matmul %42, %45, %cst_20 {dimension_numbers = #tpu.dot_dimension_numbers<[1], [0], [0], [1], [0, 0, 1, 1], [], []>} : vector<8x8xf32>, vector<8x8xf32>, vector<8x8xf32> -> vector<8x8xf32>
    %47 = vector.broadcast %2 : f32 to vector<8x8xf32>
    %48 = arith.mulf %46, %47 : vector<8x8xf32>
    %cst_21 = arith.constant dense<0xFF800000> : vector<8xf32>
    %49 = vector.multi_reduction <maximumf>, %48, %cst_21 [1] : vector<8x8xf32> to vector<8xf32>
    %50 = vector.shape_cast %49 : vector<8xf32> to vector<8x1xf32>
    %51 = vector.broadcast %50 : vector<8x1xf32> to vector<8x8xf32>
    %52 = arith.subf %48, %51 : vector<8x8xf32>
    %53 = math.exp %52 : vector<8x8xf32>
    %cst_22 = arith.constant dense<0.000000e+00> : vector<8xf32>
    %54 = vector.multi_reduction <add>, %53, %cst_22 [1] : vector<8x8xf32> to vector<8xf32>
    %55 = vector.shape_cast %54 : vector<8xf32> to vector<8x1xf32>
    %56 = tpu.reciprocal %55 {approx = true} : vector<8x1xf32> -> vector<8x1xf32>
    %57 = vector.broadcast %56 : vector<8x1xf32> to vector<8x8xf32>
    %58 = arith.mulf %53, %57 : vector<8x8xf32>
    %cst_23 = arith.constant dense<0.000000e+00> : vector<8x8xf32>
    %59 = tpu.matmul %58, %44, %cst_23 {dimension_numbers = #tpu.dot_dimension_numbers<[1], [0], [0], [1], [0, 0, 1, 1], [], []>} : vector<8x8xf32>, vector<8x8xf32>, vector<8x8xf32> -> vector<8x8xf32>
    %c0_24 = arith.constant 0 : index
    %c0_25 = arith.constant 0 : index
    %60 = vector.load %arg14[%c0_24, %c0_25] : memref<16x32xf32, #tpu.memory_space<vmem>>, vector<8x8xf32>
    tpu.vector_store %arg14[%c0_24, %c0_25], %59 {strides = array<i32>} : memref<16x32xf32, #tpu.memory_space<vmem>>, vector<8x8xf32>,
    %61 = vector.extract_strided_slice %39 {offsets = [0, 8], sizes = [8, 8], strides = [1, 1]} : vector<8x32xf32> to vector<8x8xf32>
    %62 = vector.extract_strided_slice %40 {offsets = [0, 8], sizes = [8, 8], strides = [1, 1]} : vector<8x32xf32> to vector<8x8xf32>
    %63 = vector.extract_strided_slice %41 {offsets = [0, 8], sizes = [8, 8], strides = [1, 1]} : vector<8x32xf32> to vector<8x8xf32>
    %64 = tpu.transpose %62, [1, 0] : vector<8x8xf32> -> vector<8x8xf32>
    %cst_26 = arith.constant dense<0.000000e+00> : vector<8x8xf32>
    %65 = tpu.matmul %61, %64, %cst_26 {dimension_numbers = #tpu.dot_dimension_numbers<[1], [0], [0], [1], [0, 0, 1, 1], [], []>} : vector<8x8xf32>, vector<8x8xf32>, vector<8x8xf32> -> vector<8x8xf32>
    %66 = vector.broadcast %2 : f32 to vector<8x8xf32>
    %67 = arith.mulf %65, %66 : vector<8x8xf32>
    %cst_27 = arith.constant dense<0xFF800000> : vector<8xf32>
    %68 = vector.multi_reduction <maximumf>, %67, %cst_27 [1] : vector<8x8xf32> to vector<8xf32>
    %69 = vector.shape_cast %68 : vector<8xf32> to vector<8x1xf32>
    %70 = vector.broadcast %69 : vector<8x1xf32> to vector<8x8xf32>
    %71 = arith.subf %67, %70 : vector<8x8xf32>
    %72 = math.exp %71 : vector<8x8xf32>
    %cst_28 = arith.constant dense<0.000000e+00> : vector<8xf32>
    %73 = vector.multi_reduction <add>, %72, %cst_28 [1] : vector<8x8xf32> to vector<8xf32>
    %74 = vector.shape_cast %73 : vector<8xf32> to vector<8x1xf32>
    %75 = tpu.reciprocal %74 {approx = true} : vector<8x1xf32> -> vector<8x1xf32>
    %76 = vector.broadcast %75 : vector<8x1xf32> to vector<8x8xf32>
    %77 = arith.mulf %72, %76 : vector<8x8xf32>
    %cst_29 = arith.constant dense<0.000000e+00> : vector<8x8xf32>
    %78 = tpu.matmul %77, %63, %cst_29 {dimension_numbers = #tpu.dot_dimension_numbers<[1], [0], [0], [1], [0, 0, 1, 1], [], []>} : vector<8x8xf32>, vector<8x8xf32>, vector<8x8xf32> -> vector<8x8xf32>
    %c0_30 = arith.constant 0 : index
    %c8 = arith.constant 8 : index
    %79 = vector.load %arg14[%c0_30, %c8] : memref<16x32xf32, #tpu.memory_space<vmem>>, vector<8x8xf32>
    tpu.vector_store %arg14[%c0_30, %c8], %78 {strides = array<i32>} : memref<16x32xf32, #tpu.memory_space<vmem>>, vector<8x8xf32>,
    %80 = vector.extract_strided_slice %39 {offsets = [0, 16], sizes = [8, 8], strides = [1, 1]} : vector<8x32xf32> to vector<8x8xf32>
    %81 = vector.extract_strided_slice %40 {offsets = [0, 16], sizes = [8, 8], strides = [1, 1]} : vector<8x32xf32> to vector<8x8xf32>
    %82 = vector.extract_strided_slice %41 {offsets = [0, 16], sizes = [8, 8], strides = [1, 1]} : vector<8x32xf32> to vector<8x8xf32>
    %83 = tpu.transpose %81, [1, 0] : vector<8x8xf32> -> vector<8x8xf32>
    %cst_31 = arith.constant dense<0.000000e+00> : vector<8x8xf32>
    %84 = tpu.matmul %80, %83, %cst_31 {dimension_numbers = #tpu.dot_dimension_numbers<[1], [0], [0], [1], [0, 0, 1, 1], [], []>} : vector<8x8xf32>, vector<8x8xf32>, vector<8x8xf32> -> vector<8x8xf32>
    %85 = vector.broadcast %2 : f32 to vector<8x8xf32>
    %86 = arith.mulf %84, %85 : vector<8x8xf32>
    %cst_32 = arith.constant dense<0xFF800000> : vector<8xf32>
    %87 = vector.multi_reduction <maximumf>, %86, %cst_32 [1] : vector<8x8xf32> to vector<8xf32>
    %88 = vector.shape_cast %87 : vector<8xf32> to vector<8x1xf32>
    %89 = vector.broadcast %88 : vector<8x1xf32> to vector<8x8xf32>
    %90 = arith.subf %86, %89 : vector<8x8xf32>
    %91 = math.exp %90 : vector<8x8xf32>
    %cst_33 = arith.constant dense<0.000000e+00> : vector<8xf32>
    %92 = vector.multi_reduction <add>, %91, %cst_33 [1] : vector<8x8xf32> to vector<8xf32>
    %93 = vector.shape_cast %92 : vector<8xf32> to vector<8x1xf32>
    %94 = tpu.reciprocal %93 {approx = true} : vector<8x1xf32> -> vector<8x1xf32>
    %95 = vector.broadcast %94 : vector<8x1xf32> to vector<8x8xf32>
    %96 = arith.mulf %91, %95 : vector<8x8xf32>
    %cst_34 = arith.constant dense<0.000000e+00> : vector<8x8xf32>
    %97 = tpu.matmul %96, %82, %cst_34 {dimension_numbers = #tpu.dot_dimension_numbers<[1], [0], [0], [1], [0, 0, 1, 1], [], []>} : vector<8x8xf32>, vector<8x8xf32>, vector<8x8xf32> -> vector<8x8xf32>
    %c0_35 = arith.constant 0 : index
    %c16 = arith.constant 16 : index
    %98 = vector.load %arg14[%c0_35, %c16] : memref<16x32xf32, #tpu.memory_space<vmem>>, vector<8x8xf32>
    tpu.vector_store %arg14[%c0_35, %c16], %97 {strides = array<i32>} : memref<16x32xf32, #tpu.memory_space<vmem>>, vector<8x8xf32>,
    %99 = vector.extract_strided_slice %39 {offsets = [0, 24], sizes = [8, 8], strides = [1, 1]} : vector<8x32xf32> to vector<8x8xf32>
    %100 = vector.extract_strided_slice %40 {offsets = [0, 24], sizes = [8, 8], strides = [1, 1]} : vector<8x32xf32> to vector<8x8xf32>
    %101 = vector.extract_strided_slice %41 {offsets = [0, 24], sizes = [8, 8], strides = [1, 1]} : vector<8x32xf32> to vector<8x8xf32>
    %102 = tpu.transpose %100, [1, 0] : vector<8x8xf32> -> vector<8x8xf32>
    %cst_36 = arith.constant dense<0.000000e+00> : vector<8x8xf32>
    %103 = tpu.matmul %99, %102, %cst_36 {dimension_numbers = #tpu.dot_dimension_numbers<[1], [0], [0], [1], [0, 0, 1, 1], [], []>} : vector<8x8xf32>, vector<8x8xf32>, vector<8x8xf32> -> vector<8x8xf32>
    %104 = vector.broadcast %2 : f32 to vector<8x8xf32>
    %105 = arith.mulf %103, %104 : vector<8x8xf32>
    %cst_37 = arith.constant dense<0xFF800000> : vector<8xf32>
    %106 = vector.multi_reduction <maximumf>, %105, %cst_37 [1] : vector<8x8xf32> to vector<8xf32>
    %107 = vector.shape_cast %106 : vector<8xf32> to vector<8x1xf32>
    %108 = vector.broadcast %107 : vector<8x1xf32> to vector<8x8xf32>
    %109 = arith.subf %105, %108 : vector<8x8xf32>
    %110 = math.exp %109 : vector<8x8xf32>
    %cst_38 = arith.constant dense<0.000000e+00> : vector<8xf32>
    %111 = vector.multi_reduction <add>, %110, %cst_38 [1] : vector<8x8xf32> to vector<8xf32>
    %112 = vector.shape_cast %111 : vector<8xf32> to vector<8x1xf32>
    %113 = tpu.reciprocal %112 {approx = true} : vector<8x1xf32> -> vector<8x1xf32>
    %114 = vector.broadcast %113 : vector<8x1xf32> to vector<8x8xf32>
    %115 = arith.mulf %110, %114 : vector<8x8xf32>
    %cst_39 = arith.constant dense<0.000000e+00> : vector<8x8xf32>
    %116 = tpu.matmul %115, %101, %cst_39 {dimension_numbers = #tpu.dot_dimension_numbers<[1], [0], [0], [1], [0, 0, 1, 1], [], []>} : vector<8x8xf32>, vector<8x8xf32>, vector<8x8xf32> -> vector<8x8xf32>
    %c0_40 = arith.constant 0 : index
    %c24 = arith.constant 24 : index
    %117 = vector.load %arg14[%c0_40, %c24] : memref<16x32xf32, #tpu.memory_space<vmem>>, vector<8x8xf32>
    tpu.vector_store %arg14[%c0_40, %c24], %116 {strides = array<i32>} : memref<16x32xf32, #tpu.memory_space<vmem>>, vector<8x8xf32>,
    %118 = vector.extract_strided_slice %36 {offsets = [8, 0], sizes = [8, 32], strides = [1, 1]} : vector<16x32xf32> to vector<8x32xf32>
    %119 = vector.extract_strided_slice %37 {offsets = [8, 0], sizes = [8, 32], strides = [1, 1]} : vector<16x32xf32> to vector<8x32xf32>
    %120 = vector.extract_strided_slice %38 {offsets = [8, 0], sizes = [8, 32], strides = [1, 1]} : vector<16x32xf32> to vector<8x32xf32>
    %121 = vector.extract_strided_slice %118 {offsets = [0, 0], sizes = [8, 8], strides = [1, 1]} : vector<8x32xf32> to vector<8x8xf32>
    %122 = vector.extract_strided_slice %119 {offsets = [0, 0], sizes = [8, 8], strides = [1, 1]} : vector<8x32xf32> to vector<8x8xf32>
    %123 = vector.extract_strided_slice %120 {offsets = [0, 0], sizes = [8, 8], strides = [1, 1]} : vector<8x32xf32> to vector<8x8xf32>
    %124 = tpu.transpose %122, [1, 0] : vector<8x8xf32> -> vector<8x8xf32>
    %cst_41 = arith.constant dense<0.000000e+00> : vector<8x8xf32>
    %125 = tpu.matmul %121, %124, %cst_41 {dimension_numbers = #tpu.dot_dimension_numbers<[1], [0], [0], [1], [0, 0, 1, 1], [], []>} : vector<8x8xf32>, vector<8x8xf32>, vector<8x8xf32> -> vector<8x8xf32>
    %126 = vector.broadcast %2 : f32 to vector<8x8xf32>
    %127 = arith.mulf %125, %126 : vector<8x8xf32>
    %cst_42 = arith.constant dense<0xFF800000> : vector<8xf32>
    %128 = vector.multi_reduction <maximumf>, %127, %cst_42 [1] : vector<8x8xf32> to vector<8xf32>
    %129 = vector.shape_cast %128 : vector<8xf32> to vector<8x1xf32>
    %130 = vector.broadcast %129 : vector<8x1xf32> to vector<8x8xf32>
    %131 = arith.subf %127, %130 : vector<8x8xf32>
    %132 = math.exp %131 : vector<8x8xf32>
    %cst_43 = arith.constant dense<0.000000e+00> : vector<8xf32>
    %133 = vector.multi_reduction <add>, %132, %cst_43 [1] : vector<8x8xf32> to vector<8xf32>
    %134 = vector.shape_cast %133 : vector<8xf32> to vector<8x1xf32>
    %135 = tpu.reciprocal %134 {approx = true} : vector<8x1xf32> -> vector<8x1xf32>
    %136 = vector.broadcast %135 : vector<8x1xf32> to vector<8x8xf32>
    %137 = arith.mulf %132, %136 : vector<8x8xf32>
    %cst_44 = arith.constant dense<0.000000e+00> : vector<8x8xf32>
    %138 = tpu.matmul %137, %123, %cst_44 {dimension_numbers = #tpu.dot_dimension_numbers<[1], [0], [0], [1], [0, 0, 1, 1], [], []>} : vector<8x8xf32>, vector<8x8xf32>, vector<8x8xf32> -> vector<8x8xf32>
    %c8_45 = arith.constant 8 : index
    %c0_46 = arith.constant 0 : index
    %139 = vector.load %arg14[%c8_45, %c0_46] : memref<16x32xf32, #tpu.memory_space<vmem>>, vector<8x8xf32>
    tpu.vector_store %arg14[%c8_45, %c0_46], %138 {strides = array<i32>} : memref<16x32xf32, #tpu.memory_space<vmem>>, vector<8x8xf32>,
    %140 = vector.extract_strided_slice %118 {offsets = [0, 8], sizes = [8, 8], strides = [1, 1]} : vector<8x32xf32> to vector<8x8xf32>
    %141 = vector.extract_strided_slice %119 {offsets = [0, 8], sizes = [8, 8], strides = [1, 1]} : vector<8x32xf32> to vector<8x8xf32>
    %142 = vector.extract_strided_slice %120 {offsets = [0, 8], sizes = [8, 8], strides = [1, 1]} : vector<8x32xf32> to vector<8x8xf32>
    %143 = tpu.transpose %141, [1, 0] : vector<8x8xf32> -> vector<8x8xf32>
    %cst_47 = arith.constant dense<0.000000e+00> : vector<8x8xf32>
    %144 = tpu.matmul %140, %143, %cst_47 {dimension_numbers = #tpu.dot_dimension_numbers<[1], [0], [0], [1], [0, 0, 1, 1], [], []>} : vector<8x8xf32>, vector<8x8xf32>, vector<8x8xf32> -> vector<8x8xf32>
    %145 = vector.broadcast %2 : f32 to vector<8x8xf32>
    %146 = arith.mulf %144, %145 : vector<8x8xf32>
    %cst_48 = arith.constant dense<0xFF800000> : vector<8xf32>
    %147 = vector.multi_reduction <maximumf>, %146, %cst_48 [1] : vector<8x8xf32> to vector<8xf32>
    %148 = vector.shape_cast %147 : vector<8xf32> to vector<8x1xf32>
    %149 = vector.broadcast %148 : vector<8x1xf32> to vector<8x8xf32>
    %150 = arith.subf %146, %149 : vector<8x8xf32>
    %151 = math.exp %150 : vector<8x8xf32>
    %cst_49 = arith.constant dense<0.000000e+00> : vector<8xf32>
    %152 = vector.multi_reduction <add>, %151, %cst_49 [1] : vector<8x8xf32> to vector<8xf32>
    %153 = vector.shape_cast %152 : vector<8xf32> to vector<8x1xf32>
    %154 = tpu.reciprocal %153 {approx = true} : vector<8x1xf32> -> vector<8x1xf32>
    %155 = vector.broadcast %154 : vector<8x1xf32> to vector<8x8xf32>
    %156 = arith.mulf %151, %155 : vector<8x8xf32>
    %cst_50 = arith.constant dense<0.000000e+00> : vector<8x8xf32>
    %157 = tpu.matmul %156, %142, %cst_50 {dimension_numbers = #tpu.dot_dimension_numbers<[1], [0], [0], [1], [0, 0, 1, 1], [], []>} : vector<8x8xf32>, vector<8x8xf32>, vector<8x8xf32> -> vector<8x8xf32>
    %c8_51 = arith.constant 8 : index
    %c8_52 = arith.constant 8 : index
    %158 = vector.load %arg14[%c8_51, %c8_52] : memref<16x32xf32, #tpu.memory_space<vmem>>, vector<8x8xf32>
    tpu.vector_store %arg14[%c8_51, %c8_52], %157 {strides = array<i32>} : memref<16x32xf32, #tpu.memory_space<vmem>>, vector<8x8xf32>,
    %159 = vector.extract_strided_slice %118 {offsets = [0, 16], sizes = [8, 8], strides = [1, 1]} : vector<8x32xf32> to vector<8x8xf32>
    %160 = vector.extract_strided_slice %119 {offsets = [0, 16], sizes = [8, 8], strides = [1, 1]} : vector<8x32xf32> to vector<8x8xf32>
    %161 = vector.extract_strided_slice %120 {offsets = [0, 16], sizes = [8, 8], strides = [1, 1]} : vector<8x32xf32> to vector<8x8xf32>
    %162 = tpu.transpose %160, [1, 0] : vector<8x8xf32> -> vector<8x8xf32>
    %cst_53 = arith.constant dense<0.000000e+00> : vector<8x8xf32>
    %163 = tpu.matmul %159, %162, %cst_53 {dimension_numbers = #tpu.dot_dimension_numbers<[1], [0], [0], [1], [0, 0, 1, 1], [], []>} : vector<8x8xf32>, vector<8x8xf32>, vector<8x8xf32> -> vector<8x8xf32>
    %164 = vector.broadcast %2 : f32 to vector<8x8xf32>
    %165 = arith.mulf %163, %164 : vector<8x8xf32>
    %cst_54 = arith.constant dense<0xFF800000> : vector<8xf32>
    %166 = vector.multi_reduction <maximumf>, %165, %cst_54 [1] : vector<8x8xf32> to vector<8xf32>
    %167 = vector.shape_cast %166 : vector<8xf32> to vector<8x1xf32>
    %168 = vector.broadcast %167 : vector<8x1xf32> to vector<8x8xf32>
    %169 = arith.subf %165, %168 : vector<8x8xf32>
    %170 = math.exp %169 : vector<8x8xf32>
    %cst_55 = arith.constant dense<0.000000e+00> : vector<8xf32>
    %171 = vector.multi_reduction <add>, %170, %cst_55 [1] : vector<8x8xf32> to vector<8xf32>
    %172 = vector.shape_cast %171 : vector<8xf32> to vector<8x1xf32>
    %173 = tpu.reciprocal %172 {approx = true} : vector<8x1xf32> -> vector<8x1xf32>
    %174 = vector.broadcast %173 : vector<8x1xf32> to vector<8x8xf32>
    %175 = arith.mulf %170, %174 : vector<8x8xf32>
    %cst_56 = arith.constant dense<0.000000e+00> : vector<8x8xf32>
    %176 = tpu.matmul %175, %161, %cst_56 {dimension_numbers = #tpu.dot_dimension_numbers<[1], [0], [0], [1], [0, 0, 1, 1], [], []>} : vector<8x8xf32>, vector<8x8xf32>, vector<8x8xf32> -> vector<8x8xf32>
    %c8_57 = arith.constant 8 : index
    %c16_58 = arith.constant 16 : index
    %177 = vector.load %arg14[%c8_57, %c16_58] : memref<16x32xf32, #tpu.memory_space<vmem>>, vector<8x8xf32>
    tpu.vector_store %arg14[%c8_57, %c16_58], %176 {strides = array<i32>} : memref<16x32xf32, #tpu.memory_space<vmem>>, vector<8x8xf32>,
    %178 = vector.extract_strided_slice %118 {offsets = [0, 24], sizes = [8, 8], strides = [1, 1]} : vector<8x32xf32> to vector<8x8xf32>
    %179 = vector.extract_strided_slice %119 {offsets = [0, 24], sizes = [8, 8], strides = [1, 1]} : vector<8x32xf32> to vector<8x8xf32>
    %180 = vector.extract_strided_slice %120 {offsets = [0, 24], sizes = [8, 8], strides = [1, 1]} : vector<8x32xf32> to vector<8x8xf32>
    %181 = tpu.transpose %179, [1, 0] : vector<8x8xf32> -> vector<8x8xf32>
    %cst_59 = arith.constant dense<0.000000e+00> : vector<8x8xf32>
    %182 = tpu.matmul %178, %181, %cst_59 {dimension_numbers = #tpu.dot_dimension_numbers<[1], [0], [0], [1], [0, 0, 1, 1], [], []>} : vector<8x8xf32>, vector<8x8xf32>, vector<8x8xf32> -> vector<8x8xf32>
    %183 = vector.broadcast %2 : f32 to vector<8x8xf32>
    %184 = arith.mulf %182, %183 : vector<8x8xf32>
    %cst_60 = arith.constant dense<0xFF800000> : vector<8xf32>
    %185 = vector.multi_reduction <maximumf>, %184, %cst_60 [1] : vector<8x8xf32> to vector<8xf32>
    %186 = vector.shape_cast %185 : vector<8xf32> to vector<8x1xf32>
    %187 = vector.broadcast %186 : vector<8x1xf32> to vector<8x8xf32>
    %188 = arith.subf %184, %187 : vector<8x8xf32>
    %189 = math.exp %188 : vector<8x8xf32>
    %cst_61 = arith.constant dense<0.000000e+00> : vector<8xf32>
    %190 = vector.multi_reduction <add>, %189, %cst_61 [1] : vector<8x8xf32> to vector<8xf32>
    %191 = vector.shape_cast %190 : vector<8xf32> to vector<8x1xf32>
    %192 = tpu.reciprocal %191 {approx = true} : vector<8x1xf32> -> vector<8x1xf32>
    %193 = vector.broadcast %192 : vector<8x1xf32> to vector<8x8xf32>
    %194 = arith.mulf %189, %193 : vector<8x8xf32>
    %cst_62 = arith.constant dense<0.000000e+00> : vector<8x8xf32>
    %195 = tpu.matmul %194, %180, %cst_62 {dimension_numbers = #tpu.dot_dimension_numbers<[1], [0], [0], [1], [0, 0, 1, 1], [], []>} : vector<8x8xf32>, vector<8x8xf32>, vector<8x8xf32> -> vector<8x8xf32>
    %c8_63 = arith.constant 8 : index
    %c24_64 = arith.constant 24 : index
    %196 = vector.load %arg14[%c8_63, %c24_64] : memref<16x32xf32, #tpu.memory_space<vmem>>, vector<8x8xf32>
    tpu.vector_store %arg14[%c8_63, %c24_64], %195 {strides = array<i32>} : memref<16x32xf32, #tpu.memory_space<vmem>>, vector<8x8xf32>,
    %c0_65 = arith.constant 0 : index
    %c0_66 = arith.constant 0 : index
    %197 = vector.load %arg14[%c0_65, %c0_66] : memref<16x32xf32, #tpu.memory_space<vmem>>, vector<16x32xf32>
    %c0_67 = arith.constant 0 : index
    %c0_68 = arith.constant 0 : index
    %c0_69 = arith.constant 0 : index
    %198 = vector.load %arg5[%c0_67, %c0_68, %c0_69] : memref<4x32x32xf32, #tpu.memory_space<vmem>>, vector<1x32x32xf32>
    %199 = vector.shape_cast %198 : vector<1x32x32xf32> to vector<32x32xf32>
    %cst_70 = arith.constant dense<0.000000e+00> : vector<16x32xf32>
    %200 = tpu.matmul %197, %199, %cst_70 {dimension_numbers = #tpu.dot_dimension_numbers<[1], [0], [0], [1], [0, 0, 1, 1], [], []>} : vector<16x32xf32>, vector<32x32xf32>, vector<16x32xf32> -> vector<16x32xf32>
    %c0_71 = arith.constant 0 : index
    %c0_72 = arith.constant 0 : index
    %c0_73 = arith.constant 0 : index
    %201 = vector.load %arg6[%c0_71, %c0_72, %c0_73] : memref<4x1x32xf32, #tpu.memory_space<vmem>>, vector<1x1x32xf32>
    %202 = vector.shape_cast %201 : vector<1x1x32xf32> to vector<1x32xf32>
    %203 = vector.broadcast %202 : vector<1x32xf32> to vector<16x32xf32>
    %204 = arith.addf %200, %203 : vector<16x32xf32>
    %205 = arith.addf %0, %204 : vector<16x32xf32>
    %c0_74 = arith.constant 0 : index
    %c0_75 = arith.constant 0 : index
    %c0_76 = arith.constant 0 : index
    %206 = vector.load %arg7[%c0_74, %c0_75, %c0_76] : memref<4x1x32xf32, #tpu.memory_space<vmem>>, vector<1x1x32xf32>
    %207 = vector.shape_cast %206 : vector<1x1x32xf32> to vector<1x32xf32>
    %c0_77 = arith.constant 0 : index
    %c0_78 = arith.constant 0 : index
    %c0_79 = arith.constant 0 : index
    %208 = vector.load %arg8[%c0_77, %c0_78, %c0_79] : memref<4x1x32xf32, #tpu.memory_space<vmem>>, vector<1x1x32xf32>
    %209 = vector.shape_cast %208 : vector<1x1x32xf32> to vector<1x32xf32>
    %cst_80 = arith.constant dense<0.000000e+00> : vector<16xf32>
    %210 = vector.multi_reduction <add>, %205, %cst_80 [1] : vector<16x32xf32> to vector<16xf32>
    %211 = vector.shape_cast %210 : vector<16xf32> to vector<16x1xf32>
    %cst_81 = arith.constant 3.200000e+01 : f32
    %212 = vector.broadcast %cst_81 : f32 to vector<16x1xf32>
    %213 = arith.divf %211, %212 : vector<16x1xf32>
    %214 = vector.broadcast %213 : vector<16x1xf32> to vector<16x32xf32>
    %215 = arith.subf %205, %214 : vector<16x32xf32>
    %216 = arith.mulf %215, %215 : vector<16x32xf32>
    %cst_82 = arith.constant dense<0.000000e+00> : vector<16xf32>
    %217 = vector.multi_reduction <add>, %216, %cst_82 [1] : vector<16x32xf32> to vector<16xf32>
    %218 = vector.shape_cast %217 : vector<16xf32> to vector<16x1xf32>
    %cst_83 = arith.constant 3.200000e+01 : f32
    %219 = vector.broadcast %cst_83 : f32 to vector<16x1xf32>
    %220 = arith.divf %218, %219 : vector<16x1xf32>
    %221 = vector.broadcast %213 : vector<16x1xf32> to vector<16x32xf32>
    %222 = arith.subf %205, %221 : vector<16x32xf32>
    %cst_84 = arith.constant 9.99999997E-7 : f32
    %223 = vector.broadcast %cst_84 : f32 to vector<16x1xf32>
    %224 = arith.addf %220, %223 : vector<16x1xf32>
    %225 = math.rsqrt %224 : vector<16x1xf32>
    %226 = vector.broadcast %225 : vector<16x1xf32> to vector<16x32xf32>
    %227 = arith.mulf %222, %226 : vector<16x32xf32>
    %228 = vector.broadcast %207 : vector<1x32xf32> to vector<16x32xf32>
    %229 = arith.mulf %227, %228 : vector<16x32xf32>
    %230 = vector.broadcast %209 : vector<1x32xf32> to vector<16x32xf32>
    %231 = arith.addf %229, %230 : vector<16x32xf32>
    %c0_85 = arith.constant 0 : index
    %c0_86 = arith.constant 0 : index
    %c0_87 = arith.constant 0 : index
    %232 = vector.load %arg9[%c0_85, %c0_86, %c0_87] : memref<4x32x64xf32, #tpu.memory_space<vmem>>, vector<1x32x64xf32>
    %233 = vector.shape_cast %232 : vector<1x32x64xf32> to vector<32x64xf32>
    %cst_88 = arith.constant dense<0.000000e+00> : vector<16x64xf32>
    %234 = tpu.matmul %231, %233, %cst_88 {dimension_numbers = #tpu.dot_dimension_numbers<[1], [0], [0], [1], [0, 0, 1, 1], [], []>} : vector<16x32xf32>, vector<32x64xf32>, vector<16x64xf32> -> vector<16x64xf32>
    %c0_89 = arith.constant 0 : index
    %c0_90 = arith.constant 0 : index
    %c0_91 = arith.constant 0 : index
    %235 = vector.load %arg10[%c0_89, %c0_90, %c0_91] : memref<4x1x64xf32, #tpu.memory_space<vmem>>, vector<1x1x64xf32>
    %236 = vector.shape_cast %235 : vector<1x1x64xf32> to vector<1x64xf32>
    %237 = vector.broadcast %236 : vector<1x64xf32> to vector<16x64xf32>
    %238 = arith.addf %234, %237 : vector<16x64xf32>
    %cst_92 = arith.constant 0.000000e+00 : f32
    %239 = vector.broadcast %cst_92 : f32 to vector<16x64xf32>
    %240 = arith.maximumf %238, %239 : vector<16x64xf32>
    %c0_93 = arith.constant 0 : index
    %c0_94 = arith.constant 0 : index
    %c0_95 = arith.constant 0 : index
    %241 = vector.load %arg11[%c0_93, %c0_94, %c0_95] : memref<4x64x32xf32, #tpu.memory_space<vmem>>, vector<1x64x32xf32>
    %242 = vector.shape_cast %241 : vector<1x64x32xf32> to vector<64x32xf32>
    %cst_96 = arith.constant dense<0.000000e+00> : vector<16x32xf32>
    %243 = tpu.matmul %240, %242, %cst_96 {dimension_numbers = #tpu.dot_dimension_numbers<[1], [0], [0], [1], [0, 0, 1, 1], [], []>} : vector<16x64xf32>, vector<64x32xf32>, vector<16x32xf32> -> vector<16x32xf32>
    %c0_97 = arith.constant 0 : index
    %c0_98 = arith.constant 0 : index
    %c0_99 = arith.constant 0 : index
    %244 = vector.load %arg12[%c0_97, %c0_98, %c0_99] : memref<4x1x32xf32, #tpu.memory_space<vmem>>, vector<1x1x32xf32>
    %245 = vector.shape_cast %244 : vector<1x1x32xf32> to vector<1x32xf32>
    %246 = vector.broadcast %245 : vector<1x32xf32> to vector<16x32xf32>
    %247 = arith.addf %243, %246 : vector<16x32xf32>
    %248 = arith.addf %205, %247 : vector<16x32xf32>
    %c1 = arith.constant 1 : index
    %c0_100 = arith.constant 0 : index
    %c0_101 = arith.constant 0 : index
    %249 = vector.load %arg1[%c1, %c0_100, %c0_101] : memref<4x1x32xf32, #tpu.memory_space<vmem>>, vector<1x1x32xf32>
    %250 = vector.shape_cast %249 : vector<1x1x32xf32> to vector<1x32xf32>
    %c1_102 = arith.constant 1 : index
    %c0_103 = arith.constant 0 : index
    %c0_104 = arith.constant 0 : index
    %251 = vector.load %arg2[%c1_102, %c0_103, %c0_104] : memref<4x1x32xf32, #tpu.memory_space<vmem>>, vector<1x1x32xf32>
    %252 = vector.shape_cast %251 : vector<1x1x32xf32> to vector<1x32xf32>
    %cst_105 = arith.constant dense<0.000000e+00> : vector<16xf32>
    %253 = vector.multi_reduction <add>, %248, %cst_105 [1] : vector<16x32xf32> to vector<16xf32>
    %254 = vector.shape_cast %253 : vector<16xf32> to vector<16x1xf32>
    %cst_106 = arith.constant 3.200000e+01 : f32
    %255 = vector.broadcast %cst_106 : f32 to vector<16x1xf32>
    %256 = arith.divf %254, %255 : vector<16x1xf32>
    %257 = vector.broadcast %256 : vector<16x1xf32> to vector<16x32xf32>
    %258 = arith.subf %248, %257 : vector<16x32xf32>
    %259 = arith.mulf %258, %258 : vector<16x32xf32>
    %cst_107 = arith.constant dense<0.000000e+00> : vector<16xf32>
    %260 = vector.multi_reduction <add>, %259, %cst_107 [1] : vector<16x32xf32> to vector<16xf32>
    %261 = vector.shape_cast %260 : vector<16xf32> to vector<16x1xf32>
    %cst_108 = arith.constant 3.200000e+01 : f32
    %262 = vector.broadcast %cst_108 : f32 to vector<16x1xf32>
    %263 = arith.divf %261, %262 : vector<16x1xf32>
    %264 = vector.broadcast %256 : vector<16x1xf32> to vector<16x32xf32>
    %265 = arith.subf %248, %264 : vector<16x32xf32>
    %cst_109 = arith.constant 9.99999997E-7 : f32
    %266 = vector.broadcast %cst_109 : f32 to vector<16x1xf32>
    %267 = arith.addf %263, %266 : vector<16x1xf32>
    %268 = math.rsqrt %267 : vector<16x1xf32>
    %269 = vector.broadcast %268 : vector<16x1xf32> to vector<16x32xf32>
    %270 = arith.mulf %265, %269 : vector<16x32xf32>
    %271 = vector.broadcast %250 : vector<1x32xf32> to vector<16x32xf32>
    %272 = arith.mulf %270, %271 : vector<16x32xf32>
    %273 = vector.broadcast %252 : vector<1x32xf32> to vector<16x32xf32>
    %274 = arith.addf %272, %273 : vector<16x32xf32>
    %c1_110 = arith.constant 1 : index
    %c0_111 = arith.constant 0 : index
    %c0_112 = arith.constant 0 : index
    %275 = vector.load %arg3[%c1_110, %c0_111, %c0_112] : memref<4x32x96xf32, #tpu.memory_space<vmem>>, vector<1x32x96xf32>
    %276 = vector.shape_cast %275 : vector<1x32x96xf32> to vector<32x96xf32>
    %cst_113 = arith.constant dense<0.000000e+00> : vector<16x96xf32>
    %277 = tpu.matmul %274, %276, %cst_113 {dimension_numbers = #tpu.dot_dimension_numbers<[1], [0], [0], [1], [0, 0, 1, 1], [], []>} : vector<16x32xf32>, vector<32x96xf32>, vector<16x96xf32> -> vector<16x96xf32>
    %c1_114 = arith.constant 1 : index
    %c0_115 = arith.constant 0 : index
    %c0_116 = arith.constant 0 : index
    %278 = vector.load %arg4[%c1_114, %c0_115, %c0_116] : memref<4x1x96xf32, #tpu.memory_space<vmem>>, vector<1x1x96xf32>
    %279 = vector.shape_cast %278 : vector<1x1x96xf32> to vector<1x96xf32>
    %280 = vector.broadcast %279 : vector<1x96xf32> to vector<16x96xf32>
    %281 = arith.addf %277, %280 : vector<16x96xf32>
    %282 = vector.extract_strided_slice %281 {offsets = [0, 0], sizes = [16, 32], strides = [1, 1]} : vector<16x96xf32> to vector<16x32xf32>
    %283 = vector.extract_strided_slice %281 {offsets = [0, 32], sizes = [16, 32], strides = [1, 1]} : vector<16x96xf32> to vector<16x32xf32>
    %284 = vector.extract_strided_slice %281 {offsets = [0, 64], sizes = [16, 32], strides = [1, 1]} : vector<16x96xf32> to vector<16x32xf32>
    %285 = vector.extract_strided_slice %282 {offsets = [0, 0], sizes = [8, 32], strides = [1, 1]} : vector<16x32xf32> to vector<8x32xf32>
    %286 = vector.extract_strided_slice %283 {offsets = [0, 0], sizes = [8, 32], strides = [1, 1]} : vector<16x32xf32> to vector<8x32xf32>
    %287 = vector.extract_strided_slice %284 {offsets = [0, 0], sizes = [8, 32], strides = [1, 1]} : vector<16x32xf32> to vector<8x32xf32>
    %288 = vector.extract_strided_slice %285 {offsets = [0, 0], sizes = [8, 8], strides = [1, 1]} : vector<8x32xf32> to vector<8x8xf32>
    %289 = vector.extract_strided_slice %286 {offsets = [0, 0], sizes = [8, 8], strides = [1, 1]} : vector<8x32xf32> to vector<8x8xf32>
    %290 = vector.extract_strided_slice %287 {offsets = [0, 0], sizes = [8, 8], strides = [1, 1]} : vector<8x32xf32> to vector<8x8xf32>
    %291 = tpu.transpose %289, [1, 0] : vector<8x8xf32> -> vector<8x8xf32>
    %cst_117 = arith.constant dense<0.000000e+00> : vector<8x8xf32>
    %292 = tpu.matmul %288, %291, %cst_117 {dimension_numbers = #tpu.dot_dimension_numbers<[1], [0], [0], [1], [0, 0, 1, 1], [], []>} : vector<8x8xf32>, vector<8x8xf32>, vector<8x8xf32> -> vector<8x8xf32>
    %293 = vector.broadcast %2 : f32 to vector<8x8xf32>
    %294 = arith.mulf %292, %293 : vector<8x8xf32>
    %cst_118 = arith.constant dense<0xFF800000> : vector<8xf32>
    %295 = vector.multi_reduction <maximumf>, %294, %cst_118 [1] : vector<8x8xf32> to vector<8xf32>
    %296 = vector.shape_cast %295 : vector<8xf32> to vector<8x1xf32>
    %297 = vector.broadcast %296 : vector<8x1xf32> to vector<8x8xf32>
    %298 = arith.subf %294, %297 : vector<8x8xf32>
    %299 = math.exp %298 : vector<8x8xf32>
    %cst_119 = arith.constant dense<0.000000e+00> : vector<8xf32>
    %300 = vector.multi_reduction <add>, %299, %cst_119 [1] : vector<8x8xf32> to vector<8xf32>
    %301 = vector.shape_cast %300 : vector<8xf32> to vector<8x1xf32>
    %302 = tpu.reciprocal %301 {approx = true} : vector<8x1xf32> -> vector<8x1xf32>
    %303 = vector.broadcast %302 : vector<8x1xf32> to vector<8x8xf32>
    %304 = arith.mulf %299, %303 : vector<8x8xf32>
    %cst_120 = arith.constant dense<0.000000e+00> : vector<8x8xf32>
    %305 = tpu.matmul %304, %290, %cst_120 {dimension_numbers = #tpu.dot_dimension_numbers<[1], [0], [0], [1], [0, 0, 1, 1], [], []>} : vector<8x8xf32>, vector<8x8xf32>, vector<8x8xf32> -> vector<8x8xf32>
    %c0_121 = arith.constant 0 : index
    %c0_122 = arith.constant 0 : index
    %306 = vector.load %arg14[%c0_121, %c0_122] : memref<16x32xf32, #tpu.memory_space<vmem>>, vector<8x8xf32>
    tpu.vector_store %arg14[%c0_121, %c0_122], %305 {strides = array<i32>} : memref<16x32xf32, #tpu.memory_space<vmem>>, vector<8x8xf32>,
    %307 = vector.extract_strided_slice %285 {offsets = [0, 8], sizes = [8, 8], strides = [1, 1]} : vector<8x32xf32> to vector<8x8xf32>
    %308 = vector.extract_strided_slice %286 {offsets = [0, 8], sizes = [8, 8], strides = [1, 1]} : vector<8x32xf32> to vector<8x8xf32>
    %309 = vector.extract_strided_slice %287 {offsets = [0, 8], sizes = [8, 8], strides = [1, 1]} : vector<8x32xf32> to vector<8x8xf32>
    %310 = tpu.transpose %308, [1, 0] : vector<8x8xf32> -> vector<8x8xf32>
    %cst_123 = arith.constant dense<0.000000e+00> : vector<8x8xf32>
    %311 = tpu.matmul %307, %310, %cst_123 {dimension_numbers = #tpu.dot_dimension_numbers<[1], [0], [0], [1], [0, 0, 1, 1], [], []>} : vector<8x8xf32>, vector<8x8xf32>, vector<8x8xf32> -> vector<8x8xf32>
    %312 = vector.broadcast %2 : f32 to vector<8x8xf32>
    %313 = arith.mulf %311, %312 : vector<8x8xf32>
    %cst_124 = arith.constant dense<0xFF800000> : vector<8xf32>
    %314 = vector.multi_reduction <maximumf>, %313, %cst_124 [1] : vector<8x8xf32> to vector<8xf32>
    %315 = vector.shape_cast %314 : vector<8xf32> to vector<8x1xf32>
    %316 = vector.broadcast %315 : vector<8x1xf32> to vector<8x8xf32>
    %317 = arith.subf %313, %316 : vector<8x8xf32>
    %318 = math.exp %317 : vector<8x8xf32>
    %cst_125 = arith.constant dense<0.000000e+00> : vector<8xf32>
    %319 = vector.multi_reduction <add>, %318, %cst_125 [1] : vector<8x8xf32> to vector<8xf32>
    %320 = vector.shape_cast %319 : vector<8xf32> to vector<8x1xf32>
    %321 = tpu.reciprocal %320 {approx = true} : vector<8x1xf32> -> vector<8x1xf32>
    %322 = vector.broadcast %321 : vector<8x1xf32> to vector<8x8xf32>
    %323 = arith.mulf %318, %322 : vector<8x8xf32>
    %cst_126 = arith.constant dense<0.000000e+00> : vector<8x8xf32>
    %324 = tpu.matmul %323, %309, %cst_126 {dimension_numbers = #tpu.dot_dimension_numbers<[1], [0], [0], [1], [0, 0, 1, 1], [], []>} : vector<8x8xf32>, vector<8x8xf32>, vector<8x8xf32> -> vector<8x8xf32>
    %c0_127 = arith.constant 0 : index
    %c8_128 = arith.constant 8 : index
    %325 = vector.load %arg14[%c0_127, %c8_128] : memref<16x32xf32, #tpu.memory_space<vmem>>, vector<8x8xf32>
    tpu.vector_store %arg14[%c0_127, %c8_128], %324 {strides = array<i32>} : memref<16x32xf32, #tpu.memory_space<vmem>>, vector<8x8xf32>,
    %326 = vector.extract_strided_slice %285 {offsets = [0, 16], sizes = [8, 8], strides = [1, 1]} : vector<8x32xf32> to vector<8x8xf32>
    %327 = vector.extract_strided_slice %286 {offsets = [0, 16], sizes = [8, 8], strides = [1, 1]} : vector<8x32xf32> to vector<8x8xf32>
    %328 = vector.extract_strided_slice %287 {offsets = [0, 16], sizes = [8, 8], strides = [1, 1]} : vector<8x32xf32> to vector<8x8xf32>
    %329 = tpu.transpose %327, [1, 0] : vector<8x8xf32> -> vector<8x8xf32>
    %cst_129 = arith.constant dense<0.000000e+00> : vector<8x8xf32>
    %330 = tpu.matmul %326, %329, %cst_129 {dimension_numbers = #tpu.dot_dimension_numbers<[1], [0], [0], [1], [0, 0, 1, 1], [], []>} : vector<8x8xf32>, vector<8x8xf32>, vector<8x8xf32> -> vector<8x8xf32>
    %331 = vector.broadcast %2 : f32 to vector<8x8xf32>
    %332 = arith.mulf %330, %331 : vector<8x8xf32>
    %cst_130 = arith.constant dense<0xFF800000> : vector<8xf32>
    %333 = vector.multi_reduction <maximumf>, %332, %cst_130 [1] : vector<8x8xf32> to vector<8xf32>
    %334 = vector.shape_cast %333 : vector<8xf32> to vector<8x1xf32>
    %335 = vector.broadcast %334 : vector<8x1xf32> to vector<8x8xf32>
    %336 = arith.subf %332, %335 : vector<8x8xf32>
    %337 = math.exp %336 : vector<8x8xf32>
    %cst_131 = arith.constant dense<0.000000e+00> : vector<8xf32>
    %338 = vector.multi_reduction <add>, %337, %cst_131 [1] : vector<8x8xf32> to vector<8xf32>
    %339 = vector.shape_cast %338 : vector<8xf32> to vector<8x1xf32>
    %340 = tpu.reciprocal %339 {approx = true} : vector<8x1xf32> -> vector<8x1xf32>
    %341 = vector.broadcast %340 : vector<8x1xf32> to vector<8x8xf32>
    %342 = arith.mulf %337, %341 : vector<8x8xf32>
    %cst_132 = arith.constant dense<0.000000e+00> : vector<8x8xf32>
    %343 = tpu.matmul %342, %328, %cst_132 {dimension_numbers = #tpu.dot_dimension_numbers<[1], [0], [0], [1], [0, 0, 1, 1], [], []>} : vector<8x8xf32>, vector<8x8xf32>, vector<8x8xf32> -> vector<8x8xf32>
    %c0_133 = arith.constant 0 : index
    %c16_134 = arith.constant 16 : index
    %344 = vector.load %arg14[%c0_133, %c16_134] : memref<16x32xf32, #tpu.memory_space<vmem>>, vector<8x8xf32>
    tpu.vector_store %arg14[%c0_133, %c16_134], %343 {strides = array<i32>} : memref<16x32xf32, #tpu.memory_space<vmem>>, vector<8x8xf32>,
    %345 = vector.extract_strided_slice %285 {offsets = [0, 24], sizes = [8, 8], strides = [1, 1]} : vector<8x32xf32> to vector<8x8xf32>
    %346 = vector.extract_strided_slice %286 {offsets = [0, 24], sizes = [8, 8], strides = [1, 1]} : vector<8x32xf32> to vector<8x8xf32>
    %347 = vector.extract_strided_slice %287 {offsets = [0, 24], sizes = [8, 8], strides = [1, 1]} : vector<8x32xf32> to vector<8x8xf32>
    %348 = tpu.transpose %346, [1, 0] : vector<8x8xf32> -> vector<8x8xf32>
    %cst_135 = arith.constant dense<0.000000e+00> : vector<8x8xf32>
    %349 = tpu.matmul %345, %348, %cst_135 {dimension_numbers = #tpu.dot_dimension_numbers<[1], [0], [0], [1], [0, 0, 1, 1], [], []>} : vector<8x8xf32>, vector<8x8xf32>, vector<8x8xf32> -> vector<8x8xf32>
    %350 = vector.broadcast %2 : f32 to vector<8x8xf32>
    %351 = arith.mulf %349, %350 : vector<8x8xf32>
    %cst_136 = arith.constant dense<0xFF800000> : vector<8xf32>
    %352 = vector.multi_reduction <maximumf>, %351, %cst_136 [1] : vector<8x8xf32> to vector<8xf32>
    %353 = vector.shape_cast %352 : vector<8xf32> to vector<8x1xf32>
    %354 = vector.broadcast %353 : vector<8x1xf32> to vector<8x8xf32>
    %355 = arith.subf %351, %354 : vector<8x8xf32>
    %356 = math.exp %355 : vector<8x8xf32>
    %cst_137 = arith.constant dense<0.000000e+00> : vector<8xf32>
    %357 = vector.multi_reduction <add>, %356, %cst_137 [1] : vector<8x8xf32> to vector<8xf32>
    %358 = vector.shape_cast %357 : vector<8xf32> to vector<8x1xf32>
    %359 = tpu.reciprocal %358 {approx = true} : vector<8x1xf32> -> vector<8x1xf32>
    %360 = vector.broadcast %359 : vector<8x1xf32> to vector<8x8xf32>
    %361 = arith.mulf %356, %360 : vector<8x8xf32>
    %cst_138 = arith.constant dense<0.000000e+00> : vector<8x8xf32>
    %362 = tpu.matmul %361, %347, %cst_138 {dimension_numbers = #tpu.dot_dimension_numbers<[1], [0], [0], [1], [0, 0, 1, 1], [], []>} : vector<8x8xf32>, vector<8x8xf32>, vector<8x8xf32> -> vector<8x8xf32>
    %c0_139 = arith.constant 0 : index
    %c24_140 = arith.constant 24 : index
    %363 = vector.load %arg14[%c0_139, %c24_140] : memref<16x32xf32, #tpu.memory_space<vmem>>, vector<8x8xf32>
    tpu.vector_store %arg14[%c0_139, %c24_140], %362 {strides = array<i32>} : memref<16x32xf32, #tpu.memory_space<vmem>>, vector<8x8xf32>,
    %364 = vector.extract_strided_slice %282 {offsets = [8, 0], sizes = [8, 32], strides = [1, 1]} : vector<16x32xf32> to vector<8x32xf32>
    %365 = vector.extract_strided_slice %283 {offsets = [8, 0], sizes = [8, 32], strides = [1, 1]} : vector<16x32xf32> to vector<8x32xf32>
    %366 = vector.extract_strided_slice %284 {offsets = [8, 0], sizes = [8, 32], strides = [1, 1]} : vector<16x32xf32> to vector<8x32xf32>
    %367 = vector.extract_strided_slice %364 {offsets = [0, 0], sizes = [8, 8], strides = [1, 1]} : vector<8x32xf32> to vector<8x8xf32>
    %368 = vector.extract_strided_slice %365 {offsets = [0, 0], sizes = [8, 8], strides = [1, 1]} : vector<8x32xf32> to vector<8x8xf32>
    %369 = vector.extract_strided_slice %366 {offsets = [0, 0], sizes = [8, 8], strides = [1, 1]} : vector<8x32xf32> to vector<8x8xf32>
    %370 = tpu.transpose %368, [1, 0] : vector<8x8xf32> -> vector<8x8xf32>
    %cst_141 = arith.constant dense<0.000000e+00> : vector<8x8xf32>
    %371 = tpu.matmul %367, %370, %cst_141 {dimension_numbers = #tpu.dot_dimension_numbers<[1], [0], [0], [1], [0, 0, 1, 1], [], []>} : vector<8x8xf32>, vector<8x8xf32>, vector<8x8xf32> -> vector<8x8xf32>
    %372 = vector.broadcast %2 : f32 to vector<8x8xf32>
    %373 = arith.mulf %371, %372 : vector<8x8xf32>
    %cst_142 = arith.constant dense<0xFF800000> : vector<8xf32>
    %374 = vector.multi_reduction <maximumf>, %373, %cst_142 [1] : vector<8x8xf32> to vector<8xf32>
    %375 = vector.shape_cast %374 : vector<8xf32> to vector<8x1xf32>
    %376 = vector.broadcast %375 : vector<8x1xf32> to vector<8x8xf32>
    %377 = arith.subf %373, %376 : vector<8x8xf32>
    %378 = math.exp %377 : vector<8x8xf32>
    %cst_143 = arith.constant dense<0.000000e+00> : vector<8xf32>
    %379 = vector.multi_reduction <add>, %378, %cst_143 [1] : vector<8x8xf32> to vector<8xf32>
    %380 = vector.shape_cast %379 : vector<8xf32> to vector<8x1xf32>
    %381 = tpu.reciprocal %380 {approx = true} : vector<8x1xf32> -> vector<8x1xf32>
    %382 = vector.broadcast %381 : vector<8x1xf32> to vector<8x8xf32>
    %383 = arith.mulf %378, %382 : vector<8x8xf32>
    %cst_144 = arith.constant dense<0.000000e+00> : vector<8x8xf32>
    %384 = tpu.matmul %383, %369, %cst_144 {dimension_numbers = #tpu.dot_dimension_numbers<[1], [0], [0], [1], [0, 0, 1, 1], [], []>} : vector<8x8xf32>, vector<8x8xf32>, vector<8x8xf32> -> vector<8x8xf32>
    %c8_145 = arith.constant 8 : index
    %c0_146 = arith.constant 0 : index
    %385 = vector.load %arg14[%c8_145, %c0_146] : memref<16x32xf32, #tpu.memory_space<vmem>>, vector<8x8xf32>
    tpu.vector_store %arg14[%c8_145, %c0_146], %384 {strides = array<i32>} : memref<16x32xf32, #tpu.memory_space<vmem>>, vector<8x8xf32>,
    %386 = vector.extract_strided_slice %364 {offsets = [0, 8], sizes = [8, 8], strides = [1, 1]} : vector<8x32xf32> to vector<8x8xf32>
    %387 = vector.extract_strided_slice %365 {offsets = [0, 8], sizes = [8, 8], strides = [1, 1]} : vector<8x32xf32> to vector<8x8xf32>
    %388 = vector.extract_strided_slice %366 {offsets = [0, 8], sizes = [8, 8], strides = [1, 1]} : vector<8x32xf32> to vector<8x8xf32>
    %389 = tpu.transpose %387, [1, 0] : vector<8x8xf32> -> vector<8x8xf32>
    %cst_147 = arith.constant dense<0.000000e+00> : vector<8x8xf32>
    %390 = tpu.matmul %386, %389, %cst_147 {dimension_numbers = #tpu.dot_dimension_numbers<[1], [0], [0], [1], [0, 0, 1, 1], [], []>} : vector<8x8xf32>, vector<8x8xf32>, vector<8x8xf32> -> vector<8x8xf32>
    %391 = vector.broadcast %2 : f32 to vector<8x8xf32>
    %392 = arith.mulf %390, %391 : vector<8x8xf32>
    %cst_148 = arith.constant dense<0xFF800000> : vector<8xf32>
    %393 = vector.multi_reduction <maximumf>, %392, %cst_148 [1] : vector<8x8xf32> to vector<8xf32>
    %394 = vector.shape_cast %393 : vector<8xf32> to vector<8x1xf32>
    %395 = vector.broadcast %394 : vector<8x1xf32> to vector<8x8xf32>
    %396 = arith.subf %392, %395 : vector<8x8xf32>
    %397 = math.exp %396 : vector<8x8xf32>
    %cst_149 = arith.constant dense<0.000000e+00> : vector<8xf32>
    %398 = vector.multi_reduction <add>, %397, %cst_149 [1] : vector<8x8xf32> to vector<8xf32>
    %399 = vector.shape_cast %398 : vector<8xf32> to vector<8x1xf32>
    %400 = tpu.reciprocal %399 {approx = true} : vector<8x1xf32> -> vector<8x1xf32>
    %401 = vector.broadcast %400 : vector<8x1xf32> to vector<8x8xf32>
    %402 = arith.mulf %397, %401 : vector<8x8xf32>
    %cst_150 = arith.constant dense<0.000000e+00> : vector<8x8xf32>
    %403 = tpu.matmul %402, %388, %cst_150 {dimension_numbers = #tpu.dot_dimension_numbers<[1], [0], [0], [1], [0, 0, 1, 1], [], []>} : vector<8x8xf32>, vector<8x8xf32>, vector<8x8xf32> -> vector<8x8xf32>
    %c8_151 = arith.constant 8 : index
    %c8_152 = arith.constant 8 : index
    %404 = vector.load %arg14[%c8_151, %c8_152] : memref<16x32xf32, #tpu.memory_space<vmem>>, vector<8x8xf32>
    tpu.vector_store %arg14[%c8_151, %c8_152], %403 {strides = array<i32>} : memref<16x32xf32, #tpu.memory_space<vmem>>, vector<8x8xf32>,
    %405 = vector.extract_strided_slice %364 {offsets = [0, 16], sizes = [8, 8], strides = [1, 1]} : vector<8x32xf32> to vector<8x8xf32>
    %406 = vector.extract_strided_slice %365 {offsets = [0, 16], sizes = [8, 8], strides = [1, 1]} : vector<8x32xf32> to vector<8x8xf32>
    %407 = vector.extract_strided_slice %366 {offsets = [0, 16], sizes = [8, 8], strides = [1, 1]} : vector<8x32xf32> to vector<8x8xf32>
    %408 = tpu.transpose %406, [1, 0] : vector<8x8xf32> -> vector<8x8xf32>
    %cst_153 = arith.constant dense<0.000000e+00> : vector<8x8xf32>
    %409 = tpu.matmul %405, %408, %cst_153 {dimension_numbers = #tpu.dot_dimension_numbers<[1], [0], [0], [1], [0, 0, 1, 1], [], []>} : vector<8x8xf32>, vector<8x8xf32>, vector<8x8xf32> -> vector<8x8xf32>
    %410 = vector.broadcast %2 : f32 to vector<8x8xf32>
    %411 = arith.mulf %409, %410 : vector<8x8xf32>
    %cst_154 = arith.constant dense<0xFF800000> : vector<8xf32>
    %412 = vector.multi_reduction <maximumf>, %411, %cst_154 [1] : vector<8x8xf32> to vector<8xf32>
    %413 = vector.shape_cast %412 : vector<8xf32> to vector<8x1xf32>
    %414 = vector.broadcast %413 : vector<8x1xf32> to vector<8x8xf32>
    %415 = arith.subf %411, %414 : vector<8x8xf32>
    %416 = math.exp %415 : vector<8x8xf32>
    %cst_155 = arith.constant dense<0.000000e+00> : vector<8xf32>
    %417 = vector.multi_reduction <add>, %416, %cst_155 [1] : vector<8x8xf32> to vector<8xf32>
    %418 = vector.shape_cast %417 : vector<8xf32> to vector<8x1xf32>
    %419 = tpu.reciprocal %418 {approx = true} : vector<8x1xf32> -> vector<8x1xf32>
    %420 = vector.broadcast %419 : vector<8x1xf32> to vector<8x8xf32>
    %421 = arith.mulf %416, %420 : vector<8x8xf32>
    %cst_156 = arith.constant dense<0.000000e+00> : vector<8x8xf32>
    %422 = tpu.matmul %421, %407, %cst_156 {dimension_numbers = #tpu.dot_dimension_numbers<[1], [0], [0], [1], [0, 0, 1, 1], [], []>} : vector<8x8xf32>, vector<8x8xf32>, vector<8x8xf32> -> vector<8x8xf32>
    %c8_157 = arith.constant 8 : index
    %c16_158 = arith.constant 16 : index
    %423 = vector.load %arg14[%c8_157, %c16_158] : memref<16x32xf32, #tpu.memory_space<vmem>>, vector<8x8xf32>
    tpu.vector_store %arg14[%c8_157, %c16_158], %422 {strides = array<i32>} : memref<16x32xf32, #tpu.memory_space<vmem>>, vector<8x8xf32>,
    %424 = vector.extract_strided_slice %364 {offsets = [0, 24], sizes = [8, 8], strides = [1, 1]} : vector<8x32xf32> to vector<8x8xf32>
    %425 = vector.extract_strided_slice %365 {offsets = [0, 24], sizes = [8, 8], strides = [1, 1]} : vector<8x32xf32> to vector<8x8xf32>
    %426 = vector.extract_strided_slice %366 {offsets = [0, 24], sizes = [8, 8], strides = [1, 1]} : vector<8x32xf32> to vector<8x8xf32>
    %427 = tpu.transpose %425, [1, 0] : vector<8x8xf32> -> vector<8x8xf32>
    %cst_159 = arith.constant dense<0.000000e+00> : vector<8x8xf32>
    %428 = tpu.matmul %424, %427, %cst_159 {dimension_numbers = #tpu.dot_dimension_numbers<[1], [0], [0], [1], [0, 0, 1, 1], [], []>} : vector<8x8xf32>, vector<8x8xf32>, vector<8x8xf32> -> vector<8x8xf32>
    %429 = vector.broadcast %2 : f32 to vector<8x8xf32>
    %430 = arith.mulf %428, %429 : vector<8x8xf32>
    %cst_160 = arith.constant dense<0xFF800000> : vector<8xf32>
    %431 = vector.multi_reduction <maximumf>, %430, %cst_160 [1] : vector<8x8xf32> to vector<8xf32>
    %432 = vector.shape_cast %431 : vector<8xf32> to vector<8x1xf32>
    %433 = vector.broadcast %432 : vector<8x1xf32> to vector<8x8xf32>
    %434 = arith.subf %430, %433 : vector<8x8xf32>
    %435 = math.exp %434 : vector<8x8xf32>
    %cst_161 = arith.constant dense<0.000000e+00> : vector<8xf32>
    %436 = vector.multi_reduction <add>, %435, %cst_161 [1] : vector<8x8xf32> to vector<8xf32>
    %437 = vector.shape_cast %436 : vector<8xf32> to vector<8x1xf32>
    %438 = tpu.reciprocal %437 {approx = true} : vector<8x1xf32> -> vector<8x1xf32>
    %439 = vector.broadcast %438 : vector<8x1xf32> to vector<8x8xf32>
    %440 = arith.mulf %435, %439 : vector<8x8xf32>
    %cst_162 = arith.constant dense<0.000000e+00> : vector<8x8xf32>
    %441 = tpu.matmul %440, %426, %cst_162 {dimension_numbers = #tpu.dot_dimension_numbers<[1], [0], [0], [1], [0, 0, 1, 1], [], []>} : vector<8x8xf32>, vector<8x8xf32>, vector<8x8xf32> -> vector<8x8xf32>
    %c8_163 = arith.constant 8 : index
    %c24_164 = arith.constant 24 : index
    %442 = vector.load %arg14[%c8_163, %c24_164] : memref<16x32xf32, #tpu.memory_space<vmem>>, vector<8x8xf32>
    tpu.vector_store %arg14[%c8_163, %c24_164], %441 {strides = array<i32>} : memref<16x32xf32, #tpu.memory_space<vmem>>, vector<8x8xf32>,
    %c0_165 = arith.constant 0 : index
    %c0_166 = arith.constant 0 : index
    %443 = vector.load %arg14[%c0_165, %c0_166] : memref<16x32xf32, #tpu.memory_space<vmem>>, vector<16x32xf32>
    %c1_167 = arith.constant 1 : index
    %c0_168 = arith.constant 0 : index
    %c0_169 = arith.constant 0 : index
    %444 = vector.load %arg5[%c1_167, %c0_168, %c0_169] : memref<4x32x32xf32, #tpu.memory_space<vmem>>, vector<1x32x32xf32>
    %445 = vector.shape_cast %444 : vector<1x32x32xf32> to vector<32x32xf32>
    %cst_170 = arith.constant dense<0.000000e+00> : vector<16x32xf32>
    %446 = tpu.matmul %443, %445, %cst_170 {dimension_numbers = #tpu.dot_dimension_numbers<[1], [0], [0], [1], [0, 0, 1, 1], [], []>} : vector<16x32xf32>, vector<32x32xf32>, vector<16x32xf32> -> vector<16x32xf32>
    %c1_171 = arith.constant 1 : index
    %c0_172 = arith.constant 0 : index
    %c0_173 = arith.constant 0 : index
    %447 = vector.load %arg6[%c1_171, %c0_172, %c0_173] : memref<4x1x32xf32, #tpu.memory_space<vmem>>, vector<1x1x32xf32>
    %448 = vector.shape_cast %447 : vector<1x1x32xf32> to vector<1x32xf32>
    %449 = vector.broadcast %448 : vector<1x32xf32> to vector<16x32xf32>
    %450 = arith.addf %446, %449 : vector<16x32xf32>
    %451 = arith.addf %248, %450 : vector<16x32xf32>
    %c1_174 = arith.constant 1 : index
    %c0_175 = arith.constant 0 : index
    %c0_176 = arith.constant 0 : index
    %452 = vector.load %arg7[%c1_174, %c0_175, %c0_176] : memref<4x1x32xf32, #tpu.memory_space<vmem>>, vector<1x1x32xf32>
    %453 = vector.shape_cast %452 : vector<1x1x32xf32> to vector<1x32xf32>
    %c1_177 = arith.constant 1 : index
    %c0_178 = arith.constant 0 : index
    %c0_179 = arith.constant 0 : index
    %454 = vector.load %arg8[%c1_177, %c0_178, %c0_179] : memref<4x1x32xf32, #tpu.memory_space<vmem>>, vector<1x1x32xf32>
    %455 = vector.shape_cast %454 : vector<1x1x32xf32> to vector<1x32xf32>
    %cst_180 = arith.constant dense<0.000000e+00> : vector<16xf32>
    %456 = vector.multi_reduction <add>, %451, %cst_180 [1] : vector<16x32xf32> to vector<16xf32>
    %457 = vector.shape_cast %456 : vector<16xf32> to vector<16x1xf32>
    %cst_181 = arith.constant 3.200000e+01 : f32
    %458 = vector.broadcast %cst_181 : f32 to vector<16x1xf32>
    %459 = arith.divf %457, %458 : vector<16x1xf32>
    %460 = vector.broadcast %459 : vector<16x1xf32> to vector<16x32xf32>
    %461 = arith.subf %451, %460 : vector<16x32xf32>
    %462 = arith.mulf %461, %461 : vector<16x32xf32>
    %cst_182 = arith.constant dense<0.000000e+00> : vector<16xf32>
    %463 = vector.multi_reduction <add>, %462, %cst_182 [1] : vector<16x32xf32> to vector<16xf32>
    %464 = vector.shape_cast %463 : vector<16xf32> to vector<16x1xf32>
    %cst_183 = arith.constant 3.200000e+01 : f32
    %465 = vector.broadcast %cst_183 : f32 to vector<16x1xf32>
    %466 = arith.divf %464, %465 : vector<16x1xf32>
    %467 = vector.broadcast %459 : vector<16x1xf32> to vector<16x32xf32>
    %468 = arith.subf %451, %467 : vector<16x32xf32>
    %cst_184 = arith.constant 9.99999997E-7 : f32
    %469 = vector.broadcast %cst_184 : f32 to vector<16x1xf32>
    %470 = arith.addf %466, %469 : vector<16x1xf32>
    %471 = math.rsqrt %470 : vector<16x1xf32>
    %472 = vector.broadcast %471 : vector<16x1xf32> to vector<16x32xf32>
    %473 = arith.mulf %468, %472 : vector<16x32xf32>
    %474 = vector.broadcast %453 : vector<1x32xf32> to vector<16x32xf32>
    %475 = arith.mulf %473, %474 : vector<16x32xf32>
    %476 = vector.broadcast %455 : vector<1x32xf32> to vector<16x32xf32>
    %477 = arith.addf %475, %476 : vector<16x32xf32>
    %c1_185 = arith.constant 1 : index
    %c0_186 = arith.constant 0 : index
    %c0_187 = arith.constant 0 : index
    %478 = vector.load %arg9[%c1_185, %c0_186, %c0_187] : memref<4x32x64xf32, #tpu.memory_space<vmem>>, vector<1x32x64xf32>
    %479 = vector.shape_cast %478 : vector<1x32x64xf32> to vector<32x64xf32>
    %cst_188 = arith.constant dense<0.000000e+00> : vector<16x64xf32>
    %480 = tpu.matmul %477, %479, %cst_188 {dimension_numbers = #tpu.dot_dimension_numbers<[1], [0], [0], [1], [0, 0, 1, 1], [], []>} : vector<16x32xf32>, vector<32x64xf32>, vector<16x64xf32> -> vector<16x64xf32>
    %c1_189 = arith.constant 1 : index
    %c0_190 = arith.constant 0 : index
    %c0_191 = arith.constant 0 : index
    %481 = vector.load %arg10[%c1_189, %c0_190, %c0_191] : memref<4x1x64xf32, #tpu.memory_space<vmem>>, vector<1x1x64xf32>
    %482 = vector.shape_cast %481 : vector<1x1x64xf32> to vector<1x64xf32>
    %483 = vector.broadcast %482 : vector<1x64xf32> to vector<16x64xf32>
    %484 = arith.addf %480, %483 : vector<16x64xf32>
    %cst_192 = arith.constant 0.000000e+00 : f32
    %485 = vector.broadcast %cst_192 : f32 to vector<16x64xf32>
    %486 = arith.maximumf %484, %485 : vector<16x64xf32>
    %c1_193 = arith.constant 1 : index
    %c0_194 = arith.constant 0 : index
    %c0_195 = arith.constant 0 : index
    %487 = vector.load %arg11[%c1_193, %c0_194, %c0_195] : memref<4x64x32xf32, #tpu.memory_space<vmem>>, vector<1x64x32xf32>
    %488 = vector.shape_cast %487 : vector<1x64x32xf32> to vector<64x32xf32>
    %cst_196 = arith.constant dense<0.000000e+00> : vector<16x32xf32>
    %489 = tpu.matmul %486, %488, %cst_196 {dimension_numbers = #tpu.dot_dimension_numbers<[1], [0], [0], [1], [0, 0, 1, 1], [], []>} : vector<16x64xf32>, vector<64x32xf32>, vector<16x32xf32> -> vector<16x32xf32>
    %c1_197 = arith.constant 1 : index
    %c0_198 = arith.constant 0 : index
    %c0_199 = arith.constant 0 : index
    %490 = vector.load %arg12[%c1_197, %c0_198, %c0_199] : memref<4x1x32xf32, #tpu.memory_space<vmem>>, vector<1x1x32xf32>
    %491 = vector.shape_cast %490 : vector<1x1x32xf32> to vector<1x32xf32>
    %492 = vector.broadcast %491 : vector<1x32xf32> to vector<16x32xf32>
    %493 = arith.addf %489, %492 : vector<16x32xf32>
    %494 = arith.addf %451, %493 : vector<16x32xf32>
    %c2 = arith.constant 2 : index
    %c0_200 = arith.constant 0 : index
    %c0_201 = arith.constant 0 : index
    %495 = vector.load %arg1[%c2, %c0_200, %c0_201] : memref<4x1x32xf32, #tpu.memory_space<vmem>>, vector<1x1x32xf32>
    %496 = vector.shape_cast %495 : vector<1x1x32xf32> to vector<1x32xf32>
    %c2_202 = arith.constant 2 : index
    %c0_203 = arith.constant 0 : index
    %c0_204 = arith.constant 0 : index
    %497 = vector.load %arg2[%c2_202, %c0_203, %c0_204] : memref<4x1x32xf32, #tpu.memory_space<vmem>>, vector<1x1x32xf32>
    %498 = vector.shape_cast %497 : vector<1x1x32xf32> to vector<1x32xf32>
    %cst_205 = arith.constant dense<0.000000e+00> : vector<16xf32>
    %499 = vector.multi_reduction <add>, %494, %cst_205 [1] : vector<16x32xf32> to vector<16xf32>
    %500 = vector.shape_cast %499 : vector<16xf32> to vector<16x1xf32>
    %cst_206 = arith.constant 3.200000e+01 : f32
    %501 = vector.broadcast %cst_206 : f32 to vector<16x1xf32>
    %502 = arith.divf %500, %501 : vector<16x1xf32>
    %503 = vector.broadcast %502 : vector<16x1xf32> to vector<16x32xf32>
    %504 = arith.subf %494, %503 : vector<16x32xf32>
    %505 = arith.mulf %504, %504 : vector<16x32xf32>
    %cst_207 = arith.constant dense<0.000000e+00> : vector<16xf32>
    %506 = vector.multi_reduction <add>, %505, %cst_207 [1] : vector<16x32xf32> to vector<16xf32>
    %507 = vector.shape_cast %506 : vector<16xf32> to vector<16x1xf32>
    %cst_208 = arith.constant 3.200000e+01 : f32
    %508 = vector.broadcast %cst_208 : f32 to vector<16x1xf32>
    %509 = arith.divf %507, %508 : vector<16x1xf32>
    %510 = vector.broadcast %502 : vector<16x1xf32> to vector<16x32xf32>
    %511 = arith.subf %494, %510 : vector<16x32xf32>
    %cst_209 = arith.constant 9.99999997E-7 : f32
    %512 = vector.broadcast %cst_209 : f32 to vector<16x1xf32>
    %513 = arith.addf %509, %512 : vector<16x1xf32>
    %514 = math.rsqrt %513 : vector<16x1xf32>
    %515 = vector.broadcast %514 : vector<16x1xf32> to vector<16x32xf32>
    %516 = arith.mulf %511, %515 : vector<16x32xf32>
    %517 = vector.broadcast %496 : vector<1x32xf32> to vector<16x32xf32>
    %518 = arith.mulf %516, %517 : vector<16x32xf32>
    %519 = vector.broadcast %498 : vector<1x32xf32> to vector<16x32xf32>
    %520 = arith.addf %518, %519 : vector<16x32xf32>
    %c2_210 = arith.constant 2 : index
    %c0_211 = arith.constant 0 : index
    %c0_212 = arith.constant 0 : index
    %521 = vector.load %arg3[%c2_210, %c0_211, %c0_212] : memref<4x32x96xf32, #tpu.memory_space<vmem>>, vector<1x32x96xf32>
    %522 = vector.shape_cast %521 : vector<1x32x96xf32> to vector<32x96xf32>
    %cst_213 = arith.constant dense<0.000000e+00> : vector<16x96xf32>
    %523 = tpu.matmul %520, %522, %cst_213 {dimension_numbers = #tpu.dot_dimension_numbers<[1], [0], [0], [1], [0, 0, 1, 1], [], []>} : vector<16x32xf32>, vector<32x96xf32>, vector<16x96xf32> -> vector<16x96xf32>
    %c2_214 = arith.constant 2 : index
    %c0_215 = arith.constant 0 : index
    %c0_216 = arith.constant 0 : index
    %524 = vector.load %arg4[%c2_214, %c0_215, %c0_216] : memref<4x1x96xf32, #tpu.memory_space<vmem>>, vector<1x1x96xf32>
    %525 = vector.shape_cast %524 : vector<1x1x96xf32> to vector<1x96xf32>
    %526 = vector.broadcast %525 : vector<1x96xf32> to vector<16x96xf32>
    %527 = arith.addf %523, %526 : vector<16x96xf32>
    %528 = vector.extract_strided_slice %527 {offsets = [0, 0], sizes = [16, 32], strides = [1, 1]} : vector<16x96xf32> to vector<16x32xf32>
    %529 = vector.extract_strided_slice %527 {offsets = [0, 32], sizes = [16, 32], strides = [1, 1]} : vector<16x96xf32> to vector<16x32xf32>
    %530 = vector.extract_strided_slice %527 {offsets = [0, 64], sizes = [16, 32], strides = [1, 1]} : vector<16x96xf32> to vector<16x32xf32>
    %531 = vector.extract_strided_slice %528 {offsets = [0, 0], sizes = [8, 32], strides = [1, 1]} : vector<16x32xf32> to vector<8x32xf32>
    %532 = vector.extract_strided_slice %529 {offsets = [0, 0], sizes = [8, 32], strides = [1, 1]} : vector<16x32xf32> to vector<8x32xf32>
    %533 = vector.extract_strided_slice %530 {offsets = [0, 0], sizes = [8, 32], strides = [1, 1]} : vector<16x32xf32> to vector<8x32xf32>
    %534 = vector.extract_strided_slice %531 {offsets = [0, 0], sizes = [8, 8], strides = [1, 1]} : vector<8x32xf32> to vector<8x8xf32>
    %535 = vector.extract_strided_slice %532 {offsets = [0, 0], sizes = [8, 8], strides = [1, 1]} : vector<8x32xf32> to vector<8x8xf32>
    %536 = vector.extract_strided_slice %533 {offsets = [0, 0], sizes = [8, 8], strides = [1, 1]} : vector<8x32xf32> to vector<8x8xf32>
    %537 = tpu.transpose %535, [1, 0] : vector<8x8xf32> -> vector<8x8xf32>
    %cst_217 = arith.constant dense<0.000000e+00> : vector<8x8xf32>
    %538 = tpu.matmul %534, %537, %cst_217 {dimension_numbers = #tpu.dot_dimension_numbers<[1], [0], [0], [1], [0, 0, 1, 1], [], []>} : vector<8x8xf32>, vector<8x8xf32>, vector<8x8xf32> -> vector<8x8xf32>
    %539 = vector.broadcast %2 : f32 to vector<8x8xf32>
    %540 = arith.mulf %538, %539 : vector<8x8xf32>
    %cst_218 = arith.constant dense<0xFF800000> : vector<8xf32>
    %541 = vector.multi_reduction <maximumf>, %540, %cst_218 [1] : vector<8x8xf32> to vector<8xf32>
    %542 = vector.shape_cast %541 : vector<8xf32> to vector<8x1xf32>
    %543 = vector.broadcast %542 : vector<8x1xf32> to vector<8x8xf32>
    %544 = arith.subf %540, %543 : vector<8x8xf32>
    %545 = math.exp %544 : vector<8x8xf32>
    %cst_219 = arith.constant dense<0.000000e+00> : vector<8xf32>
    %546 = vector.multi_reduction <add>, %545, %cst_219 [1] : vector<8x8xf32> to vector<8xf32>
    %547 = vector.shape_cast %546 : vector<8xf32> to vector<8x1xf32>
    %548 = tpu.reciprocal %547 {approx = true} : vector<8x1xf32> -> vector<8x1xf32>
    %549 = vector.broadcast %548 : vector<8x1xf32> to vector<8x8xf32>
    %550 = arith.mulf %545, %549 : vector<8x8xf32>
    %cst_220 = arith.constant dense<0.000000e+00> : vector<8x8xf32>
    %551 = tpu.matmul %550, %536, %cst_220 {dimension_numbers = #tpu.dot_dimension_numbers<[1], [0], [0], [1], [0, 0, 1, 1], [], []>} : vector<8x8xf32>, vector<8x8xf32>, vector<8x8xf32> -> vector<8x8xf32>
    %c0_221 = arith.constant 0 : index
    %c0_222 = arith.constant 0 : index
    %552 = vector.load %arg14[%c0_221, %c0_222] : memref<16x32xf32, #tpu.memory_space<vmem>>, vector<8x8xf32>
    tpu.vector_store %arg14[%c0_221, %c0_222], %551 {strides = array<i32>} : memref<16x32xf32, #tpu.memory_space<vmem>>, vector<8x8xf32>,
    %553 = vector.extract_strided_slice %531 {offsets = [0, 8], sizes = [8, 8], strides = [1, 1]} : vector<8x32xf32> to vector<8x8xf32>
    %554 = vector.extract_strided_slice %532 {offsets = [0, 8], sizes = [8, 8], strides = [1, 1]} : vector<8x32xf32> to vector<8x8xf32>
    %555 = vector.extract_strided_slice %533 {offsets = [0, 8], sizes = [8, 8], strides = [1, 1]} : vector<8x32xf32> to vector<8x8xf32>
    %556 = tpu.transpose %554, [1, 0] : vector<8x8xf32> -> vector<8x8xf32>
    %cst_223 = arith.constant dense<0.000000e+00> : vector<8x8xf32>
    %557 = tpu.matmul %553, %556, %cst_223 {dimension_numbers = #tpu.dot_dimension_numbers<[1], [0], [0], [1], [0, 0, 1, 1], [], []>} : vector<8x8xf32>, vector<8x8xf32>, vector<8x8xf32> -> vector<8x8xf32>
    %558 = vector.broadcast %2 : f32 to vector<8x8xf32>
    %559 = arith.mulf %557, %558 : vector<8x8xf32>
    %cst_224 = arith.constant dense<0xFF800000> : vector<8xf32>
    %560 = vector.multi_reduction <maximumf>, %559, %cst_224 [1] : vector<8x8xf32> to vector<8xf32>
    %561 = vector.shape_cast %560 : vector<8xf32> to vector<8x1xf32>
    %562 = vector.broadcast %561 : vector<8x1xf32> to vector<8x8xf32>
    %563 = arith.subf %559, %562 : vector<8x8xf32>
    %564 = math.exp %563 : vector<8x8xf32>
    %cst_225 = arith.constant dense<0.000000e+00> : vector<8xf32>
    %565 = vector.multi_reduction <add>, %564, %cst_225 [1] : vector<8x8xf32> to vector<8xf32>
    %566 = vector.shape_cast %565 : vector<8xf32> to vector<8x1xf32>
    %567 = tpu.reciprocal %566 {approx = true} : vector<8x1xf32> -> vector<8x1xf32>
    %568 = vector.broadcast %567 : vector<8x1xf32> to vector<8x8xf32>
    %569 = arith.mulf %564, %568 : vector<8x8xf32>
    %cst_226 = arith.constant dense<0.000000e+00> : vector<8x8xf32>
    %570 = tpu.matmul %569, %555, %cst_226 {dimension_numbers = #tpu.dot_dimension_numbers<[1], [0], [0], [1], [0, 0, 1, 1], [], []>} : vector<8x8xf32>, vector<8x8xf32>, vector<8x8xf32> -> vector<8x8xf32>
    %c0_227 = arith.constant 0 : index
    %c8_228 = arith.constant 8 : index
    %571 = vector.load %arg14[%c0_227, %c8_228] : memref<16x32xf32, #tpu.memory_space<vmem>>, vector<8x8xf32>
    tpu.vector_store %arg14[%c0_227, %c8_228], %570 {strides = array<i32>} : memref<16x32xf32, #tpu.memory_space<vmem>>, vector<8x8xf32>,
    %572 = vector.extract_strided_slice %531 {offsets = [0, 16], sizes = [8, 8], strides = [1, 1]} : vector<8x32xf32> to vector<8x8xf32>
    %573 = vector.extract_strided_slice %532 {offsets = [0, 16], sizes = [8, 8], strides = [1, 1]} : vector<8x32xf32> to vector<8x8xf32>
    %574 = vector.extract_strided_slice %533 {offsets = [0, 16], sizes = [8, 8], strides = [1, 1]} : vector<8x32xf32> to vector<8x8xf32>
    %575 = tpu.transpose %573, [1, 0] : vector<8x8xf32> -> vector<8x8xf32>
    %cst_229 = arith.constant dense<0.000000e+00> : vector<8x8xf32>
    %576 = tpu.matmul %572, %575, %cst_229 {dimension_numbers = #tpu.dot_dimension_numbers<[1], [0], [0], [1], [0, 0, 1, 1], [], []>} : vector<8x8xf32>, vector<8x8xf32>, vector<8x8xf32> -> vector<8x8xf32>
    %577 = vector.broadcast %2 : f32 to vector<8x8xf32>
    %578 = arith.mulf %576, %577 : vector<8x8xf32>
    %cst_230 = arith.constant dense<0xFF800000> : vector<8xf32>
    %579 = vector.multi_reduction <maximumf>, %578, %cst_230 [1] : vector<8x8xf32> to vector<8xf32>
    %580 = vector.shape_cast %579 : vector<8xf32> to vector<8x1xf32>
    %581 = vector.broadcast %580 : vector<8x1xf32> to vector<8x8xf32>
    %582 = arith.subf %578, %581 : vector<8x8xf32>
    %583 = math.exp %582 : vector<8x8xf32>
    %cst_231 = arith.constant dense<0.000000e+00> : vector<8xf32>
    %584 = vector.multi_reduction <add>, %583, %cst_231 [1] : vector<8x8xf32> to vector<8xf32>
    %585 = vector.shape_cast %584 : vector<8xf32> to vector<8x1xf32>
    %586 = tpu.reciprocal %585 {approx = true} : vector<8x1xf32> -> vector<8x1xf32>
    %587 = vector.broadcast %586 : vector<8x1xf32> to vector<8x8xf32>
    %588 = arith.mulf %583, %587 : vector<8x8xf32>
    %cst_232 = arith.constant dense<0.000000e+00> : vector<8x8xf32>
    %589 = tpu.matmul %588, %574, %cst_232 {dimension_numbers = #tpu.dot_dimension_numbers<[1], [0], [0], [1], [0, 0, 1, 1], [], []>} : vector<8x8xf32>, vector<8x8xf32>, vector<8x8xf32> -> vector<8x8xf32>
    %c0_233 = arith.constant 0 : index
    %c16_234 = arith.constant 16 : index
    %590 = vector.load %arg14[%c0_233, %c16_234] : memref<16x32xf32, #tpu.memory_space<vmem>>, vector<8x8xf32>
    tpu.vector_store %arg14[%c0_233, %c16_234], %589 {strides = array<i32>} : memref<16x32xf32, #tpu.memory_space<vmem>>, vector<8x8xf32>,
    %591 = vector.extract_strided_slice %531 {offsets = [0, 24], sizes = [8, 8], strides = [1, 1]} : vector<8x32xf32> to vector<8x8xf32>
    %592 = vector.extract_strided_slice %532 {offsets = [0, 24], sizes = [8, 8], strides = [1, 1]} : vector<8x32xf32> to vector<8x8xf32>
    %593 = vector.extract_strided_slice %533 {offsets = [0, 24], sizes = [8, 8], strides = [1, 1]} : vector<8x32xf32> to vector<8x8xf32>
    %594 = tpu.transpose %592, [1, 0] : vector<8x8xf32> -> vector<8x8xf32>
    %cst_235 = arith.constant dense<0.000000e+00> : vector<8x8xf32>
    %595 = tpu.matmul %591, %594, %cst_235 {dimension_numbers = #tpu.dot_dimension_numbers<[1], [0], [0], [1], [0, 0, 1, 1], [], []>} : vector<8x8xf32>, vector<8x8xf32>, vector<8x8xf32> -> vector<8x8xf32>
    %596 = vector.broadcast %2 : f32 to vector<8x8xf32>
    %597 = arith.mulf %595, %596 : vector<8x8xf32>
    %cst_236 = arith.constant dense<0xFF800000> : vector<8xf32>
    %598 = vector.multi_reduction <maximumf>, %597, %cst_236 [1] : vector<8x8xf32> to vector<8xf32>
    %599 = vector.shape_cast %598 : vector<8xf32> to vector<8x1xf32>
    %600 = vector.broadcast %599 : vector<8x1xf32> to vector<8x8xf32>
    %601 = arith.subf %597, %600 : vector<8x8xf32>
    %602 = math.exp %601 : vector<8x8xf32>
    %cst_237 = arith.constant dense<0.000000e+00> : vector<8xf32>
    %603 = vector.multi_reduction <add>, %602, %cst_237 [1] : vector<8x8xf32> to vector<8xf32>
    %604 = vector.shape_cast %603 : vector<8xf32> to vector<8x1xf32>
    %605 = tpu.reciprocal %604 {approx = true} : vector<8x1xf32> -> vector<8x1xf32>
    %606 = vector.broadcast %605 : vector<8x1xf32> to vector<8x8xf32>
    %607 = arith.mulf %602, %606 : vector<8x8xf32>
    %cst_238 = arith.constant dense<0.000000e+00> : vector<8x8xf32>
    %608 = tpu.matmul %607, %593, %cst_238 {dimension_numbers = #tpu.dot_dimension_numbers<[1], [0], [0], [1], [0, 0, 1, 1], [], []>} : vector<8x8xf32>, vector<8x8xf32>, vector<8x8xf32> -> vector<8x8xf32>
    %c0_239 = arith.constant 0 : index
    %c24_240 = arith.constant 24 : index
    %609 = vector.load %arg14[%c0_239, %c24_240] : memref<16x32xf32, #tpu.memory_space<vmem>>, vector<8x8xf32>
    tpu.vector_store %arg14[%c0_239, %c24_240], %608 {strides = array<i32>} : memref<16x32xf32, #tpu.memory_space<vmem>>, vector<8x8xf32>,
    %610 = vector.extract_strided_slice %528 {offsets = [8, 0], sizes = [8, 32], strides = [1, 1]} : vector<16x32xf32> to vector<8x32xf32>
    %611 = vector.extract_strided_slice %529 {offsets = [8, 0], sizes = [8, 32], strides = [1, 1]} : vector<16x32xf32> to vector<8x32xf32>
    %612 = vector.extract_strided_slice %530 {offsets = [8, 0], sizes = [8, 32], strides = [1, 1]} : vector<16x32xf32> to vector<8x32xf32>
    %613 = vector.extract_strided_slice %610 {offsets = [0, 0], sizes = [8, 8], strides = [1, 1]} : vector<8x32xf32> to vector<8x8xf32>
    %614 = vector.extract_strided_slice %611 {offsets = [0, 0], sizes = [8, 8], strides = [1, 1]} : vector<8x32xf32> to vector<8x8xf32>
    %615 = vector.extract_strided_slice %612 {offsets = [0, 0], sizes = [8, 8], strides = [1, 1]} : vector<8x32xf32> to vector<8x8xf32>
    %616 = tpu.transpose %614, [1, 0] : vector<8x8xf32> -> vector<8x8xf32>
    %cst_241 = arith.constant dense<0.000000e+00> : vector<8x8xf32>
    %617 = tpu.matmul %613, %616, %cst_241 {dimension_numbers = #tpu.dot_dimension_numbers<[1], [0], [0], [1], [0, 0, 1, 1], [], []>} : vector<8x8xf32>, vector<8x8xf32>, vector<8x8xf32> -> vector<8x8xf32>
    %618 = vector.broadcast %2 : f32 to vector<8x8xf32>
    %619 = arith.mulf %617, %618 : vector<8x8xf32>
    %cst_242 = arith.constant dense<0xFF800000> : vector<8xf32>
    %620 = vector.multi_reduction <maximumf>, %619, %cst_242 [1] : vector<8x8xf32> to vector<8xf32>
    %621 = vector.shape_cast %620 : vector<8xf32> to vector<8x1xf32>
    %622 = vector.broadcast %621 : vector<8x1xf32> to vector<8x8xf32>
    %623 = arith.subf %619, %622 : vector<8x8xf32>
    %624 = math.exp %623 : vector<8x8xf32>
    %cst_243 = arith.constant dense<0.000000e+00> : vector<8xf32>
    %625 = vector.multi_reduction <add>, %624, %cst_243 [1] : vector<8x8xf32> to vector<8xf32>
    %626 = vector.shape_cast %625 : vector<8xf32> to vector<8x1xf32>
    %627 = tpu.reciprocal %626 {approx = true} : vector<8x1xf32> -> vector<8x1xf32>
    %628 = vector.broadcast %627 : vector<8x1xf32> to vector<8x8xf32>
    %629 = arith.mulf %624, %628 : vector<8x8xf32>
    %cst_244 = arith.constant dense<0.000000e+00> : vector<8x8xf32>
    %630 = tpu.matmul %629, %615, %cst_244 {dimension_numbers = #tpu.dot_dimension_numbers<[1], [0], [0], [1], [0, 0, 1, 1], [], []>} : vector<8x8xf32>, vector<8x8xf32>, vector<8x8xf32> -> vector<8x8xf32>
    %c8_245 = arith.constant 8 : index
    %c0_246 = arith.constant 0 : index
    %631 = vector.load %arg14[%c8_245, %c0_246] : memref<16x32xf32, #tpu.memory_space<vmem>>, vector<8x8xf32>
    tpu.vector_store %arg14[%c8_245, %c0_246], %630 {strides = array<i32>} : memref<16x32xf32, #tpu.memory_space<vmem>>, vector<8x8xf32>,
    %632 = vector.extract_strided_slice %610 {offsets = [0, 8], sizes = [8, 8], strides = [1, 1]} : vector<8x32xf32> to vector<8x8xf32>
    %633 = vector.extract_strided_slice %611 {offsets = [0, 8], sizes = [8, 8], strides = [1, 1]} : vector<8x32xf32> to vector<8x8xf32>
    %634 = vector.extract_strided_slice %612 {offsets = [0, 8], sizes = [8, 8], strides = [1, 1]} : vector<8x32xf32> to vector<8x8xf32>
    %635 = tpu.transpose %633, [1, 0] : vector<8x8xf32> -> vector<8x8xf32>
    %cst_247 = arith.constant dense<0.000000e+00> : vector<8x8xf32>
    %636 = tpu.matmul %632, %635, %cst_247 {dimension_numbers = #tpu.dot_dimension_numbers<[1], [0], [0], [1], [0, 0, 1, 1], [], []>} : vector<8x8xf32>, vector<8x8xf32>, vector<8x8xf32> -> vector<8x8xf32>
    %637 = vector.broadcast %2 : f32 to vector<8x8xf32>
    %638 = arith.mulf %636, %637 : vector<8x8xf32>
    %cst_248 = arith.constant dense<0xFF800000> : vector<8xf32>
    %639 = vector.multi_reduction <maximumf>, %638, %cst_248 [1] : vector<8x8xf32> to vector<8xf32>
    %640 = vector.shape_cast %639 : vector<8xf32> to vector<8x1xf32>
    %641 = vector.broadcast %640 : vector<8x1xf32> to vector<8x8xf32>
    %642 = arith.subf %638, %641 : vector<8x8xf32>
    %643 = math.exp %642 : vector<8x8xf32>
    %cst_249 = arith.constant dense<0.000000e+00> : vector<8xf32>
    %644 = vector.multi_reduction <add>, %643, %cst_249 [1] : vector<8x8xf32> to vector<8xf32>
    %645 = vector.shape_cast %644 : vector<8xf32> to vector<8x1xf32>
    %646 = tpu.reciprocal %645 {approx = true} : vector<8x1xf32> -> vector<8x1xf32>
    %647 = vector.broadcast %646 : vector<8x1xf32> to vector<8x8xf32>
    %648 = arith.mulf %643, %647 : vector<8x8xf32>
    %cst_250 = arith.constant dense<0.000000e+00> : vector<8x8xf32>
    %649 = tpu.matmul %648, %634, %cst_250 {dimension_numbers = #tpu.dot_dimension_numbers<[1], [0], [0], [1], [0, 0, 1, 1], [], []>} : vector<8x8xf32>, vector<8x8xf32>, vector<8x8xf32> -> vector<8x8xf32>
    %c8_251 = arith.constant 8 : index
    %c8_252 = arith.constant 8 : index
    %650 = vector.load %arg14[%c8_251, %c8_252] : memref<16x32xf32, #tpu.memory_space<vmem>>, vector<8x8xf32>
    tpu.vector_store %arg14[%c8_251, %c8_252], %649 {strides = array<i32>} : memref<16x32xf32, #tpu.memory_space<vmem>>, vector<8x8xf32>,
    %651 = vector.extract_strided_slice %610 {offsets = [0, 16], sizes = [8, 8], strides = [1, 1]} : vector<8x32xf32> to vector<8x8xf32>
    %652 = vector.extract_strided_slice %611 {offsets = [0, 16], sizes = [8, 8], strides = [1, 1]} : vector<8x32xf32> to vector<8x8xf32>
    %653 = vector.extract_strided_slice %612 {offsets = [0, 16], sizes = [8, 8], strides = [1, 1]} : vector<8x32xf32> to vector<8x8xf32>
    %654 = tpu.transpose %652, [1, 0] : vector<8x8xf32> -> vector<8x8xf32>
    %cst_253 = arith.constant dense<0.000000e+00> : vector<8x8xf32>
    %655 = tpu.matmul %651, %654, %cst_253 {dimension_numbers = #tpu.dot_dimension_numbers<[1], [0], [0], [1], [0, 0, 1, 1], [], []>} : vector<8x8xf32>, vector<8x8xf32>, vector<8x8xf32> -> vector<8x8xf32>
    %656 = vector.broadcast %2 : f32 to vector<8x8xf32>
    %657 = arith.mulf %655, %656 : vector<8x8xf32>
    %cst_254 = arith.constant dense<0xFF800000> : vector<8xf32>
    %658 = vector.multi_reduction <maximumf>, %657, %cst_254 [1] : vector<8x8xf32> to vector<8xf32>
    %659 = vector.shape_cast %658 : vector<8xf32> to vector<8x1xf32>
    %660 = vector.broadcast %659 : vector<8x1xf32> to vector<8x8xf32>
    %661 = arith.subf %657, %660 : vector<8x8xf32>
    %662 = math.exp %661 : vector<8x8xf32>
    %cst_255 = arith.constant dense<0.000000e+00> : vector<8xf32>
    %663 = vector.multi_reduction <add>, %662, %cst_255 [1] : vector<8x8xf32> to vector<8xf32>
    %664 = vector.shape_cast %663 : vector<8xf32> to vector<8x1xf32>
    %665 = tpu.reciprocal %664 {approx = true} : vector<8x1xf32> -> vector<8x1xf32>
    %666 = vector.broadcast %665 : vector<8x1xf32> to vector<8x8xf32>
    %667 = arith.mulf %662, %666 : vector<8x8xf32>
    %cst_256 = arith.constant dense<0.000000e+00> : vector<8x8xf32>
    %668 = tpu.matmul %667, %653, %cst_256 {dimension_numbers = #tpu.dot_dimension_numbers<[1], [0], [0], [1], [0, 0, 1, 1], [], []>} : vector<8x8xf32>, vector<8x8xf32>, vector<8x8xf32> -> vector<8x8xf32>
    %c8_257 = arith.constant 8 : index
    %c16_258 = arith.constant 16 : index
    %669 = vector.load %arg14[%c8_257, %c16_258] : memref<16x32xf32, #tpu.memory_space<vmem>>, vector<8x8xf32>
    tpu.vector_store %arg14[%c8_257, %c16_258], %668 {strides = array<i32>} : memref<16x32xf32, #tpu.memory_space<vmem>>, vector<8x8xf32>,
    %670 = vector.extract_strided_slice %610 {offsets = [0, 24], sizes = [8, 8], strides = [1, 1]} : vector<8x32xf32> to vector<8x8xf32>
    %671 = vector.extract_strided_slice %611 {offsets = [0, 24], sizes = [8, 8], strides = [1, 1]} : vector<8x32xf32> to vector<8x8xf32>
    %672 = vector.extract_strided_slice %612 {offsets = [0, 24], sizes = [8, 8], strides = [1, 1]} : vector<8x32xf32> to vector<8x8xf32>
    %673 = tpu.transpose %671, [1, 0] : vector<8x8xf32> -> vector<8x8xf32>
    %cst_259 = arith.constant dense<0.000000e+00> : vector<8x8xf32>
    %674 = tpu.matmul %670, %673, %cst_259 {dimension_numbers = #tpu.dot_dimension_numbers<[1], [0], [0], [1], [0, 0, 1, 1], [], []>} : vector<8x8xf32>, vector<8x8xf32>, vector<8x8xf32> -> vector<8x8xf32>
    %675 = vector.broadcast %2 : f32 to vector<8x8xf32>
    %676 = arith.mulf %674, %675 : vector<8x8xf32>
    %cst_260 = arith.constant dense<0xFF800000> : vector<8xf32>
    %677 = vector.multi_reduction <maximumf>, %676, %cst_260 [1] : vector<8x8xf32> to vector<8xf32>
    %678 = vector.shape_cast %677 : vector<8xf32> to vector<8x1xf32>
    %679 = vector.broadcast %678 : vector<8x1xf32> to vector<8x8xf32>
    %680 = arith.subf %676, %679 : vector<8x8xf32>
    %681 = math.exp %680 : vector<8x8xf32>
    %cst_261 = arith.constant dense<0.000000e+00> : vector<8xf32>
    %682 = vector.multi_reduction <add>, %681, %cst_261 [1] : vector<8x8xf32> to vector<8xf32>
    %683 = vector.shape_cast %682 : vector<8xf32> to vector<8x1xf32>
    %684 = tpu.reciprocal %683 {approx = true} : vector<8x1xf32> -> vector<8x1xf32>
    %685 = vector.broadcast %684 : vector<8x1xf32> to vector<8x8xf32>
    %686 = arith.mulf %681, %685 : vector<8x8xf32>
    %cst_262 = arith.constant dense<0.000000e+00> : vector<8x8xf32>
    %687 = tpu.matmul %686, %672, %cst_262 {dimension_numbers = #tpu.dot_dimension_numbers<[1], [0], [0], [1], [0, 0, 1, 1], [], []>} : vector<8x8xf32>, vector<8x8xf32>, vector<8x8xf32> -> vector<8x8xf32>
    %c8_263 = arith.constant 8 : index
    %c24_264 = arith.constant 24 : index
    %688 = vector.load %arg14[%c8_263, %c24_264] : memref<16x32xf32, #tpu.memory_space<vmem>>, vector<8x8xf32>
    tpu.vector_store %arg14[%c8_263, %c24_264], %687 {strides = array<i32>} : memref<16x32xf32, #tpu.memory_space<vmem>>, vector<8x8xf32>,
    %c0_265 = arith.constant 0 : index
    %c0_266 = arith.constant 0 : index
    %689 = vector.load %arg14[%c0_265, %c0_266] : memref<16x32xf32, #tpu.memory_space<vmem>>, vector<16x32xf32>
    %c2_267 = arith.constant 2 : index
    %c0_268 = arith.constant 0 : index
    %c0_269 = arith.constant 0 : index
    %690 = vector.load %arg5[%c2_267, %c0_268, %c0_269] : memref<4x32x32xf32, #tpu.memory_space<vmem>>, vector<1x32x32xf32>
    %691 = vector.shape_cast %690 : vector<1x32x32xf32> to vector<32x32xf32>
    %cst_270 = arith.constant dense<0.000000e+00> : vector<16x32xf32>
    %692 = tpu.matmul %689, %691, %cst_270 {dimension_numbers = #tpu.dot_dimension_numbers<[1], [0], [0], [1], [0, 0, 1, 1], [], []>} : vector<16x32xf32>, vector<32x32xf32>, vector<16x32xf32> -> vector<16x32xf32>
    %c2_271 = arith.constant 2 : index
    %c0_272 = arith.constant 0 : index
    %c0_273 = arith.constant 0 : index
    %693 = vector.load %arg6[%c2_271, %c0_272, %c0_273] : memref<4x1x32xf32, #tpu.memory_space<vmem>>, vector<1x1x32xf32>
    %694 = vector.shape_cast %693 : vector<1x1x32xf32> to vector<1x32xf32>
    %695 = vector.broadcast %694 : vector<1x32xf32> to vector<16x32xf32>
    %696 = arith.addf %692, %695 : vector<16x32xf32>
    %697 = arith.addf %494, %696 : vector<16x32xf32>
    %c2_274 = arith.constant 2 : index
    %c0_275 = arith.constant 0 : index
    %c0_276 = arith.constant 0 : index
    %698 = vector.load %arg7[%c2_274, %c0_275, %c0_276] : memref<4x1x32xf32, #tpu.memory_space<vmem>>, vector<1x1x32xf32>
    %699 = vector.shape_cast %698 : vector<1x1x32xf32> to vector<1x32xf32>
    %c2_277 = arith.constant 2 : index
    %c0_278 = arith.constant 0 : index
    %c0_279 = arith.constant 0 : index
    %700 = vector.load %arg8[%c2_277, %c0_278, %c0_279] : memref<4x1x32xf32, #tpu.memory_space<vmem>>, vector<1x1x32xf32>
    %701 = vector.shape_cast %700 : vector<1x1x32xf32> to vector<1x32xf32>
    %cst_280 = arith.constant dense<0.000000e+00> : vector<16xf32>
    %702 = vector.multi_reduction <add>, %697, %cst_280 [1] : vector<16x32xf32> to vector<16xf32>
    %703 = vector.shape_cast %702 : vector<16xf32> to vector<16x1xf32>
    %cst_281 = arith.constant 3.200000e+01 : f32
    %704 = vector.broadcast %cst_281 : f32 to vector<16x1xf32>
    %705 = arith.divf %703, %704 : vector<16x1xf32>
    %706 = vector.broadcast %705 : vector<16x1xf32> to vector<16x32xf32>
    %707 = arith.subf %697, %706 : vector<16x32xf32>
    %708 = arith.mulf %707, %707 : vector<16x32xf32>
    %cst_282 = arith.constant dense<0.000000e+00> : vector<16xf32>
    %709 = vector.multi_reduction <add>, %708, %cst_282 [1] : vector<16x32xf32> to vector<16xf32>
    %710 = vector.shape_cast %709 : vector<16xf32> to vector<16x1xf32>
    %cst_283 = arith.constant 3.200000e+01 : f32
    %711 = vector.broadcast %cst_283 : f32 to vector<16x1xf32>
    %712 = arith.divf %710, %711 : vector<16x1xf32>
    %713 = vector.broadcast %705 : vector<16x1xf32> to vector<16x32xf32>
    %714 = arith.subf %697, %713 : vector<16x32xf32>
    %cst_284 = arith.constant 9.99999997E-7 : f32
    %715 = vector.broadcast %cst_284 : f32 to vector<16x1xf32>
    %716 = arith.addf %712, %715 : vector<16x1xf32>
    %717 = math.rsqrt %716 : vector<16x1xf32>
    %718 = vector.broadcast %717 : vector<16x1xf32> to vector<16x32xf32>
    %719 = arith.mulf %714, %718 : vector<16x32xf32>
    %720 = vector.broadcast %699 : vector<1x32xf32> to vector<16x32xf32>
    %721 = arith.mulf %719, %720 : vector<16x32xf32>
    %722 = vector.broadcast %701 : vector<1x32xf32> to vector<16x32xf32>
    %723 = arith.addf %721, %722 : vector<16x32xf32>
    %c2_285 = arith.constant 2 : index
    %c0_286 = arith.constant 0 : index
    %c0_287 = arith.constant 0 : index
    %724 = vector.load %arg9[%c2_285, %c0_286, %c0_287] : memref<4x32x64xf32, #tpu.memory_space<vmem>>, vector<1x32x64xf32>
    %725 = vector.shape_cast %724 : vector<1x32x64xf32> to vector<32x64xf32>
    %cst_288 = arith.constant dense<0.000000e+00> : vector<16x64xf32>
    %726 = tpu.matmul %723, %725, %cst_288 {dimension_numbers = #tpu.dot_dimension_numbers<[1], [0], [0], [1], [0, 0, 1, 1], [], []>} : vector<16x32xf32>, vector<32x64xf32>, vector<16x64xf32> -> vector<16x64xf32>
    %c2_289 = arith.constant 2 : index
    %c0_290 = arith.constant 0 : index
    %c0_291 = arith.constant 0 : index
    %727 = vector.load %arg10[%c2_289, %c0_290, %c0_291] : memref<4x1x64xf32, #tpu.memory_space<vmem>>, vector<1x1x64xf32>
    %728 = vector.shape_cast %727 : vector<1x1x64xf32> to vector<1x64xf32>
    %729 = vector.broadcast %728 : vector<1x64xf32> to vector<16x64xf32>
    %730 = arith.addf %726, %729 : vector<16x64xf32>
    %cst_292 = arith.constant 0.000000e+00 : f32
    %731 = vector.broadcast %cst_292 : f32 to vector<16x64xf32>
    %732 = arith.maximumf %730, %731 : vector<16x64xf32>
    %c2_293 = arith.constant 2 : index
    %c0_294 = arith.constant 0 : index
    %c0_295 = arith.constant 0 : index
    %733 = vector.load %arg11[%c2_293, %c0_294, %c0_295] : memref<4x64x32xf32, #tpu.memory_space<vmem>>, vector<1x64x32xf32>
    %734 = vector.shape_cast %733 : vector<1x64x32xf32> to vector<64x32xf32>
    %cst_296 = arith.constant dense<0.000000e+00> : vector<16x32xf32>
    %735 = tpu.matmul %732, %734, %cst_296 {dimension_numbers = #tpu.dot_dimension_numbers<[1], [0], [0], [1], [0, 0, 1, 1], [], []>} : vector<16x64xf32>, vector<64x32xf32>, vector<16x32xf32> -> vector<16x32xf32>
    %c2_297 = arith.constant 2 : index
    %c0_298 = arith.constant 0 : index
    %c0_299 = arith.constant 0 : index
    %736 = vector.load %arg12[%c2_297, %c0_298, %c0_299] : memref<4x1x32xf32, #tpu.memory_space<vmem>>, vector<1x1x32xf32>
    %737 = vector.shape_cast %736 : vector<1x1x32xf32> to vector<1x32xf32>
    %738 = vector.broadcast %737 : vector<1x32xf32> to vector<16x32xf32>
    %739 = arith.addf %735, %738 : vector<16x32xf32>
    %740 = arith.addf %697, %739 : vector<16x32xf32>
    %c3 = arith.constant 3 : index
    %c0_300 = arith.constant 0 : index
    %c0_301 = arith.constant 0 : index
    %741 = vector.load %arg1[%c3, %c0_300, %c0_301] : memref<4x1x32xf32, #tpu.memory_space<vmem>>, vector<1x1x32xf32>
    %742 = vector.shape_cast %741 : vector<1x1x32xf32> to vector<1x32xf32>
    %c3_302 = arith.constant 3 : index
    %c0_303 = arith.constant 0 : index
    %c0_304 = arith.constant 0 : index
    %743 = vector.load %arg2[%c3_302, %c0_303, %c0_304] : memref<4x1x32xf32, #tpu.memory_space<vmem>>, vector<1x1x32xf32>
    %744 = vector.shape_cast %743 : vector<1x1x32xf32> to vector<1x32xf32>
    %cst_305 = arith.constant dense<0.000000e+00> : vector<16xf32>
    %745 = vector.multi_reduction <add>, %740, %cst_305 [1] : vector<16x32xf32> to vector<16xf32>
    %746 = vector.shape_cast %745 : vector<16xf32> to vector<16x1xf32>
    %cst_306 = arith.constant 3.200000e+01 : f32
    %747 = vector.broadcast %cst_306 : f32 to vector<16x1xf32>
    %748 = arith.divf %746, %747 : vector<16x1xf32>
    %749 = vector.broadcast %748 : vector<16x1xf32> to vector<16x32xf32>
    %750 = arith.subf %740, %749 : vector<16x32xf32>
    %751 = arith.mulf %750, %750 : vector<16x32xf32>
    %cst_307 = arith.constant dense<0.000000e+00> : vector<16xf32>
    %752 = vector.multi_reduction <add>, %751, %cst_307 [1] : vector<16x32xf32> to vector<16xf32>
    %753 = vector.shape_cast %752 : vector<16xf32> to vector<16x1xf32>
    %cst_308 = arith.constant 3.200000e+01 : f32
    %754 = vector.broadcast %cst_308 : f32 to vector<16x1xf32>
    %755 = arith.divf %753, %754 : vector<16x1xf32>
    %756 = vector.broadcast %748 : vector<16x1xf32> to vector<16x32xf32>
    %757 = arith.subf %740, %756 : vector<16x32xf32>
    %cst_309 = arith.constant 9.99999997E-7 : f32
    %758 = vector.broadcast %cst_309 : f32 to vector<16x1xf32>
    %759 = arith.addf %755, %758 : vector<16x1xf32>
    %760 = math.rsqrt %759 : vector<16x1xf32>
    %761 = vector.broadcast %760 : vector<16x1xf32> to vector<16x32xf32>
    %762 = arith.mulf %757, %761 : vector<16x32xf32>
    %763 = vector.broadcast %742 : vector<1x32xf32> to vector<16x32xf32>
    %764 = arith.mulf %762, %763 : vector<16x32xf32>
    %765 = vector.broadcast %744 : vector<1x32xf32> to vector<16x32xf32>
    %766 = arith.addf %764, %765 : vector<16x32xf32>
    %c3_310 = arith.constant 3 : index
    %c0_311 = arith.constant 0 : index
    %c0_312 = arith.constant 0 : index
    %767 = vector.load %arg3[%c3_310, %c0_311, %c0_312] : memref<4x32x96xf32, #tpu.memory_space<vmem>>, vector<1x32x96xf32>
    %768 = vector.shape_cast %767 : vector<1x32x96xf32> to vector<32x96xf32>
    %cst_313 = arith.constant dense<0.000000e+00> : vector<16x96xf32>
    %769 = tpu.matmul %766, %768, %cst_313 {dimension_numbers = #tpu.dot_dimension_numbers<[1], [0], [0], [1], [0, 0, 1, 1], [], []>} : vector<16x32xf32>, vector<32x96xf32>, vector<16x96xf32> -> vector<16x96xf32>
    %c3_314 = arith.constant 3 : index
    %c0_315 = arith.constant 0 : index
    %c0_316 = arith.constant 0 : index
    %770 = vector.load %arg4[%c3_314, %c0_315, %c0_316] : memref<4x1x96xf32, #tpu.memory_space<vmem>>, vector<1x1x96xf32>
    %771 = vector.shape_cast %770 : vector<1x1x96xf32> to vector<1x96xf32>
    %772 = vector.broadcast %771 : vector<1x96xf32> to vector<16x96xf32>
    %773 = arith.addf %769, %772 : vector<16x96xf32>
    %774 = vector.extract_strided_slice %773 {offsets = [0, 0], sizes = [16, 32], strides = [1, 1]} : vector<16x96xf32> to vector<16x32xf32>
    %775 = vector.extract_strided_slice %773 {offsets = [0, 32], sizes = [16, 32], strides = [1, 1]} : vector<16x96xf32> to vector<16x32xf32>
    %776 = vector.extract_strided_slice %773 {offsets = [0, 64], sizes = [16, 32], strides = [1, 1]} : vector<16x96xf32> to vector<16x32xf32>
    %777 = vector.extract_strided_slice %774 {offsets = [0, 0], sizes = [8, 32], strides = [1, 1]} : vector<16x32xf32> to vector<8x32xf32>
    %778 = vector.extract_strided_slice %775 {offsets = [0, 0], sizes = [8, 32], strides = [1, 1]} : vector<16x32xf32> to vector<8x32xf32>
    %779 = vector.extract_strided_slice %776 {offsets = [0, 0], sizes = [8, 32], strides = [1, 1]} : vector<16x32xf32> to vector<8x32xf32>
    %780 = vector.extract_strided_slice %777 {offsets = [0, 0], sizes = [8, 8], strides = [1, 1]} : vector<8x32xf32> to vector<8x8xf32>
    %781 = vector.extract_strided_slice %778 {offsets = [0, 0], sizes = [8, 8], strides = [1, 1]} : vector<8x32xf32> to vector<8x8xf32>
    %782 = vector.extract_strided_slice %779 {offsets = [0, 0], sizes = [8, 8], strides = [1, 1]} : vector<8x32xf32> to vector<8x8xf32>
    %783 = tpu.transpose %781, [1, 0] : vector<8x8xf32> -> vector<8x8xf32>
    %cst_317 = arith.constant dense<0.000000e+00> : vector<8x8xf32>
    %784 = tpu.matmul %780, %783, %cst_317 {dimension_numbers = #tpu.dot_dimension_numbers<[1], [0], [0], [1], [0, 0, 1, 1], [], []>} : vector<8x8xf32>, vector<8x8xf32>, vector<8x8xf32> -> vector<8x8xf32>
    %785 = vector.broadcast %2 : f32 to vector<8x8xf32>
    %786 = arith.mulf %784, %785 : vector<8x8xf32>
    %cst_318 = arith.constant dense<0xFF800000> : vector<8xf32>
    %787 = vector.multi_reduction <maximumf>, %786, %cst_318 [1] : vector<8x8xf32> to vector<8xf32>
    %788 = vector.shape_cast %787 : vector<8xf32> to vector<8x1xf32>
    %789 = vector.broadcast %788 : vector<8x1xf32> to vector<8x8xf32>
    %790 = arith.subf %786, %789 : vector<8x8xf32>
    %791 = math.exp %790 : vector<8x8xf32>
    %cst_319 = arith.constant dense<0.000000e+00> : vector<8xf32>
    %792 = vector.multi_reduction <add>, %791, %cst_319 [1] : vector<8x8xf32> to vector<8xf32>
    %793 = vector.shape_cast %792 : vector<8xf32> to vector<8x1xf32>
    %794 = tpu.reciprocal %793 {approx = true} : vector<8x1xf32> -> vector<8x1xf32>
    %795 = vector.broadcast %794 : vector<8x1xf32> to vector<8x8xf32>
    %796 = arith.mulf %791, %795 : vector<8x8xf32>
    %cst_320 = arith.constant dense<0.000000e+00> : vector<8x8xf32>
    %797 = tpu.matmul %796, %782, %cst_320 {dimension_numbers = #tpu.dot_dimension_numbers<[1], [0], [0], [1], [0, 0, 1, 1], [], []>} : vector<8x8xf32>, vector<8x8xf32>, vector<8x8xf32> -> vector<8x8xf32>
    %c0_321 = arith.constant 0 : index
    %c0_322 = arith.constant 0 : index
    %798 = vector.load %arg14[%c0_321, %c0_322] : memref<16x32xf32, #tpu.memory_space<vmem>>, vector<8x8xf32>
    tpu.vector_store %arg14[%c0_321, %c0_322], %797 {strides = array<i32>} : memref<16x32xf32, #tpu.memory_space<vmem>>, vector<8x8xf32>,
    %799 = vector.extract_strided_slice %777 {offsets = [0, 8], sizes = [8, 8], strides = [1, 1]} : vector<8x32xf32> to vector<8x8xf32>
    %800 = vector.extract_strided_slice %778 {offsets = [0, 8], sizes = [8, 8], strides = [1, 1]} : vector<8x32xf32> to vector<8x8xf32>
    %801 = vector.extract_strided_slice %779 {offsets = [0, 8], sizes = [8, 8], strides = [1, 1]} : vector<8x32xf32> to vector<8x8xf32>
    %802 = tpu.transpose %800, [1, 0] : vector<8x8xf32> -> vector<8x8xf32>
    %cst_323 = arith.constant dense<0.000000e+00> : vector<8x8xf32>
    %803 = tpu.matmul %799, %802, %cst_323 {dimension_numbers = #tpu.dot_dimension_numbers<[1], [0], [0], [1], [0, 0, 1, 1], [], []>} : vector<8x8xf32>, vector<8x8xf32>, vector<8x8xf32> -> vector<8x8xf32>
    %804 = vector.broadcast %2 : f32 to vector<8x8xf32>
    %805 = arith.mulf %803, %804 : vector<8x8xf32>
    %cst_324 = arith.constant dense<0xFF800000> : vector<8xf32>
    %806 = vector.multi_reduction <maximumf>, %805, %cst_324 [1] : vector<8x8xf32> to vector<8xf32>
    %807 = vector.shape_cast %806 : vector<8xf32> to vector<8x1xf32>
    %808 = vector.broadcast %807 : vector<8x1xf32> to vector<8x8xf32>
    %809 = arith.subf %805, %808 : vector<8x8xf32>
    %810 = math.exp %809 : vector<8x8xf32>
    %cst_325 = arith.constant dense<0.000000e+00> : vector<8xf32>
    %811 = vector.multi_reduction <add>, %810, %cst_325 [1] : vector<8x8xf32> to vector<8xf32>
    %812 = vector.shape_cast %811 : vector<8xf32> to vector<8x1xf32>
    %813 = tpu.reciprocal %812 {approx = true} : vector<8x1xf32> -> vector<8x1xf32>
    %814 = vector.broadcast %813 : vector<8x1xf32> to vector<8x8xf32>
    %815 = arith.mulf %810, %814 : vector<8x8xf32>
    %cst_326 = arith.constant dense<0.000000e+00> : vector<8x8xf32>
    %816 = tpu.matmul %815, %801, %cst_326 {dimension_numbers = #tpu.dot_dimension_numbers<[1], [0], [0], [1], [0, 0, 1, 1], [], []>} : vector<8x8xf32>, vector<8x8xf32>, vector<8x8xf32> -> vector<8x8xf32>
    %c0_327 = arith.constant 0 : index
    %c8_328 = arith.constant 8 : index
    %817 = vector.load %arg14[%c0_327, %c8_328] : memref<16x32xf32, #tpu.memory_space<vmem>>, vector<8x8xf32>
    tpu.vector_store %arg14[%c0_327, %c8_328], %816 {strides = array<i32>} : memref<16x32xf32, #tpu.memory_space<vmem>>, vector<8x8xf32>,
    %818 = vector.extract_strided_slice %777 {offsets = [0, 16], sizes = [8, 8], strides = [1, 1]} : vector<8x32xf32> to vector<8x8xf32>
    %819 = vector.extract_strided_slice %778 {offsets = [0, 16], sizes = [8, 8], strides = [1, 1]} : vector<8x32xf32> to vector<8x8xf32>
    %820 = vector.extract_strided_slice %779 {offsets = [0, 16], sizes = [8, 8], strides = [1, 1]} : vector<8x32xf32> to vector<8x8xf32>
    %821 = tpu.transpose %819, [1, 0] : vector<8x8xf32> -> vector<8x8xf32>
    %cst_329 = arith.constant dense<0.000000e+00> : vector<8x8xf32>
    %822 = tpu.matmul %818, %821, %cst_329 {dimension_numbers = #tpu.dot_dimension_numbers<[1], [0], [0], [1], [0, 0, 1, 1], [], []>} : vector<8x8xf32>, vector<8x8xf32>, vector<8x8xf32> -> vector<8x8xf32>
    %823 = vector.broadcast %2 : f32 to vector<8x8xf32>
    %824 = arith.mulf %822, %823 : vector<8x8xf32>
    %cst_330 = arith.constant dense<0xFF800000> : vector<8xf32>
    %825 = vector.multi_reduction <maximumf>, %824, %cst_330 [1] : vector<8x8xf32> to vector<8xf32>
    %826 = vector.shape_cast %825 : vector<8xf32> to vector<8x1xf32>
    %827 = vector.broadcast %826 : vector<8x1xf32> to vector<8x8xf32>
    %828 = arith.subf %824, %827 : vector<8x8xf32>
    %829 = math.exp %828 : vector<8x8xf32>
    %cst_331 = arith.constant dense<0.000000e+00> : vector<8xf32>
    %830 = vector.multi_reduction <add>, %829, %cst_331 [1] : vector<8x8xf32> to vector<8xf32>
    %831 = vector.shape_cast %830 : vector<8xf32> to vector<8x1xf32>
    %832 = tpu.reciprocal %831 {approx = true} : vector<8x1xf32> -> vector<8x1xf32>
    %833 = vector.broadcast %832 : vector<8x1xf32> to vector<8x8xf32>
    %834 = arith.mulf %829, %833 : vector<8x8xf32>
    %cst_332 = arith.constant dense<0.000000e+00> : vector<8x8xf32>
    %835 = tpu.matmul %834, %820, %cst_332 {dimension_numbers = #tpu.dot_dimension_numbers<[1], [0], [0], [1], [0, 0, 1, 1], [], []>} : vector<8x8xf32>, vector<8x8xf32>, vector<8x8xf32> -> vector<8x8xf32>
    %c0_333 = arith.constant 0 : index
    %c16_334 = arith.constant 16 : index
    %836 = vector.load %arg14[%c0_333, %c16_334] : memref<16x32xf32, #tpu.memory_space<vmem>>, vector<8x8xf32>
    tpu.vector_store %arg14[%c0_333, %c16_334], %835 {strides = array<i32>} : memref<16x32xf32, #tpu.memory_space<vmem>>, vector<8x8xf32>,
    %837 = vector.extract_strided_slice %777 {offsets = [0, 24], sizes = [8, 8], strides = [1, 1]} : vector<8x32xf32> to vector<8x8xf32>
    %838 = vector.extract_strided_slice %778 {offsets = [0, 24], sizes = [8, 8], strides = [1, 1]} : vector<8x32xf32> to vector<8x8xf32>
    %839 = vector.extract_strided_slice %779 {offsets = [0, 24], sizes = [8, 8], strides = [1, 1]} : vector<8x32xf32> to vector<8x8xf32>
    %840 = tpu.transpose %838, [1, 0] : vector<8x8xf32> -> vector<8x8xf32>
    %cst_335 = arith.constant dense<0.000000e+00> : vector<8x8xf32>
    %841 = tpu.matmul %837, %840, %cst_335 {dimension_numbers = #tpu.dot_dimension_numbers<[1], [0], [0], [1], [0, 0, 1, 1], [], []>} : vector<8x8xf32>, vector<8x8xf32>, vector<8x8xf32> -> vector<8x8xf32>
    %842 = vector.broadcast %2 : f32 to vector<8x8xf32>
    %843 = arith.mulf %841, %842 : vector<8x8xf32>
    %cst_336 = arith.constant dense<0xFF800000> : vector<8xf32>
    %844 = vector.multi_reduction <maximumf>, %843, %cst_336 [1] : vector<8x8xf32> to vector<8xf32>
    %845 = vector.shape_cast %844 : vector<8xf32> to vector<8x1xf32>
    %846 = vector.broadcast %845 : vector<8x1xf32> to vector<8x8xf32>
    %847 = arith.subf %843, %846 : vector<8x8xf32>
    %848 = math.exp %847 : vector<8x8xf32>
    %cst_337 = arith.constant dense<0.000000e+00> : vector<8xf32>
    %849 = vector.multi_reduction <add>, %848, %cst_337 [1] : vector<8x8xf32> to vector<8xf32>
    %850 = vector.shape_cast %849 : vector<8xf32> to vector<8x1xf32>
    %851 = tpu.reciprocal %850 {approx = true} : vector<8x1xf32> -> vector<8x1xf32>
    %852 = vector.broadcast %851 : vector<8x1xf32> to vector<8x8xf32>
    %853 = arith.mulf %848, %852 : vector<8x8xf32>
    %cst_338 = arith.constant dense<0.000000e+00> : vector<8x8xf32>
    %854 = tpu.matmul %853, %839, %cst_338 {dimension_numbers = #tpu.dot_dimension_numbers<[1], [0], [0], [1], [0, 0, 1, 1], [], []>} : vector<8x8xf32>, vector<8x8xf32>, vector<8x8xf32> -> vector<8x8xf32>
    %c0_339 = arith.constant 0 : index
    %c24_340 = arith.constant 24 : index
    %855 = vector.load %arg14[%c0_339, %c24_340] : memref<16x32xf32, #tpu.memory_space<vmem>>, vector<8x8xf32>
    tpu.vector_store %arg14[%c0_339, %c24_340], %854 {strides = array<i32>} : memref<16x32xf32, #tpu.memory_space<vmem>>, vector<8x8xf32>,
    %856 = vector.extract_strided_slice %774 {offsets = [8, 0], sizes = [8, 32], strides = [1, 1]} : vector<16x32xf32> to vector<8x32xf32>
    %857 = vector.extract_strided_slice %775 {offsets = [8, 0], sizes = [8, 32], strides = [1, 1]} : vector<16x32xf32> to vector<8x32xf32>
    %858 = vector.extract_strided_slice %776 {offsets = [8, 0], sizes = [8, 32], strides = [1, 1]} : vector<16x32xf32> to vector<8x32xf32>
    %859 = vector.extract_strided_slice %856 {offsets = [0, 0], sizes = [8, 8], strides = [1, 1]} : vector<8x32xf32> to vector<8x8xf32>
    %860 = vector.extract_strided_slice %857 {offsets = [0, 0], sizes = [8, 8], strides = [1, 1]} : vector<8x32xf32> to vector<8x8xf32>
    %861 = vector.extract_strided_slice %858 {offsets = [0, 0], sizes = [8, 8], strides = [1, 1]} : vector<8x32xf32> to vector<8x8xf32>
    %862 = tpu.transpose %860, [1, 0] : vector<8x8xf32> -> vector<8x8xf32>
    %cst_341 = arith.constant dense<0.000000e+00> : vector<8x8xf32>
    %863 = tpu.matmul %859, %862, %cst_341 {dimension_numbers = #tpu.dot_dimension_numbers<[1], [0], [0], [1], [0, 0, 1, 1], [], []>} : vector<8x8xf32>, vector<8x8xf32>, vector<8x8xf32> -> vector<8x8xf32>
    %864 = vector.broadcast %2 : f32 to vector<8x8xf32>
    %865 = arith.mulf %863, %864 : vector<8x8xf32>
    %cst_342 = arith.constant dense<0xFF800000> : vector<8xf32>
    %866 = vector.multi_reduction <maximumf>, %865, %cst_342 [1] : vector<8x8xf32> to vector<8xf32>
    %867 = vector.shape_cast %866 : vector<8xf32> to vector<8x1xf32>
    %868 = vector.broadcast %867 : vector<8x1xf32> to vector<8x8xf32>
    %869 = arith.subf %865, %868 : vector<8x8xf32>
    %870 = math.exp %869 : vector<8x8xf32>
    %cst_343 = arith.constant dense<0.000000e+00> : vector<8xf32>
    %871 = vector.multi_reduction <add>, %870, %cst_343 [1] : vector<8x8xf32> to vector<8xf32>
    %872 = vector.shape_cast %871 : vector<8xf32> to vector<8x1xf32>
    %873 = tpu.reciprocal %872 {approx = true} : vector<8x1xf32> -> vector<8x1xf32>
    %874 = vector.broadcast %873 : vector<8x1xf32> to vector<8x8xf32>
    %875 = arith.mulf %870, %874 : vector<8x8xf32>
    %cst_344 = arith.constant dense<0.000000e+00> : vector<8x8xf32>
    %876 = tpu.matmul %875, %861, %cst_344 {dimension_numbers = #tpu.dot_dimension_numbers<[1], [0], [0], [1], [0, 0, 1, 1], [], []>} : vector<8x8xf32>, vector<8x8xf32>, vector<8x8xf32> -> vector<8x8xf32>
    %c8_345 = arith.constant 8 : index
    %c0_346 = arith.constant 0 : index
    %877 = vector.load %arg14[%c8_345, %c0_346] : memref<16x32xf32, #tpu.memory_space<vmem>>, vector<8x8xf32>
    tpu.vector_store %arg14[%c8_345, %c0_346], %876 {strides = array<i32>} : memref<16x32xf32, #tpu.memory_space<vmem>>, vector<8x8xf32>,
    %878 = vector.extract_strided_slice %856 {offsets = [0, 8], sizes = [8, 8], strides = [1, 1]} : vector<8x32xf32> to vector<8x8xf32>
    %879 = vector.extract_strided_slice %857 {offsets = [0, 8], sizes = [8, 8], strides = [1, 1]} : vector<8x32xf32> to vector<8x8xf32>
    %880 = vector.extract_strided_slice %858 {offsets = [0, 8], sizes = [8, 8], strides = [1, 1]} : vector<8x32xf32> to vector<8x8xf32>
    %881 = tpu.transpose %879, [1, 0] : vector<8x8xf32> -> vector<8x8xf32>
    %cst_347 = arith.constant dense<0.000000e+00> : vector<8x8xf32>
    %882 = tpu.matmul %878, %881, %cst_347 {dimension_numbers = #tpu.dot_dimension_numbers<[1], [0], [0], [1], [0, 0, 1, 1], [], []>} : vector<8x8xf32>, vector<8x8xf32>, vector<8x8xf32> -> vector<8x8xf32>
    %883 = vector.broadcast %2 : f32 to vector<8x8xf32>
    %884 = arith.mulf %882, %883 : vector<8x8xf32>
    %cst_348 = arith.constant dense<0xFF800000> : vector<8xf32>
    %885 = vector.multi_reduction <maximumf>, %884, %cst_348 [1] : vector<8x8xf32> to vector<8xf32>
    %886 = vector.shape_cast %885 : vector<8xf32> to vector<8x1xf32>
    %887 = vector.broadcast %886 : vector<8x1xf32> to vector<8x8xf32>
    %888 = arith.subf %884, %887 : vector<8x8xf32>
    %889 = math.exp %888 : vector<8x8xf32>
    %cst_349 = arith.constant dense<0.000000e+00> : vector<8xf32>
    %890 = vector.multi_reduction <add>, %889, %cst_349 [1] : vector<8x8xf32> to vector<8xf32>
    %891 = vector.shape_cast %890 : vector<8xf32> to vector<8x1xf32>
    %892 = tpu.reciprocal %891 {approx = true} : vector<8x1xf32> -> vector<8x1xf32>
    %893 = vector.broadcast %892 : vector<8x1xf32> to vector<8x8xf32>
    %894 = arith.mulf %889, %893 : vector<8x8xf32>
    %cst_350 = arith.constant dense<0.000000e+00> : vector<8x8xf32>
    %895 = tpu.matmul %894, %880, %cst_350 {dimension_numbers = #tpu.dot_dimension_numbers<[1], [0], [0], [1], [0, 0, 1, 1], [], []>} : vector<8x8xf32>, vector<8x8xf32>, vector<8x8xf32> -> vector<8x8xf32>
    %c8_351 = arith.constant 8 : index
    %c8_352 = arith.constant 8 : index
    %896 = vector.load %arg14[%c8_351, %c8_352] : memref<16x32xf32, #tpu.memory_space<vmem>>, vector<8x8xf32>
    tpu.vector_store %arg14[%c8_351, %c8_352], %895 {strides = array<i32>} : memref<16x32xf32, #tpu.memory_space<vmem>>, vector<8x8xf32>,
    %897 = vector.extract_strided_slice %856 {offsets = [0, 16], sizes = [8, 8], strides = [1, 1]} : vector<8x32xf32> to vector<8x8xf32>
    %898 = vector.extract_strided_slice %857 {offsets = [0, 16], sizes = [8, 8], strides = [1, 1]} : vector<8x32xf32> to vector<8x8xf32>
    %899 = vector.extract_strided_slice %858 {offsets = [0, 16], sizes = [8, 8], strides = [1, 1]} : vector<8x32xf32> to vector<8x8xf32>
    %900 = tpu.transpose %898, [1, 0] : vector<8x8xf32> -> vector<8x8xf32>
    %cst_353 = arith.constant dense<0.000000e+00> : vector<8x8xf32>
    %901 = tpu.matmul %897, %900, %cst_353 {dimension_numbers = #tpu.dot_dimension_numbers<[1], [0], [0], [1], [0, 0, 1, 1], [], []>} : vector<8x8xf32>, vector<8x8xf32>, vector<8x8xf32> -> vector<8x8xf32>
    %902 = vector.broadcast %2 : f32 to vector<8x8xf32>
    %903 = arith.mulf %901, %902 : vector<8x8xf32>
    %cst_354 = arith.constant dense<0xFF800000> : vector<8xf32>
    %904 = vector.multi_reduction <maximumf>, %903, %cst_354 [1] : vector<8x8xf32> to vector<8xf32>
    %905 = vector.shape_cast %904 : vector<8xf32> to vector<8x1xf32>
    %906 = vector.broadcast %905 : vector<8x1xf32> to vector<8x8xf32>
    %907 = arith.subf %903, %906 : vector<8x8xf32>
    %908 = math.exp %907 : vector<8x8xf32>
    %cst_355 = arith.constant dense<0.000000e+00> : vector<8xf32>
    %909 = vector.multi_reduction <add>, %908, %cst_355 [1] : vector<8x8xf32> to vector<8xf32>
    %910 = vector.shape_cast %909 : vector<8xf32> to vector<8x1xf32>
    %911 = tpu.reciprocal %910 {approx = true} : vector<8x1xf32> -> vector<8x1xf32>
    %912 = vector.broadcast %911 : vector<8x1xf32> to vector<8x8xf32>
    %913 = arith.mulf %908, %912 : vector<8x8xf32>
    %cst_356 = arith.constant dense<0.000000e+00> : vector<8x8xf32>
    %914 = tpu.matmul %913, %899, %cst_356 {dimension_numbers = #tpu.dot_dimension_numbers<[1], [0], [0], [1], [0, 0, 1, 1], [], []>} : vector<8x8xf32>, vector<8x8xf32>, vector<8x8xf32> -> vector<8x8xf32>
    %c8_357 = arith.constant 8 : index
    %c16_358 = arith.constant 16 : index
    %915 = vector.load %arg14[%c8_357, %c16_358] : memref<16x32xf32, #tpu.memory_space<vmem>>, vector<8x8xf32>
    tpu.vector_store %arg14[%c8_357, %c16_358], %914 {strides = array<i32>} : memref<16x32xf32, #tpu.memory_space<vmem>>, vector<8x8xf32>,
    %916 = vector.extract_strided_slice %856 {offsets = [0, 24], sizes = [8, 8], strides = [1, 1]} : vector<8x32xf32> to vector<8x8xf32>
    %917 = vector.extract_strided_slice %857 {offsets = [0, 24], sizes = [8, 8], strides = [1, 1]} : vector<8x32xf32> to vector<8x8xf32>
    %918 = vector.extract_strided_slice %858 {offsets = [0, 24], sizes = [8, 8], strides = [1, 1]} : vector<8x32xf32> to vector<8x8xf32>
    %919 = tpu.transpose %917, [1, 0] : vector<8x8xf32> -> vector<8x8xf32>
    %cst_359 = arith.constant dense<0.000000e+00> : vector<8x8xf32>
    %920 = tpu.matmul %916, %919, %cst_359 {dimension_numbers = #tpu.dot_dimension_numbers<[1], [0], [0], [1], [0, 0, 1, 1], [], []>} : vector<8x8xf32>, vector<8x8xf32>, vector<8x8xf32> -> vector<8x8xf32>
    %921 = vector.broadcast %2 : f32 to vector<8x8xf32>
    %922 = arith.mulf %920, %921 : vector<8x8xf32>
    %cst_360 = arith.constant dense<0xFF800000> : vector<8xf32>
    %923 = vector.multi_reduction <maximumf>, %922, %cst_360 [1] : vector<8x8xf32> to vector<8xf32>
    %924 = vector.shape_cast %923 : vector<8xf32> to vector<8x1xf32>
    %925 = vector.broadcast %924 : vector<8x1xf32> to vector<8x8xf32>
    %926 = arith.subf %922, %925 : vector<8x8xf32>
    %927 = math.exp %926 : vector<8x8xf32>
    %cst_361 = arith.constant dense<0.000000e+00> : vector<8xf32>
    %928 = vector.multi_reduction <add>, %927, %cst_361 [1] : vector<8x8xf32> to vector<8xf32>
    %929 = vector.shape_cast %928 : vector<8xf32> to vector<8x1xf32>
    %930 = tpu.reciprocal %929 {approx = true} : vector<8x1xf32> -> vector<8x1xf32>
    %931 = vector.broadcast %930 : vector<8x1xf32> to vector<8x8xf32>
    %932 = arith.mulf %927, %931 : vector<8x8xf32>
    %cst_362 = arith.constant dense<0.000000e+00> : vector<8x8xf32>
    %933 = tpu.matmul %932, %918, %cst_362 {dimension_numbers = #tpu.dot_dimension_numbers<[1], [0], [0], [1], [0, 0, 1, 1], [], []>} : vector<8x8xf32>, vector<8x8xf32>, vector<8x8xf32> -> vector<8x8xf32>
    %c8_363 = arith.constant 8 : index
    %c24_364 = arith.constant 24 : index
    %934 = vector.load %arg14[%c8_363, %c24_364] : memref<16x32xf32, #tpu.memory_space<vmem>>, vector<8x8xf32>
    tpu.vector_store %arg14[%c8_363, %c24_364], %933 {strides = array<i32>} : memref<16x32xf32, #tpu.memory_space<vmem>>, vector<8x8xf32>,
    %c0_365 = arith.constant 0 : index
    %c0_366 = arith.constant 0 : index
    %935 = vector.load %arg14[%c0_365, %c0_366] : memref<16x32xf32, #tpu.memory_space<vmem>>, vector<16x32xf32>
    %c3_367 = arith.constant 3 : index
    %c0_368 = arith.constant 0 : index
    %c0_369 = arith.constant 0 : index
    %936 = vector.load %arg5[%c3_367, %c0_368, %c0_369] : memref<4x32x32xf32, #tpu.memory_space<vmem>>, vector<1x32x32xf32>
    %937 = vector.shape_cast %936 : vector<1x32x32xf32> to vector<32x32xf32>
    %cst_370 = arith.constant dense<0.000000e+00> : vector<16x32xf32>
    %938 = tpu.matmul %935, %937, %cst_370 {dimension_numbers = #tpu.dot_dimension_numbers<[1], [0], [0], [1], [0, 0, 1, 1], [], []>} : vector<16x32xf32>, vector<32x32xf32>, vector<16x32xf32> -> vector<16x32xf32>
    %c3_371 = arith.constant 3 : index
    %c0_372 = arith.constant 0 : index
    %c0_373 = arith.constant 0 : index
    %939 = vector.load %arg6[%c3_371, %c0_372, %c0_373] : memref<4x1x32xf32, #tpu.memory_space<vmem>>, vector<1x1x32xf32>
    %940 = vector.shape_cast %939 : vector<1x1x32xf32> to vector<1x32xf32>
    %941 = vector.broadcast %940 : vector<1x32xf32> to vector<16x32xf32>
    %942 = arith.addf %938, %941 : vector<16x32xf32>
    %943 = arith.addf %740, %942 : vector<16x32xf32>
    %c3_374 = arith.constant 3 : index
    %c0_375 = arith.constant 0 : index
    %c0_376 = arith.constant 0 : index
    %944 = vector.load %arg7[%c3_374, %c0_375, %c0_376] : memref<4x1x32xf32, #tpu.memory_space<vmem>>, vector<1x1x32xf32>
    %945 = vector.shape_cast %944 : vector<1x1x32xf32> to vector<1x32xf32>
    %c3_377 = arith.constant 3 : index
    %c0_378 = arith.constant 0 : index
    %c0_379 = arith.constant 0 : index
    %946 = vector.load %arg8[%c3_377, %c0_378, %c0_379] : memref<4x1x32xf32, #tpu.memory_space<vmem>>, vector<1x1x32xf32>
    %947 = vector.shape_cast %946 : vector<1x1x32xf32> to vector<1x32xf32>
    %cst_380 = arith.constant dense<0.000000e+00> : vector<16xf32>
    %948 = vector.multi_reduction <add>, %943, %cst_380 [1] : vector<16x32xf32> to vector<16xf32>
    %949 = vector.shape_cast %948 : vector<16xf32> to vector<16x1xf32>
    %cst_381 = arith.constant 3.200000e+01 : f32
    %950 = vector.broadcast %cst_381 : f32 to vector<16x1xf32>
    %951 = arith.divf %949, %950 : vector<16x1xf32>
    %952 = vector.broadcast %951 : vector<16x1xf32> to vector<16x32xf32>
    %953 = arith.subf %943, %952 : vector<16x32xf32>
    %954 = arith.mulf %953, %953 : vector<16x32xf32>
    %cst_382 = arith.constant dense<0.000000e+00> : vector<16xf32>
    %955 = vector.multi_reduction <add>, %954, %cst_382 [1] : vector<16x32xf32> to vector<16xf32>
    %956 = vector.shape_cast %955 : vector<16xf32> to vector<16x1xf32>
    %cst_383 = arith.constant 3.200000e+01 : f32
    %957 = vector.broadcast %cst_383 : f32 to vector<16x1xf32>
    %958 = arith.divf %956, %957 : vector<16x1xf32>
    %959 = vector.broadcast %951 : vector<16x1xf32> to vector<16x32xf32>
    %960 = arith.subf %943, %959 : vector<16x32xf32>
    %cst_384 = arith.constant 9.99999997E-7 : f32
    %961 = vector.broadcast %cst_384 : f32 to vector<16x1xf32>
    %962 = arith.addf %958, %961 : vector<16x1xf32>
    %963 = math.rsqrt %962 : vector<16x1xf32>
    %964 = vector.broadcast %963 : vector<16x1xf32> to vector<16x32xf32>
    %965 = arith.mulf %960, %964 : vector<16x32xf32>
    %966 = vector.broadcast %945 : vector<1x32xf32> to vector<16x32xf32>
    %967 = arith.mulf %965, %966 : vector<16x32xf32>
    %968 = vector.broadcast %947 : vector<1x32xf32> to vector<16x32xf32>
    %969 = arith.addf %967, %968 : vector<16x32xf32>
    %c3_385 = arith.constant 3 : index
    %c0_386 = arith.constant 0 : index
    %c0_387 = arith.constant 0 : index
    %970 = vector.load %arg9[%c3_385, %c0_386, %c0_387] : memref<4x32x64xf32, #tpu.memory_space<vmem>>, vector<1x32x64xf32>
    %971 = vector.shape_cast %970 : vector<1x32x64xf32> to vector<32x64xf32>
    %cst_388 = arith.constant dense<0.000000e+00> : vector<16x64xf32>
    %972 = tpu.matmul %969, %971, %cst_388 {dimension_numbers = #tpu.dot_dimension_numbers<[1], [0], [0], [1], [0, 0, 1, 1], [], []>} : vector<16x32xf32>, vector<32x64xf32>, vector<16x64xf32> -> vector<16x64xf32>
    %c3_389 = arith.constant 3 : index
    %c0_390 = arith.constant 0 : index
    %c0_391 = arith.constant 0 : index
    %973 = vector.load %arg10[%c3_389, %c0_390, %c0_391] : memref<4x1x64xf32, #tpu.memory_space<vmem>>, vector<1x1x64xf32>
    %974 = vector.shape_cast %973 : vector<1x1x64xf32> to vector<1x64xf32>
    %975 = vector.broadcast %974 : vector<1x64xf32> to vector<16x64xf32>
    %976 = arith.addf %972, %975 : vector<16x64xf32>
    %cst_392 = arith.constant 0.000000e+00 : f32
    %977 = vector.broadcast %cst_392 : f32 to vector<16x64xf32>
    %978 = arith.maximumf %976, %977 : vector<16x64xf32>
    %c3_393 = arith.constant 3 : index
    %c0_394 = arith.constant 0 : index
    %c0_395 = arith.constant 0 : index
    %979 = vector.load %arg11[%c3_393, %c0_394, %c0_395] : memref<4x64x32xf32, #tpu.memory_space<vmem>>, vector<1x64x32xf32>
    %980 = vector.shape_cast %979 : vector<1x64x32xf32> to vector<64x32xf32>
    %cst_396 = arith.constant dense<0.000000e+00> : vector<16x32xf32>
    %981 = tpu.matmul %978, %980, %cst_396 {dimension_numbers = #tpu.dot_dimension_numbers<[1], [0], [0], [1], [0, 0, 1, 1], [], []>} : vector<16x64xf32>, vector<64x32xf32>, vector<16x32xf32> -> vector<16x32xf32>
    %c3_397 = arith.constant 3 : index
    %c0_398 = arith.constant 0 : index
    %c0_399 = arith.constant 0 : index
    %982 = vector.load %arg12[%c3_397, %c0_398, %c0_399] : memref<4x1x32xf32, #tpu.memory_space<vmem>>, vector<1x1x32xf32>
    %983 = vector.shape_cast %982 : vector<1x1x32xf32> to vector<1x32xf32>
    %984 = vector.broadcast %983 : vector<1x32xf32> to vector<16x32xf32>
    %985 = arith.addf %981, %984 : vector<16x32xf32>
    %986 = arith.addf %943, %985 : vector<16x32xf32>
    %c0_400 = arith.constant 0 : index
    %c0_401 = arith.constant 0 : index
    %987 = vector.load %arg13[%c0_400, %c0_401] : memref<16x32xf32, #tpu.memory_space<vmem>>, vector<16x32xf32>
    tpu.vector_store %arg13[%c0_400, %c0_401], %986 {strides = array<i32>} : memref<16x32xf32, #tpu.memory_space<vmem>>, vector<16x32xf32>,
    return
  }
}

</mosaic_0001>

<bundles_post_ra>
// kernel: encoder_forward.1
= control target key start
LH: loop header
LB: loop body
LE: loop exit
PB: predicated region body
PF: predicated region fallthrough
CT: control target
= control target key end

     0   :  { %18 = vsyncpa [#allocation4], 0  ;;  %s10259_s0 = inlined_call_operand.hbm [shape: f32[16,32], index: 0, kind: input, shape index: {}]   ;;  %s10260_s1 = inlined_call_operand.vmem [shape: f32[4,1,32], index: 1, kind: input, shape index: {}]   ;;  %s10261_s2 = inlined_call_operand.vmem [shape: f32[4,1,32], index: 2, kind: input, shape index: {}]   ;;  %s10262_s3 = inlined_call_operand.vmem [shape: f32[4,32,96], index: 3, kind: input, shape index: {}]   ;;  %s10263_s4 = inlined_call_operand.vmem [shape: f32[4,1,96], index: 4, kind: input, shape index: {}]   ;;  %s10264_s5 = inlined_call_operand.vmem [shape: f32[4,32,32], index: 5, kind: input, shape index: {}]   ;;  %s10265_s6 = inlined_call_operand.hbm [shape: f32[4,1,32], index: 6, kind: input, shape index: {}]   ;;  %s10266_s7 = inlined_call_operand.vmem [shape: f32[4,1,32], index: 7, kind: input, shape index: {}]   ;;  %s10267_s8 = inlined_call_operand.vmem [shape: f32[4,1,32], index: 8, kind: input, shape index: {}]   ;;  %s10268_s9 = inlined_call_operand.vmem [shape: f32[4,32,64], index: 9, kind: input, shape index: {}]   ;;  %s10269_s10 = inlined_call_operand.hbm [shape: f32[4,1,64], index: 10, kind: input, shape index: {}]   ;;  %s10270_s11 = inlined_call_operand.vmem [shape: f32[4,64,32], index: 11, kind: input, shape index: {}]   ;;  %s10271_s12 = inlined_call_operand.hbm [shape: f32[4,1,32], index: 12, kind: input, shape index: {}]   ;;  %s10272_s13 = inlined_call_operand.hbm [shape: f32[16,32], index: 13, kind: output, shape index: {}]  }
   0x1   :  { %19 = vsyncpa [#allocation7], 0 }
   0x2   :  { %20 = vsyncpa [#allocation10], 0 }
   0x3   :  { %21 = vsyncpa [#allocation5], 0  ;;  %s8934_s25 = smov [#allocation6]   ;;  %s8816_s29 = scalar_lea.hbm %s10265_s6, 64 }
   0x4   :  { %s49_s26 = sshll.u32 %s8934_s25, 4  ;;  %p8817_p0 = scmp.ne.s32.totalorder %s10265_s6, %s8816_s29  ;;  %s50_s26 = int_to_ptr.vmem [resolvable:$true] %s49_s26 }
   0x5   :  { %p8820_p1 = scmp.lt.u32.totalorder %s8816_s29, %s10265_s6 }
   0x7   :  { %p8822_p2 = pnand %p8820_p1, %p8817_p0 }
   0x9   :  { %8825 = shalt.err (!%p8822_p2)
}
   0xa   :  { %s8826_s17 = scalar_lea.vmem %s50_s26, 64  ;;  %p8831_p4 = scmp.lt.s32.totalorder %s50_s26, %s50_s26 }
   0xb   :  { %p8827_p3 = scmp.ne.s32.totalorder %s50_s26, %s8826_s17  ;;  %p8832_p5 = scmp.lt.s32.totalorder %s8826_s17, %s8826_s17 }
   0xd   :  { %p8833_p6 = por %p8832_p5, %p8831_p4 }
   0xf   :  { %p8834_p7 = pnand %p8833_p6, %p8827_p3 }
  0x11   :  { %8837 = shalt.err (!%p8834_p7)
}
  0x12   :  { %s10278_s18 = smov 16   ;;  %s8936_s19 = smov 1  }
  0x13   :  { %55 = dma.hbm_to_vmem [thread:$0]  %s10265_s6, 64, %s50_s26, [#allocation7], %s10278_s18, %s10278_s18, %s8936_s19  }
  0x14   :  { %s8937_s22 = smov [#allocation3]   ;;  %s8838_s27 = scalar_lea.hbm %s10259_s0, 256 }
  0x15   :  { %s27_s23 = sshll.u32 %s8937_s22, 4  ;;  %p8839_p8 = scmp.ne.s32.totalorder %s10259_s0, %s8838_s27  ;;  %s28_s23 = int_to_ptr.vmem [resolvable:$true] %s27_s23 }
  0x16   :  { %p8842_p9 = scmp.lt.u32.totalorder %s8838_s27, %s10259_s0 }
  0x18   :  { %p8844_p10 = pnand %p8842_p9, %p8839_p8 }
  0x1a   :  { %8847 = shalt.err (!%p8844_p10)
}
  0x1b   :  { %s8848_s15 = scalar_lea.vmem %s28_s23, 256  ;;  %p8853_p12 = scmp.lt.s32.totalorder %s28_s23, %s28_s23 }
  0x1c   :  { %p8849_p11 = scmp.ne.s32.totalorder %s28_s23, %s8848_s15  ;;  %p8854_p13 = scmp.lt.s32.totalorder %s8848_s15, %s8848_s15 }
  0x1e   :  { %p8855_p0 = por %p8854_p13, %p8853_p12 }
  0x20   :  { %p8856_p1 = pnand %p8855_p0, %p8849_p11 }
  0x22   :  { %8859 = shalt.err (!%p8856_p1)
}
  0x23   :  { %s10273_s6 = smov 128   ;;  %s10282_s26 = smov 8  }
  0x24   :  { %33 = dma.hbm_to_vmem [thread:$0]  %s10259_s0, 256, %s28_s23, [#allocation4], %s10273_s6, %s10273_s6, %s10282_s26  }
  0x25   :  { %s8940_s20 = smov [#allocation8]   ;;  %s8941_s22 = smov [#allocation9]  }
  0x26   :  { %s67_s21 = sshll.u32 %s8940_s20, 4  ;;  %s81_s24 = sshll.u32 %s8941_s22, 4  ;;  %s68_s21 = int_to_ptr.vmem [resolvable:$true] %s67_s21  ;;  %s9057_s24 = int_to_ptr.vmem [resolvable:$true] %s81_s24 }
  0x27   :  { %s8860_s28 = scalar_lea.hbm %s10269_s10, 64 }
  0x28   :  { %p8861_p2 = scmp.ne.s32.totalorder %s10269_s10, %s8860_s28  ;;  %p8864_p3 = scmp.lt.u32.totalorder %s8860_s28, %s10269_s10 }
  0x2a   :  { %p8866_p4 = pnand %p8864_p3, %p8861_p2 }
  0x2c   :  { %8869 = shalt.err (!%p8866_p4)
}
  0x2d   :  { %s8870_s0 = scalar_lea.vmem %s68_s21, 64  ;;  %p8875_p6 = scmp.lt.s32.totalorder %s68_s21, %s68_s21 }
  0x2e   :  { %p8871_p5 = scmp.ne.s32.totalorder %s68_s21, %s8870_s0  ;;  %p8876_p7 = scmp.lt.s32.totalorder %s8870_s0, %s8870_s0 }
  0x30   :  { %p8877_p8 = por %p8876_p7, %p8875_p6 }
  0x32   :  { %p8878_p9 = pnand %p8877_p8, %p8871_p5 }
  0x34   :  { %8881 = shalt.err (!%p8878_p9)
}
  0x35   :  { %73 = dma.hbm_to_vmem [thread:$0]  %s10269_s10, 64, %s68_s21, [#allocation7], %s10278_s18, %s10278_s18, %s8936_s19  }
  0x36   :  { %s8882_s22 = scalar_lea.hbm %s10271_s12, 64 }
  0x37   :  { %p8883_p10 = scmp.ne.s32.totalorder %s10271_s12, %s8882_s22  ;;  %p8886_p11 = scmp.lt.u32.totalorder %s8882_s22, %s10271_s12 }
  0x39   :  { %p8888_p12 = pnand %p8886_p11, %p8883_p10 }
  0x3b   :  { %8891 = shalt.err (!%p8888_p12)
}
  0x3c   :  { %s8892_s30 = scalar_lea.vmem %s9057_s24, 64  ;;  %p8897_p0 = scmp.lt.s32.totalorder %s9057_s24, %s9057_s24 }
  0x3d   :  { %p8893_p13 = scmp.ne.s32.totalorder %s9057_s24, %s8892_s30  ;;  %p8898_p1 = scmp.lt.s32.totalorder %s8892_s30, %s8892_s30 }
  0x3f   :  { %p8899_p2 = por %p8898_p1, %p8897_p0 }
  0x41   :  { %p8900_p3 = pnand %p8899_p2, %p8893_p13 }
  0x43   :  { %8903 = shalt.err (!%p8900_p3)
}
  0x44   :  { %87 = dma.hbm_to_vmem [thread:$0]  %s10271_s12, 64, %s9057_s24, [#allocation10], %s10278_s18, %s10278_s18, %s8936_s19  }
  0x45   :  { %8926 = dma.done.wait [#allocation4], 256  }
  0x46   :  { %8927 = vsyncadd [#allocation4], 4294967040 }
  0x47   :  { %8928 = dma.done.wait [#allocation7], 128  }
  0x48   :  { %8929 = vsyncadd [#allocation7], 4294967168 }
  0x49   :  { %8930 = dma.done.wait [#allocation10], 64  }
  0x4a   :  { %8931 = vsyncadd [#allocation10], 4294967232  ;;  %vm104_vm0 = vcmask 261120   ;;  %v9094_v0 = vld [vmem:[#allocation3] sm:$0xff]  ;;  %v9096_v1 = vld [vmem:[#allocation3 + $0x8] sm:$0xff]  ;;  %v8942_v36 = vmov 0.0  }
  0x4b   :  { %v105_v2 = vsel %vm104_vm0, %v9094_v0, 0.0  ;;  %v108_v3 = vsel %vm104_vm0, %v9096_v1, 0.0  ;;  %v148_v14 = vld [vmem:[%s10262_s3] sm:$0xff]  ;;  %v149_v15 = vld [vmem:[%s10262_s3 + $0x8] sm:$0xff]  ;;  %v150_v16 = vld [vmem:[%s10262_s3 + $0x10] sm:$0xff]  ;;  %7966 = vmatprep.subr.mxu0 %v8942_v36  ;;  %vm8943_vm1 = vmmov 0  }
  0x4c   :  { %106 = vadd.xlane.f32.xlu0 %v105_v2  ;;  %v8473_v17 = vpack.c.bf16 %v149_v15, %v148_v14  ;;  %v151_v18 = vld [vmem:[%s10262_s3 + $0x18] sm:$0xff]  ;;  %v7470_v27 = vld [vmem:[%s10260_s1] ss:$0 sm:$0xff]  ;;  %7968 = vmatprep.mubr.msk.f32.mxu0 %vm8943_vm1, %v8942_v36  ;;  %s8944_s29 = smov 88   ;;  %s8945_s30 = smov 96   ;;  %vm243_vm2 = vcmask 64512  }
  0x4d   :  { %v8477_v19 = vpack.c.bf16 %v151_v18, %v150_v16  ;;  %v7471_v29 = vld [vmem:[%s10261_s2] ss:$0 sm:$0xff]  ;;  %s8946_s10 = smov 120   ;;  %s8947_s21 = smov 112   ;;  %vm577_vm3 = vcmask 130112   ;;  %vm749_vm4 = vcmask 195712  }
  0x4e   :  { %8474 = vmatprep.subr.bf16.mxu1 %v8473_v17  ;;  %v7472_v37 = vld [vmem:[%s10263_s4] ss:$0 sm:$0xff]  ;;  %s8948_s12 = smov 80   ;;  %s10290_s19 = smov 104   ;;  %vm921_vm5 = vcmask 261312   ;;  %vm1851_vm6 = vcmask 523264  }
  0x4f   :  { %8476 = vmatpush3.bf16.msra.mxu1 %v8473_v17  ;;  %s10288_s24 = smov 72   ;;  %s10286_s14 = smov 64  }
  0x50   :  { %109 = vadd.xlane.f32.xlu0 %v108_v3  ;;  %8478 = vmatprep.subr.bf16.mxu1 %v8477_v19  ;;  %s10284_s15 = smov 48   ;;  %s10280_s0 = smov 40  }
  0x51   :  { %s10274_s23 = smov 56   ;;  %s10276_s16 = smov 24  }
  0x52   :  { %s10292_s17 = smov 56   ;;  %s10293_s20 = smov 16  }
  0x53   :  { %8480 = vmatpush3.bf16.msra.mxu1 %v8477_v19  ;;  %s10294_s22 = smov 24   ;;  %s10295_s27 = smov 48  }
  0x54   :  { %7956 = vmatprep.subr.mxu1 %v8942_v36  ;;  %s10296_s28 = smov 40   ;;  %s10297_s6 = smov 8  }
  0xd9   :  { %v107_v4 = vpop.xlane.xlu0 %106 }
  0xda   :  { %v112_v5 = vmul.f32 0.03125, %v107_v4 }
  0xdc   :  { %v114_v6 = vsub.f32 %v9094_v0, %v112_v5 }
  0xdd   :  { %v110_v7 = vpop.xlane.xlu0 %109 }
  0xde   :  { %v113_v8 = vmul.f32 0.03125, %v110_v7  ;;  %v116_v9 = vmul.f32 %v114_v6, %v114_v6 }
  0xe0   :  { %v115_v10 = vsub.f32 %v9096_v1, %v113_v8  ;;  %v118_v11 = vsel %vm104_vm0, %v116_v9, 0.0 }
  0xe1   :  { %119 = vadd.xlane.f32.xlu1 %v118_v11 }
  0xe2   :  { %v117_v12 = vmul.f32 %v115_v10, %v115_v10 }
  0xe4   :  { %v121_v13 = vsel %vm104_vm0, %v117_v12, 0.0 }
  0xe5   :  { %122 = vadd.xlane.f32.xlu1 %v121_v13 }
 0x16e   :  { %v120_v20 = vpop.xlane.xlu1 %119 }
 0x16f   :  { %v124_v21 = vmul.f32 0.03125, %v120_v20 }
 0x171   :  { %v126_v22 = vadd.f32 1e-06, %v124_v21 }
 0x172   :  { %v123_v23 = vpop.xlane.xlu1 %122 }
 0x173   :  { %8656 = vrsqrt.f32 %v126_v22  ;;  %v125_v24 = vmul.f32 0.03125, %v123_v23 }
 0x175   :  { %v127_v25 = vadd.f32 1e-06, %v125_v24 }
 0x177   :  { %8658 = vrsqrt.f32 %v127_v25 }
 0x17d   :  { %v8657_v26 = vpop.eup %8656 }
 0x17e   :  { %v130_v28 = vmul.f32 %v8657_v26, %v114_v6 }
 0x180   :  { %v138_v30 = vmul.f32 %v7470_v27, %v130_v28 }
 0x181   :  { %v8659_v31 = vpop.eup %8658 }
 0x182   :  { %v131_v32 = vmul.f32 %v8659_v31, %v115_v10  ;;  %v146_v33 = vadd.f32 %v7471_v29, %v138_v30 }
 0x184   :  { %v139_v34 = vmul.f32 %v7470_v27, %v131_v32  ;;  %7953 = vmatprep.mubr.msk.f32.mxu1 %vm104_vm0, %v146_v33 }
 0x186   :  { %v147_v35 = vadd.f32 %v7471_v29, %v139_v34 }
 0x188   :  { %7954 = vmatmul.mubr.msk.f32.vlgmr.msra.gmra.mrb[0].mxu1 %vm104_vm0, %v147_v35 }
 0x189   :  { %7958 = vmatprep.mubr.msk.f32.mxu1 %vm8943_vm1, %v8942_v36 }
 0x25b   :  { %v7955_v38 = vpop.f32.mrb[0].mxu1 }
 0x25c   :  { %v231_v39 = vpop.f32.mrb[1].mxu1  ;;  %v9149_v41 = vadd.f32 %v7955_v38, %v7472_v37 }
 0x25d   :  { %v9135_v40 = vadd.f32 %v7472_v37, %v231_v39 }
 0x25f   :  { %409 = vrot.lane.b32.xlu1 %v9135_v40, %s8944_s29  ;;  %241 = vrot.lane.b32.xlu0 %v9135_v40, %s8945_s30 }
 0x263   :  { %407 = vrot.lane.b32.xlu1 %v9135_v40, %s8946_s10  ;;  %579 = vrot.lane.b32.xlu0 %v9135_v40, %s8947_s21 }
 0x267   :  { %581 = vrot.lane.b32.xlu1 %v9135_v40, %s8948_s12  ;;  %751 = vrot.lane.b32.xlu0 %v9135_v40, %s10290_s19 }
 0x26b   :  { %753 = vrot.lane.b32.xlu1 %v9135_v40, %s10288_s24  ;;  %1091 = vrot.lane.b32.xlu0 %v9149_v41, %s8944_s29 }
 0x26f   :  { %924 = vrot.lane.b32.xlu1 %v9149_v41, %s8945_s30  ;;  %1262 = vrot.lane.b32.xlu0 %v9149_v41, %s8948_s12 }
 0x273   :  { %1089 = vrot.lane.b32.xlu1 %v9149_v41, %s8946_s10  ;;  %1433 = vrot.lane.b32.xlu0 %v9149_v41, %s10288_s24 }
 0x277   :  { %1260 = vrot.lane.b32.xlu1 %v9149_v41, %s8947_s21 }
 0x27b   :  { %1431 = vrot.lane.b32.xlu1 %v9149_v41, %s10290_s19 }
 0x2d1   :  { %v410_v42 = vpop.permute.xlu1 %409  ;;  %v242_v43 = vpop.permute.xlu0 %241 }
 0x2d2   :  { %7957 = vmatpush3.xpose.msk.msra.mxu1 %vm243_vm2, %v242_v43  ;;  %7967 = vmatpush3.xpose.msk.msra.mxu0 %vm243_vm2, %v410_v42 }
 0x2d3   :  { %7976 = vmatprep.subr.mxu0 %v8942_v36  ;;  %7961 = vmatprep.subr.mxu1 %v8942_v36 }
 0x2d5   :  { %v408_v44 = vpop.permute.xlu1 %407  ;;  %7959 = vmatmul.mubr.msk.f32.vlgmr.msra.gmra.mrb[2].mxu1 %vm243_vm2, %v9135_v40  ;;  %v580_v45 = vpop.permute.xlu0 %579 }
 0x2d6   :  { %7969 = vmatmul.mubr.msk.f32.vlgmr.msra.gmra.mrb[0].mxu0 %vm243_vm2, %v408_v44  ;;  %7963 = vmatprep.mubr.msk.f32.mxu1 %vm8943_vm1, %v8942_v36 }
 0x2d7   :  { %7978 = vmatprep.mubr.msk.f32.mxu0 %vm8943_vm1, %v8942_v36 }
 0x2d9   :  { %v582_v46 = vpop.permute.xlu1 %581  ;;  %v752_v47 = vpop.permute.xlu0 %751 }
 0x2da   :  { %7977 = vmatpush3.xpose.msk.msra.mxu0 %vm243_vm2, %v582_v46 }
 0x2db   :  { %7986 = vmatprep.subr.mxu0 %v8942_v36 }
 0x2dd   :  { %v754_v48 = vpop.permute.xlu1 %753  ;;  %7979 = vmatmul.mubr.msk.f32.vlgmr.msra.gmra.mrb[2].mxu0 %vm243_vm2, %v580_v45  ;;  %v1092_v49 = vpop.permute.xlu0 %1091 }
 0x2de   :  { %7987 = vmatpush3.xpose.msk.msra.mxu0 %vm243_vm2, %v754_v48  ;;  %7988 = vmatprep.mubr.msk.f32.mxu0 %vm8943_vm1, %v8942_v36 }
 0x2df   :  { %7996 = vmatprep.subr.mxu0 %v8942_v36 }
 0x2e1   :  { %v925_v50 = vpop.permute.xlu1 %924  ;;  %7989 = vmatmul.mubr.msk.f32.vlgmr.msra.gmra.mrb[4].mxu0 %vm243_vm2, %v752_v47  ;;  %v1263_v52 = vpop.permute.xlu0 %1262 }
 0x2e2   :  { %7997 = vmatpush3.xpose.msk.msra.mxu0 %vm243_vm2, %v925_v50  ;;  %7998 = vmatprep.mubr.msk.f32.mxu0 %vm8943_vm1, %v8942_v36 }
 0x2e3   :  { %8006 = vmatprep.subr.mxu0 %v8942_v36 }
 0x2e5   :  { %v1090_v51 = vpop.permute.xlu1 %1089  ;;  %7999 = vmatmul.mubr.msk.f32.vlgmr.msra.gmra.mrb[6].mxu0 %vm243_vm2, %v9149_v41  ;;  %v1434_v54 = vpop.permute.xlu0 %1433 }
 0x2e6   :  { %8007 = vmatpush3.xpose.msk.msra.mxu0 %vm243_vm2, %v1092_v49  ;;  %8008 = vmatprep.mubr.msk.f32.mxu0 %vm8943_vm1, %v8942_v36 }
 0x2e7   :  { %8016 = vmatprep.subr.mxu0 %v8942_v36 }
 0x2e9   :  { %8009 = vmatmul.mubr.msk.f32.vlgmr.msra.gmra.mrb[8].mxu0 %vm243_vm2, %v1090_v51  ;;  %v1261_v53 = vpop.permute.xlu1 %1260 }
 0x2ea   :  { %8017 = vmatpush3.xpose.msk.msra.mxu0 %vm243_vm2, %v1263_v52  ;;  %8018 = vmatprep.mubr.msk.f32.mxu0 %vm8943_vm1, %v8942_v36 }
 0x2eb   :  { %8026 = vmatprep.subr.mxu0 %v8942_v36 }
 0x2ed   :  { %8019 = vmatmul.mubr.msk.f32.vlgmr.msra.gmra.mrb[10].mxu0 %vm243_vm2, %v1261_v53  ;;  %v1432_v55 = vpop.permute.xlu1 %1431 }
 0x2ee   :  { %8027 = vmatpush3.xpose.msk.msra.mxu0 %vm243_vm2, %v1434_v54  ;;  %8028 = vmatprep.mubr.msk.f32.mxu0 %vm8943_vm1, %v8942_v36 }
 0x2f1   :  { %8029 = vmatmul.mubr.msk.f32.vlgmr.msra.gmra.mrb[12].mxu0 %vm243_vm2, %v1432_v55 }
 0x3a8   :  { %v314_v56 = vpop.f32.mrb[2].mxu1 }
 0x3a9   :  { %v318_v57 = vmul.f32 0.35355338, %v314_v56  ;;  %v7960_v58 = vpop.f32.mrb[3].mxu1  ;;  %v481_v59 = vpop.f32.mrb[0].mxu0 }
 0x3aa   :  { %v485_v60 = vmul.f32 0.35355338, %v481_v59  ;;  %v7970_v61 = vpop.f32.mrb[1].mxu0 }
 0x3ab   :  { %v319_v62 = vsel %vm243_vm2, %v318_v57, -inf }
 0x3ac   :  { %320 = vmax.xlane.f32.xlu0 %v319_v62  ;;  %v486_v63 = vsel %vm243_vm2, %v485_v60, -inf }
 0x3ad   :  { %487 = vmax.xlane.f32.xlu1 %v486_v63 }
 0x3b0   :  { %v653_v2 = vpop.f32.mrb[2].mxu0 }
 0x3b1   :  { %v9208_v3 = vmul.f32 0.35355338, %v653_v2  ;;  %v7980_v4 = vpop.f32.mrb[3].mxu0 }
 0x3b3   :  { %v658_v5 = vsel %vm243_vm2, %v9208_v3, -inf }
 0x3b4   :  { %659 = vmax.xlane.f32.xlu0 %v658_v5  ;;  %v825_v6 = vpop.f32.mrb[4].mxu0 }
 0x3b5   :  { %v829_v7 = vmul.f32 0.35355338, %v825_v6  ;;  %v7990_v8 = vpop.f32.mrb[5].mxu0 }
 0x3b7   :  { %v830_v9 = vsel %vm243_vm2, %v829_v7, -inf }
 0x3b8   :  { %831 = vmax.xlane.f32.xlu0 %v830_v9  ;;  %v996_v10 = vpop.f32.mrb[6].mxu0 }
 0x3b9   :  { %v1000_v11 = vmul.f32 0.35355338, %v996_v10  ;;  %v8000_v12 = vpop.f32.mrb[7].mxu0 }
 0x3bb   :  { %v1001_v13 = vsel %vm243_vm2, %v1000_v11, -inf }
 0x3bc   :  { %1002 = vmax.xlane.f32.xlu0 %v1001_v13  ;;  %v1163_v14 = vpop.f32.mrb[8].mxu0 }
 0x3bd   :  { %v1167_v15 = vmul.f32 0.35355338, %v1163_v14  ;;  %v8010_v16 = vpop.f32.mrb[9].mxu0 }
 0x3bf   :  { %v1168_v17 = vsel %vm243_vm2, %v1167_v15, -inf }
 0x3c0   :  { %1169 = vmax.xlane.f32.xlu1 %v1168_v17  ;;  %v1334_v18 = vpop.f32.mrb[10].mxu0 }
 0x3c1   :  { %v1338_v19 = vmul.f32 0.35355338, %v1334_v18  ;;  %v8020_v20 = vpop.f32.mrb[11].mxu0 }
 0x3c3   :  { %v1339_v21 = vsel %vm243_vm2, %v1338_v19, -inf }
 0x3c4   :  { %1340 = vmax.xlane.f32.xlu0 %v1339_v21  ;;  %v1505_v22 = vpop.f32.mrb[12].mxu0 }
 0x3c5   :  { %v8030_v23 = vpop.f32.mrb[13].mxu0  ;;  %v1509_v24 = vmul.f32 0.35355338, %v1505_v22 }
 0x3c7   :  { %v1510_v25 = vsel %vm243_vm2, %v1509_v24, -inf }
 0x3d1   :  { %330 = vrot.lane.b32.xlu1 %v9135_v40, %s10286_s14 }
 0x3f5   :  { %1511 = vmax.xlane.f32.xlu1 %v1510_v25 }
 0x406   :  { %669 = vrot.lane.b32.xlu1 %v9135_v40, %s10284_s15 }
 0x40a   :  { %841 = vrot.lane.b32.xlu1 %v9135_v40, %s10280_s0 }
 0x40e   :  { %1012 = vrot.lane.b32.xlu1 %v9149_v41, %s10286_s14 }
 0x439   :  { %v321_v26 = vpop.xlane.xlu0 %320 }
 0x43a   :  { %v322_v27 = vsub.f32 %v318_v57, %v321_v26  ;;  %v488_v28 = vpop.xlane.xlu1 %487 }
 0x43b   :  { %v489_v29 = vsub.f32 %v485_v60, %v488_v28 }
 0x43c   :  { %v323_v30 = vmul.f32 1.442695, %v322_v27 }
 0x43d   :  { %v490_v31 = vmul.f32 1.442695, %v489_v29 }
 0x43e   :  { %8660 = vpow2.f32 %v323_v30 }
 0x43f   :  { %8662 = vpow2.f32 %v490_v31 }
 0x441   :  { %v660_v32 = vpop.xlane.xlu0 %659 }
 0x442   :  { %v661_v47 = vsub.f32 %v9208_v3, %v660_v32 }
 0x444   :  { %v662_v49 = vmul.f32 1.442695, %v661_v47 }
 0x445   :  { %v832_v33 = vpop.xlane.xlu0 %831 }
 0x446   :  { %v833_v34 = vsub.f32 %v829_v7, %v832_v33 }
 0x448   :  { %v8661_v35 = vpop.eup %8660  ;;  %v834_v37 = vmul.f32 1.442695, %v833_v34 }
 0x449   :  { %v9225_v38 = vpop.eup %8662  ;;  %v325_v39 = vsel %vm243_vm2, %v8661_v35, 0.0  ;;  %v1003_v48 = vpop.xlane.xlu0 %1002 }
 0x44a   :  { %8664 = vpow2.f32 %v834_v37  ;;  %326 = vadd.xlane.f32.xlu0 %v325_v39  ;;  %v492_v42 = vsel %vm243_vm2, %v9225_v38, 0.0  ;;  %v1004_v50 = vsub.f32 %v1000_v11, %v1003_v48  ;;  %v1604_v48 = vld [vmem:[%s10264_s5] sm:$0xff] }
 0x44b   :  { %493 = vadd.xlane.f32.xlu1 %v492_v42  ;;  %8666 = vpow2.f32 %v662_v49  ;;  %v1605_v49 = vld [vmem:[%s10264_s5 + $0x8] sm:$0xff] }
 0x44c   :  { %v1005_v52 = vmul.f32 1.442695, %v1004_v50  ;;  %v8481_v50 = vpack.c.bf16 %v1605_v49, %v1604_v48  ;;  %v7502_v48 = vld [vmem:[%s10266_s7] ss:$0 sm:$0xff] }
 0x44d   :  { %v1170_v43 = vpop.xlane.xlu1 %1169 }
 0x44e   :  { %8668 = vpow2.f32 %v1005_v52  ;;  %v1171_v54 = vsub.f32 %v1167_v15, %v1170_v43  ;;  %v1606_v52 = vld [vmem:[%s10264_s5 + $0x10] sm:$0xff]  ;;  %8482 = vmatprep.subr.bf16.mxu0 %v8481_v50 }
 0x44f   :  { %8484 = vmatpush3.bf16.msra.mxu0 %v8481_v50  ;;  %v7503_v50 = vld [vmem:[%s10267_s8] ss:$0 sm:$0xff] }
 0x450   :  { %v1172_v56 = vmul.f32 1.442695, %v1171_v54 }
 0x451   :  { %v331_v44 = vpop.permute.xlu1 %330  ;;  %v1341_v51 = vpop.xlane.xlu0 %1340 }
 0x452   :  { %7962 = vmatpush3.msra.mxu1 %v331_v44  ;;  %v1342_v53 = vsub.f32 %v1338_v19, %v1341_v51 }
 0x453   :  { %7971 = vmatprep.subr.mxu1 %v8942_v36 }
 0x454   :  { %v9231_v45 = vpop.eup %8664  ;;  %v1343_v55 = vmul.f32 1.442695, %v1342_v53  ;;  %v1607_v53 = vld [vmem:[%s10264_s5 + $0x18] sm:$0xff] }
 0x455   :  { %v836_v46 = vsel %vm243_vm2, %v9231_v45, 0.0  ;;  %v8667_v57 = vpop.eup %8666 }
 0x456   :  { %837 = vadd.xlane.f32.xlu1 %v836_v46  ;;  %8670 = vpow2.f32 %v1343_v55  ;;  %v8485_v55 = vpack.c.bf16 %v1607_v53, %v1606_v52 }
 0x457   :  { %8672 = vpow2.f32 %v1172_v56 }
 0x458   :  { %v9241_v58 = vpop.eup %8668  ;;  %8486 = vmatprep.subr.bf16.mxu0 %v8485_v55 }
 0x459   :  { %v1007_v60 = vsel %vm243_vm2, %v9241_v58, 0.0  ;;  %8488 = vmatpush3.bf16.msra.mxu0 %v8485_v55 }
 0x460   :  { %497 = vrot.lane.b32.xlu0 %v9135_v40, %s10274_s23  ;;  %v664_v40 = vsel %vm243_vm2, %v8667_v57, 0.0  ;;  %v9245_v61 = vpop.eup %8670 }
 0x461   :  { %v1345_v2 = vsel %vm243_vm2, %v9245_v61, 0.0  ;;  %v9249_v3 = vpop.eup %8672 }
 0x462   :  { %v1174_v4 = vsel %vm243_vm2, %v9249_v3, 0.0 }
 0x467   :  { %1179 = vrot.lane.b32.xlu1 %v9149_v41, %s10274_s23 }
 0x47f   :  { %665 = vadd.xlane.f32.xlu0 %v664_v40 }
 0x482   :  { %v1512_v59 = vpop.xlane.xlu1 %1511 }
 0x483   :  { %v1513_v62 = vsub.f32 %v1509_v24, %v1512_v59  ;;  %1008 = vadd.xlane.f32.xlu0 %v1007_v60 }
 0x485   :  { %v1514_v63 = vmul.f32 1.442695, %v1513_v62 }
 0x486   :  { %v670_v7 = vpop.permute.xlu1 %669 }
 0x487   :  { %8674 = vpow2.f32 %v1514_v63  ;;  %1346 = vadd.xlane.f32.xlu0 %v1345_v2 }
 0x48a   :  { %v842_v8 = vpop.permute.xlu1 %841 }
 0x48b   :  { %1175 = vadd.xlane.f32.xlu1 %v1174_v4 }
 0x48e   :  { %v1013_v9 = vpop.permute.xlu1 %1012 }
 0x491   :  { %v9253_v5 = vpop.eup %8674 }
 0x492   :  { %v1516_v6 = vsel %vm243_vm2, %v9253_v5, 0.0 }
 0x493   :  { %1517 = vadd.xlane.f32.xlu0 %v1516_v6 }
 0x49c   :  { %1521 = vrot.lane.b32.xlu1 %v9149_v41, %s10280_s0 }
 0x4a9   :  { %1350 = vrot.lane.b32.xlu0 %v9149_v41, %s10284_s15 }
 0x4d7   :  { %v327_v10 = vpop.xlane.xlu0 %326 }
 0x4d8   :  { %8676 = vrcp.f32 %v327_v10  ;;  %v494_v11 = vpop.xlane.xlu1 %493 }
 0x4d9   :  { %8678 = vrcp.f32 %v494_v11 }
 0x4db   :  { %v498_v15 = vpop.permute.xlu0 %497 }
 0x4e2   :  { %v8677_v12 = vpop.eup %8676 }
 0x4e3   :  { %v329_v13 = vmul.f32 %v8677_v12, %v8661_v35  ;;  %v8679_v14 = vpop.eup %8678  ;;  %v838_v16 = vpop.xlane.xlu1 %837 }
 0x4e4   :  { %v496_v41 = vmul.f32 %v8679_v14, %v9225_v38 }
 0x4e5   :  { %7964 = vmatmul.mubr.msk.f32.vlgmr.msra.gmra.mrb[4].mxu1 %vm243_vm2, %v329_v13 }
 0x4e6   :  { %7972 = vmatpush3.msra.mxu1 %v498_v15  ;;  %7973 = vmatprep.mubr.msk.f32.mxu1 %vm8943_vm1, %v8942_v36 }
 0x4e7   :  { %7981 = vmatprep.subr.mxu1 %v8942_v36  ;;  %v1180_v19 = vpop.permute.xlu1 %1179 }
 0x4e9   :  { %7974 = vmatmul.mubr.msk.f32.vlgmr.msra.gmra.mrb[6].mxu1 %vm243_vm2, %v496_v41 }
 0x4ea   :  { %7982 = vmatpush3.msra.mxu1 %v670_v7  ;;  %7983 = vmatprep.mubr.msk.f32.mxu1 %vm8943_vm1, %v8942_v36  ;;  %v7499_v7 = vld [vmem:[#allocation6] ss:$0 sm:$0xff] }
 0x4eb   :  { %7991 = vmatprep.subr.mxu1 %v8942_v36 }
 0x50c   :  { %v666_v17 = vpop.xlane.xlu0 %665 }
 0x50d   :  { %8680 = vrcp.f32 %v666_v17 }
 0x50e   :  { %8682 = vrcp.f32 %v838_v16 }
 0x510   :  { %v1009_v18 = vpop.xlane.xlu0 %1008 }
 0x511   :  { %8684 = vrcp.f32 %v1009_v18 }
 0x514   :  { %v1347_v21 = vpop.xlane.xlu0 %1346 }
 0x517   :  { %v8681_v20 = vpop.eup %8680 }
 0x518   :  { %v1176_v22 = vpop.xlane.xlu1 %1175  ;;  %v668_v23 = vmul.f32 %v8681_v20, %v8667_v57  ;;  %v8683_v24 = vpop.eup %8682 }
 0x519   :  { %8686 = vrcp.f32 %v1176_v22  ;;  %v840_v25 = vmul.f32 %v8683_v24, %v9231_v45  ;;  %v1743_v24 = vld [vmem:[%s10268_s9 + $0x8] sm:$0xff] }
 0x51a   :  { %7984 = vmatmul.mubr.msk.f32.vlgmr.msra.gmra.mrb[8].mxu1 %vm243_vm2, %v668_v23  ;;  %8688 = vrcp.f32 %v1347_v21  ;;  %v1742_v23 = vld [vmem:[%s10268_s9] sm:$0xff] }
 0x51b   :  { %7992 = vmatpush3.msra.mxu1 %v842_v8  ;;  %7993 = vmatprep.mubr.msk.f32.mxu1 %vm8943_vm1, %v8942_v36  ;;  %v8685_v26 = vpop.eup %8684 }
 0x51c   :  { %8001 = vmatprep.subr.mxu1 %v8942_v36  ;;  %v1011_v28 = vmul.f32 %v8685_v26, %v9241_v58  ;;  %v1522_v34 = vpop.permute.xlu1 %1521  ;;  %v8489_v26 = vpack.c.bf16 %v1743_v24, %v1742_v23  ;;  %v7517_v24 = vld [vmem:[%s10262_s3 + $0x38] sm:$0xff] }
 0x51e   :  { %7994 = vmatmul.mubr.msk.f32.vlgmr.msra.gmra.mrb[10].mxu1 %vm243_vm2, %v840_v25  ;;  %v1744_v25 = vld [vmem:[%s10268_s9 + $0x10] sm:$0xff] }
 0x51f   :  { %8002 = vmatpush3.msra.mxu1 %v1013_v9  ;;  %8003 = vmatprep.mubr.msk.f32.mxu1 %vm8943_vm1, %v8942_v36 }
 0x520   :  { %v1518_v27 = vpop.xlane.xlu0 %1517  ;;  %8011 = vmatprep.subr.mxu1 %v8942_v36 }
 0x521   :  { %8690 = vrcp.f32 %v1518_v27  ;;  %v1745_v27 = vld [vmem:[%s10268_s9 + $0x18] sm:$0xff] }
 0x522   :  { %8004 = vmatmul.mubr.msk.f32.vlgmr.msra.gmra.mrb[12].mxu1 %vm243_vm2, %v1011_v28  ;;  %v8493_v28 = vpack.c.bf16 %v1745_v27, %v1744_v25 }
 0x523   :  { %v8687_v29 = vpop.eup %8686  ;;  %8012 = vmatpush3.msra.mxu1 %v1180_v19  ;;  %8013 = vmatprep.mubr.msk.f32.mxu1 %vm8943_vm1, %v8942_v36 }
 0x524   :  { %v1351_v30 = vpop.permute.xlu0 %1350  ;;  %8021 = vmatprep.subr.mxu1 %v8942_v36  ;;  %v1178_v31 = vmul.f32 %v8687_v29, %v9249_v3  ;;  %v8689_v32 = vpop.eup %8688  ;;  %v1836_v29 = vld [vmem:[%s10270_s11] sm:$0xff] }
 0x525   :  { %v1349_v33 = vmul.f32 %v8689_v32, %v9245_v61 }
 0x526   :  { %8014 = vmatmul.mubr.msk.f32.vlgmr.msra.gmra.mrb[14].mxu1 %vm243_vm2, %v1178_v31  ;;  %v1838_v31 = vld [vmem:[%s10270_s11 + $0x10] sm:$0xff] }
 0x527   :  { %8022 = vmatpush3.msra.mxu1 %v1351_v30  ;;  %8023 = vmatprep.mubr.msk.f32.mxu1 %vm8943_vm1, %v8942_v36  ;;  %v1837_v30 = vld [vmem:[%s10270_s11 + $0x8] sm:$0xff] }
 0x528   :  { %8031 = vmatprep.subr.mxu1 %v8942_v36  ;;  %v8497_v32 = vpack.c.bf16 %v1837_v30, %v1836_v29 }
 0x52a   :  { %8024 = vmatmul.mubr.msk.f32.vlgmr.msra.gmra.mrb[16].mxu1 %vm243_vm2, %v1349_v33  ;;  %v1839_v33 = vld [vmem:[%s10270_s11 + $0x18] sm:$0xff]  ;;  %8498 = vmatprep.subr.bf16.mxu0 %v8497_v32 }
 0x52b   :  { %v8691_v35 = vpop.eup %8690  ;;  %8032 = vmatpush3.msra.mxu1 %v1522_v34  ;;  %8033 = vmatprep.mubr.msk.f32.mxu1 %vm8943_vm1, %v8942_v36  ;;  %v8501_v34 = vpack.c.bf16 %v1839_v33, %v1838_v31  ;;  %v7512_v33 = vld [vmem:[%s10260_s1 + $0x1] ss:$0 sm:$0xff] }
 0x52c   :  { %v1520_v37 = vmul.f32 %v8691_v35, %v9253_v5  ;;  %8490 = vmatprep.subr.bf16.mxu1 %v8489_v26  ;;  %v1840_v35 = vld [vmem:[%s10270_s11 + $0x20] sm:$0xff] }
 0x52e   :  { %8034 = vmatmul.mubr.msk.f32.vlgmr.msra.gmra.mrb[18].mxu1 %vm243_vm2, %v1520_v37  ;;  %v1841_v37 = vld [vmem:[%s10270_s11 + $0x28] sm:$0xff] }
 0x52f   :  { %8492 = vmatpush3.bf16.msra.mxu1 %v8489_v26 }
 0x530   :  { %8494 = vmatprep.subr.bf16.mxu1 %v8493_v28 }
 0x533   :  { %8496 = vmatpush3.bf16.msra.mxu1 %v8493_v28 }
 0x5b8   :  { %v402_v38 = vpop.f32.mrb[4].mxu1 }
 0x5b9   :  { %406 = vst.msk [vmem:[#allocation2] sm:$0xff] %vm243_vm2, %v402_v38  ;;  %v7965_v39 = vpop.f32.mrb[5].mxu1  ;;  %v8505_v38 = vpack.c.bf16 %v1841_v37, %v1840_v35 }
 0x5bc   :  { %v569_v42 = vpop.f32.mrb[6].mxu1 }
 0x5bd   :  { %574 = vrot.lane.b32.xlu0 %v569_v42, %s10282_s26  ;;  %v7975_v43 = vpop.f32.mrb[7].mxu1 }
 0x5ed   :  { %v741_v44 = vpop.f32.mrb[8].mxu1 }
 0x5ee   :  { %746 = vrot.lane.b32.xlu1 %v741_v44, %s10278_s18  ;;  %v7985_v45 = vpop.f32.mrb[9].mxu1 }
 0x5f1   :  { %v913_v46 = vpop.f32.mrb[10].mxu1 }
 0x5f2   :  { %918 = vrot.lane.b32.xlu1 %v913_v46, %s10276_s16  ;;  %v7995_v47 = vpop.f32.mrb[11].mxu1 }
 0x5f5   :  { %v1084_v51 = vpop.f32.mrb[12].mxu1 }
 0x5f6   :  { %1088 = vst.msk [vmem:[#allocation2 + $0x8] sm:$0xff] %vm243_vm2, %v1084_v51  ;;  %v8005_v54 = vpop.f32.mrb[13].mxu1 }
 0x5f9   :  { %v1251_v56 = vpop.f32.mrb[14].mxu1 }
 0x5fa   :  { %1256 = vrot.lane.b32.xlu0 %v1251_v56, %s10282_s26  ;;  %v8015_v57 = vpop.f32.mrb[15].mxu1 }
 0x5fb   :  { %v1842_v57 = vld [vmem:[%s10270_s11 + $0x30] sm:$0xff] }
 0x5fd   :  { %v1422_v40 = vpop.f32.mrb[16].mxu1 }
 0x5fe   :  { %1427 = vrot.lane.b32.xlu0 %v1422_v40, %s10278_s18  ;;  %v8025_v58 = vpop.f32.mrb[17].mxu1  ;;  %v1843_v40 = vld [vmem:[%s10270_s11 + $0x38] sm:$0xff] }
 0x5ff   :  { %v8509_v58 = vpack.c.bf16 %v1843_v40, %v1842_v57 }
 0x601   :  { %v1593_v59 = vpop.f32.mrb[18].mxu1 }
 0x602   :  { %1598 = vrot.lane.b32.xlu1 %v1593_v59, %s10276_s16  ;;  %v8035_v60 = vpop.f32.mrb[19].mxu1  ;;  %v7504_v59 = vld [vmem:[#allocation8] ss:$0 sm:$0xff] }
 0x62f   :  { %v575_v61 = vpop.permute.xlu0 %574 }
 0x630   :  { %578 = vst.msk [vmem:[#allocation2] sm:$0xff] %vm577_vm3, %v575_v61 }
 0x660   :  { %v747_v62 = vpop.permute.xlu1 %746 }
 0x661   :  { %750 = vst.msk [vmem:[#allocation2] sm:$0xff] %vm749_vm4, %v747_v62 }
 0x664   :  { %v919_v63 = vpop.permute.xlu1 %918 }
 0x665   :  { %922 = vst.msk [vmem:[#allocation2] sm:$0xff] %vm921_vm5, %v919_v63 }
 0x66c   :  { %v1257_v2 = vpop.permute.xlu0 %1256  ;;  %v1602_v3 = vld [vmem:[#allocation2] sm:$0xff] }
 0x66d   :  { %1259 = vst.msk [vmem:[#allocation2 + $0x8] sm:$0xff] %vm577_vm3, %v1257_v2  ;;  %8044 = vmatprep.mubr.msk.f32.mxu0 %vm104_vm0, %v1602_v3 }
 0x670   :  { %v1428_v4 = vpop.permute.xlu0 %1427 }
 0x671   :  { %1430 = vst.msk [vmem:[#allocation2 + $0x8] sm:$0xff] %vm749_vm4, %v1428_v4  ;;  %v7507_v4 = vld [vmem:[#allocation9] ss:$0 sm:$0xff] }
 0x674   :  { %v1599_v5 = vpop.permute.xlu1 %1598 }
 0x675   :  { %1601 = vst.msk [vmem:[#allocation2 + $0x8] sm:$0xff] %vm921_vm5, %v1599_v5 }
 0x67c   :  { %v1603_v6 = vld [vmem:[#allocation2 + $0x8] sm:$0xff] }
 0x67d   :  { %8045 = vmatmul.mubr.msk.f32.vlgmr.msra.gmra.mrb[14].mxu0 %vm104_vm0, %v1603_v6 }
 0x67e   :  { %8500 = vmatpush3.bf16.msra.mxu0 %v8497_v32 }
 0x67f   :  { %8502 = vmatprep.subr.bf16.mxu0 %v8501_v34 }
 0x682   :  { %8504 = vmatpush3.bf16.msra.mxu0 %v8501_v34 }
 0x683   :  { %8506 = vmatprep.subr.bf16.mxu0 %v8505_v38 }
 0x686   :  { %8508 = vmatpush3.bf16.msra.mxu0 %v8505_v38  ;;  %v7513_v38 = vld [vmem:[%s10261_s2 + $0x1] ss:$0 sm:$0xff] }
 0x687   :  { %8510 = vmatprep.subr.bf16.mxu0 %v8509_v58 }
 0x68a   :  { %8512 = vmatpush3.bf16.msra.mxu0 %v8509_v58 }
 0x68b   :  { %8098 = vmatprep.subr.mxu0 %v8942_v36 }
 0x750   :  { %v8046_v8 = vpop.f32.mrb[14].mxu0 }
 0x751   :  { %v1693_v9 = vadd.f32 %v8046_v8, %v7499_v7  ;;  %v1687_v10 = vpop.f32.mrb[15].mxu0 }
 0x752   :  { %v1688_v11 = vadd.f32 %v7499_v7, %v1687_v10 }
 0x753   :  { %v9324_v12 = vadd.f32 %v1693_v9, %v9096_v1 }
 0x754   :  { %v9327_v13 = vadd.f32 %v1688_v11, %v9094_v0 }
 0x755   :  { %v1703_v14 = vsel %vm104_vm0, %v9324_v12, 0.0 }
 0x756   :  { %1704 = vadd.xlane.f32.xlu1 %v1703_v14  ;;  %v1700_v15 = vsel %vm104_vm0, %v9327_v13, 0.0 }
 0x757   :  { %1701 = vadd.xlane.f32.xlu0 %v1700_v15 }
 0x7e3   :  { %v1705_v41 = vpop.xlane.xlu1 %1704 }
 0x7e4   :  { %v1707_v16 = vmul.f32 0.03125, %v1705_v41  ;;  %v1702_v17 = vpop.xlane.xlu0 %1701 }
 0x7e5   :  { %v1706_v18 = vmul.f32 0.03125, %v1702_v17 }
 0x7e6   :  { %v1709_v19 = vsub.f32 %v9324_v12, %v1707_v16 }
 0x7e7   :  { %v1708_v1 = vsub.f32 %v9327_v13, %v1706_v18 }
 0x7e8   :  { %v1711_v21 = vmul.f32 %v1709_v19, %v1709_v19 }
 0x7e9   :  { %v1710_v20 = vmul.f32 %v1708_v1, %v1708_v1 }
 0x7ea   :  { %v1715_v22 = vsel %vm104_vm0, %v1711_v21, 0.0  ;;  %v7515_v21 = vld [vmem:[%s10262_s3 + $0x28] sm:$0xff] }
 0x7eb   :  { %v1712_v0 = vsel %vm104_vm0, %v1710_v20, 0.0 }
 0x7ec   :  { %1713 = vadd.xlane.f32.xlu0 %v1712_v0  ;;  %v7514_v0 = vld [vmem:[%s10262_s3 + $0x20] sm:$0xff] }
 0x7ed   :  { %v8513_v23 = vpack.c.bf16 %v7515_v21, %v7514_v0 }
 0x7ef   :  { %8514 = vmatprep.subr.bf16.mxu1 %v8513_v23 }
 0x7f0   :  { %1716 = vadd.xlane.f32.xlu0 %v1715_v22  ;;  %v7516_v22 = vld [vmem:[%s10262_s3 + $0x30] sm:$0xff] }
 0x7f1   :  { %v8517_v25 = vpack.c.bf16 %v7517_v24, %v7516_v22 }
 0x879   :  { %v1714_v39 = vpop.xlane.xlu0 %1713 }
 0x87a   :  { %v1718_v42 = vmul.f32 0.03125, %v1714_v39 }
 0x87c   :  { %v1720_v43 = vadd.f32 1e-06, %v1718_v42 }
 0x87d   :  { %v1717_v44 = vpop.xlane.xlu0 %1716 }
 0x87e   :  { %8692 = vrsqrt.f32 %v1720_v43  ;;  %v1719_v45 = vmul.f32 0.03125, %v1717_v44 }
 0x880   :  { %v1721_v46 = vadd.f32 1e-06, %v1719_v45  ;;  %v7519_v45 = vld [vmem:[%s10263_s4 + $0x1] ss:$0 sm:$0xff] }
 0x882   :  { %8694 = vrsqrt.f32 %v1721_v46 }
 0x888   :  { %v8693_v47 = vpop.eup %8692 }
 0x889   :  { %v1724_v49 = vmul.f32 %v8693_v47, %v1708_v1 }
 0x88b   :  { %v1732_v51 = vmul.f32 %v7502_v48, %v1724_v49 }
 0x88c   :  { %v8695_v52 = vpop.eup %8694 }
 0x88d   :  { %v1725_v53 = vmul.f32 %v8695_v52, %v1709_v19  ;;  %v1740_v54 = vadd.f32 %v7503_v50, %v1732_v51 }
 0x88f   :  { %v1733_v55 = vmul.f32 %v7502_v48, %v1725_v53  ;;  %8055 = vmatprep.mubr.msk.f32.mxu1 %vm104_vm0, %v1740_v54 }
 0x891   :  { %v1741_v56 = vadd.f32 %v7503_v50, %v1733_v55 }
 0x893   :  { %8056 = vmatmul.mubr.msk.f32.vlgmr.msra.gmra.mrb[20].mxu1 %vm104_vm0, %v1741_v56 }
 0x894   :  { %8516 = vmatpush3.bf16.msra.mxu1 %v8513_v23 }
 0x895   :  { %8518 = vmatprep.subr.bf16.mxu1 %v8517_v25 }
 0x898   :  { %8520 = vmatpush3.bf16.msra.mxu1 %v8517_v25 }
 0x899   :  { %8088 = vmatprep.subr.mxu1 %v8942_v36 }
 0x966   :  { %v8057_v60 = vpop.f32.mrb[20].mxu1 }
 0x967   :  { %v1831_v61 = vadd.f32 %v8057_v60, %v7504_v59  ;;  %v1825_v62 = vpop.f32.mrb[21].mxu1 }
 0x968   :  { %v1826_v63 = vadd.f32 %v7504_v59, %v1825_v62 }
 0x969   :  { %v1835_v3 = vmax.f32 %v1831_v61, 0.0 }
 0x96a   :  { %v1834_v2 = vmax.f32 %v1826_v63, 0.0 }
 0x96c   :  { %8074 = vmatprep.mubr.msk.f32.mxu0 %vm1851_vm6, %v1834_v2 }
 0x96d   :  { %8075 = vmatmul.mubr.msk.f32.vlgmr.msra.gmra.mrb[16].mxu0 %vm1851_vm6, %v1835_v3 }
 0x96e   :  { %8100 = vmatprep.mubr.msk.f32.mxu0 %vm8943_vm1, %v8942_v36 }
 0xa40   :  { %v8076_v5 = vpop.f32.mrb[16].mxu0 }
 0xa41   :  { %v1930_v6 = vadd.f32 %v8076_v5, %v7507_v4  ;;  %v1924_v7 = vpop.f32.mrb[17].mxu0 }
 0xa42   :  { %v1925_v8 = vadd.f32 %v7507_v4, %v1924_v7 }
 0xa43   :  { %v9387_v9 = vadd.f32 %v1930_v6, %v9324_v12 }
 0xa44   :  { %v9390_v10 = vadd.f32 %v1925_v8, %v9327_v13 }
 0xa45   :  { %v1942_v11 = vsel %vm104_vm0, %v9387_v9, 0.0 }
 0xa46   :  { %1943 = vadd.xlane.f32.xlu1 %v1942_v11  ;;  %v1939_v14 = vsel %vm104_vm0, %v9390_v10, 0.0 }
 0xa47   :  { %1940 = vadd.xlane.f32.xlu0 %v1939_v14 }
 0xad3   :  { %v1944_v15 = vpop.xlane.xlu1 %1943 }
 0xad4   :  { %v1946_v41 = vmul.f32 0.03125, %v1944_v15  ;;  %v1941_v16 = vpop.xlane.xlu0 %1940 }
 0xad5   :  { %v1945_v17 = vmul.f32 0.03125, %v1941_v16 }
 0xad6   :  { %v1948_v18 = vsub.f32 %v9387_v9, %v1946_v41 }
 0xad7   :  { %v1947_v12 = vsub.f32 %v9390_v10, %v1945_v17 }
 0xad8   :  { %v1950_v19 = vmul.f32 %v1948_v18, %v1948_v18 }
 0xad9   :  { %v1949_v1 = vmul.f32 %v1947_v12, %v1947_v12 }
 0xada   :  { %v1954_v13 = vsel %vm104_vm0, %v1950_v19, 0.0 }
 0xadb   :  { %1955 = vadd.xlane.f32.xlu1 %v1954_v13  ;;  %v1951_v20 = vsel %vm104_vm0, %v1949_v1, 0.0 }
 0xadc   :  { %1952 = vadd.xlane.f32.xlu0 %v1951_v20 }
 0xb68   :  { %v1956_v26 = vpop.xlane.xlu1 %1955 }
 0xb69   :  { %v1958_v27 = vmul.f32 0.03125, %v1956_v26  ;;  %v1953_v28 = vpop.xlane.xlu0 %1952 }
 0xb6a   :  { %v1957_v29 = vmul.f32 0.03125, %v1953_v28 }
 0xb6b   :  { %v1960_v30 = vadd.f32 1e-06, %v1958_v27 }
 0xb6c   :  { %v1959_v31 = vadd.f32 1e-06, %v1957_v29 }
 0xb6d   :  { %8696 = vrsqrt.f32 %v1960_v30 }
 0xb6e   :  { %8698 = vrsqrt.f32 %v1959_v31 }
 0xb77   :  { %v8697_v32 = vpop.eup %8696 }
 0xb78   :  { %v8699_v34 = vpop.eup %8698  ;;  %v1964_v35 = vmul.f32 %v8697_v32, %v1948_v18 }
 0xb79   :  { %v1963_v37 = vmul.f32 %v8699_v34, %v1947_v12 }
 0xb7a   :  { %v1972_v39 = vmul.f32 %v7512_v33, %v1964_v35 }
 0xb7b   :  { %v1971_v42 = vmul.f32 %v7512_v33, %v1963_v37 }
 0xb7c   :  { %v1980_v44 = vadd.f32 %v7513_v38, %v1972_v39 }
 0xb7d   :  { %v1979_v43 = vadd.f32 %v7513_v38, %v1971_v42 }
 0xb7f   :  { %8085 = vmatprep.mubr.msk.f32.mxu1 %vm104_vm0, %v1979_v43 }
 0xb80   :  { %8086 = vmatmul.mubr.msk.f32.vlgmr.msra.gmra.mrb[22].mxu1 %vm104_vm0, %v1980_v44 }
 0xb81   :  { %8090 = vmatprep.mubr.msk.f32.mxu1 %vm8943_vm1, %v8942_v36 }
 0xc53   :  { %v8087_v46 = vpop.f32.mrb[22].mxu1 }
 0xc54   :  { %v2066_v47 = vpop.f32.mrb[23].mxu1  ;;  %v9440_v49 = vadd.f32 %v8087_v46, %v7519_v45 }
 0xc55   :  { %v9426_v48 = vadd.f32 %v7519_v45, %v2066_v47 }
 0xc57   :  { %2243 = vrot.lane.b32.xlu1 %v9426_v48, %s8944_s29  ;;  %2076 = vrot.lane.b32.xlu0 %v9426_v48, %s8945_s30 }
 0xc5b   :  { %2241 = vrot.lane.b32.xlu1 %v9426_v48, %s8946_s10  ;;  %2412 = vrot.lane.b32.xlu0 %v9426_v48, %s8947_s21 }
 0xc5f   :  { %2414 = vrot.lane.b32.xlu1 %v9426_v48, %s8948_s12  ;;  %2583 = vrot.lane.b32.xlu0 %v9426_v48, %s10290_s19 }
 0xc63   :  { %2585 = vrot.lane.b32.xlu1 %v9426_v48, %s10288_s24  ;;  %2922 = vrot.lane.b32.xlu0 %v9440_v49, %s8944_s29 }
 0xc67   :  { %2755 = vrot.lane.b32.xlu1 %v9440_v49, %s8945_s30  ;;  %3093 = vrot.lane.b32.xlu0 %v9440_v49, %s8948_s12 }
 0xc6b   :  { %2920 = vrot.lane.b32.xlu1 %v9440_v49, %s8946_s10  ;;  %3264 = vrot.lane.b32.xlu0 %v9440_v49, %s10288_s24 }
 0xc6f   :  { %3091 = vrot.lane.b32.xlu1 %v9440_v49, %s8947_s21 }
 0xc73   :  { %3262 = vrot.lane.b32.xlu1 %v9440_v49, %s10290_s19 }
 0xcc9   :  { %v2244_v50 = vpop.permute.xlu1 %2243  ;;  %v2077_v51 = vpop.permute.xlu0 %2076 }
 0xcca   :  { %8089 = vmatpush3.xpose.msk.msra.mxu1 %vm243_vm2, %v2077_v51  ;;  %8099 = vmatpush3.xpose.msk.msra.mxu0 %vm243_vm2, %v2244_v50 }
 0xccb   :  { %8108 = vmatprep.subr.mxu0 %v8942_v36  ;;  %8093 = vmatprep.subr.mxu1 %v8942_v36 }
 0xccd   :  { %v2242_v52 = vpop.permute.xlu1 %2241  ;;  %8091 = vmatmul.mubr.msk.f32.vlgmr.msra.gmra.mrb[24].mxu1 %vm243_vm2, %v9426_v48  ;;  %v2413_v53 = vpop.permute.xlu0 %2412 }
 0xcce   :  { %8101 = vmatmul.mubr.msk.f32.vlgmr.msra.gmra.mrb[18].mxu0 %vm243_vm2, %v2242_v52  ;;  %8095 = vmatprep.mubr.msk.f32.mxu1 %vm8943_vm1, %v8942_v36 }
 0xccf   :  { %8110 = vmatprep.mubr.msk.f32.mxu0 %vm8943_vm1, %v8942_v36 }
 0xcd1   :  { %v2415_v54 = vpop.permute.xlu1 %2414  ;;  %v2584_v55 = vpop.permute.xlu0 %2583 }
 0xcd2   :  { %8109 = vmatpush3.xpose.msk.msra.mxu0 %vm243_vm2, %v2415_v54 }
 0xcd3   :  { %8118 = vmatprep.subr.mxu0 %v8942_v36 }
 0xcd5   :  { %v2586_v56 = vpop.permute.xlu1 %2585  ;;  %8111 = vmatmul.mubr.msk.f32.vlgmr.msra.gmra.mrb[20].mxu0 %vm243_vm2, %v2413_v53  ;;  %v2923_v57 = vpop.permute.xlu0 %2922 }
 0xcd6   :  { %8119 = vmatpush3.xpose.msk.msra.mxu0 %vm243_vm2, %v2586_v56  ;;  %8120 = vmatprep.mubr.msk.f32.mxu0 %vm8943_vm1, %v8942_v36 }
 0xcd7   :  { %8128 = vmatprep.subr.mxu0 %v8942_v36 }
 0xcd9   :  { %v2756_v40 = vpop.permute.xlu1 %2755  ;;  %8121 = vmatmul.mubr.msk.f32.vlgmr.msra.gmra.mrb[22].mxu0 %vm243_vm2, %v2584_v55  ;;  %v3094_v59 = vpop.permute.xlu0 %3093 }
 0xcda   :  { %8129 = vmatpush3.xpose.msk.msra.mxu0 %vm243_vm2, %v2756_v40  ;;  %8130 = vmatprep.mubr.msk.f32.mxu0 %vm8943_vm1, %v8942_v36 }
 0xcdb   :  { %8138 = vmatprep.subr.mxu0 %v8942_v36 }
 0xcdd   :  { %v2921_v58 = vpop.permute.xlu1 %2920  ;;  %8131 = vmatmul.mubr.msk.f32.vlgmr.msra.gmra.mrb[24].mxu0 %vm243_vm2, %v9440_v49  ;;  %v3265_v61 = vpop.permute.xlu0 %3264 }
 0xcde   :  { %8139 = vmatpush3.xpose.msk.msra.mxu0 %vm243_vm2, %v2923_v57  ;;  %8140 = vmatprep.mubr.msk.f32.mxu0 %vm8943_vm1, %v8942_v36 }
 0xcdf   :  { %8148 = vmatprep.subr.mxu0 %v8942_v36 }
 0xce1   :  { %8141 = vmatmul.mubr.msk.f32.vlgmr.msra.gmra.mrb[26].mxu0 %vm243_vm2, %v2921_v58  ;;  %v3092_v60 = vpop.permute.xlu1 %3091 }
 0xce2   :  { %8149 = vmatpush3.xpose.msk.msra.mxu0 %vm243_vm2, %v3094_v59  ;;  %8150 = vmatprep.mubr.msk.f32.mxu0 %vm8943_vm1, %v8942_v36 }
 0xce3   :  { %8158 = vmatprep.subr.mxu0 %v8942_v36 }
 0xce5   :  { %8151 = vmatmul.mubr.msk.f32.vlgmr.msra.gmra.mrb[28].mxu0 %vm243_vm2, %v3092_v60  ;;  %v3263_v62 = vpop.permute.xlu1 %3262 }
 0xce6   :  { %8159 = vmatpush3.xpose.msk.msra.mxu0 %vm243_vm2, %v3265_v61  ;;  %8160 = vmatprep.mubr.msk.f32.mxu0 %vm8943_vm1, %v8942_v36 }
 0xce9   :  { %8161 = vmatmul.mubr.msk.f32.vlgmr.msra.gmra.mrb[30].mxu0 %vm243_vm2, %v3263_v62 }
 0xda0   :  { %v2148_v63 = vpop.f32.mrb[24].mxu1 }
 0xda1   :  { %v2152_v2 = vmul.f32 0.35355338, %v2148_v63  ;;  %v8092_v3 = vpop.f32.mrb[25].mxu1  ;;  %v2315_v4 = vpop.f32.mrb[18].mxu0 }
 0xda2   :  { %v2319_v5 = vmul.f32 0.35355338, %v2315_v4  ;;  %v8102_v6 = vpop.f32.mrb[19].mxu0 }
 0xda3   :  { %v2153_v7 = vsel %vm243_vm2, %v2152_v2, -inf }
 0xda4   :  { %2154 = vmax.xlane.f32.xlu0 %v2153_v7  ;;  %v2320_v8 = vsel %vm243_vm2, %v2319_v5, -inf }
 0xda5   :  { %2321 = vmax.xlane.f32.xlu1 %v2320_v8 }
 0xda8   :  { %v2486_v11 = vpop.f32.mrb[20].mxu0 }
 0xda9   :  { %v9499_v14 = vmul.f32 0.35355338, %v2486_v11  ;;  %v8112_v15 = vpop.f32.mrb[21].mxu0 }
 0xdab   :  { %v2491_v41 = vsel %vm243_vm2, %v9499_v14, -inf }
 0xdac   :  { %2492 = vmax.xlane.f32.xlu0 %v2491_v41  ;;  %v2657_v16 = vpop.f32.mrb[22].mxu0 }
 0xdad   :  { %v2661_v17 = vmul.f32 0.35355338, %v2657_v16  ;;  %v8122_v18 = vpop.f32.mrb[23].mxu0 }
 0xdaf   :  { %v2662_v12 = vsel %vm243_vm2, %v2661_v17, -inf }
 0xdb0   :  { %2663 = vmax.xlane.f32.xlu0 %v2662_v12  ;;  %v2827_v19 = vpop.f32.mrb[24].mxu0 }
 0xdb1   :  { %v2831_v1 = vmul.f32 0.35355338, %v2827_v19  ;;  %v8132_v13 = vpop.f32.mrb[25].mxu0 }
 0xdb3   :  { %v2832_v20 = vsel %vm243_vm2, %v2831_v1, -inf }
 0xdb4   :  { %2833 = vmax.xlane.f32.xlu0 %v2832_v20  ;;  %v2994_v0 = vpop.f32.mrb[26].mxu0 }
 0xdb5   :  { %v2998_v21 = vmul.f32 0.35355338, %v2994_v0  ;;  %v8142_v22 = vpop.f32.mrb[27].mxu0 }
 0xdb7   :  { %v2999_v23 = vsel %vm243_vm2, %v2998_v21, -inf }
 0xdb8   :  { %3000 = vmax.xlane.f32.xlu1 %v2999_v23  ;;  %v3165_v24 = vpop.f32.mrb[28].mxu0 }
 0xdb9   :  { %v3169_v25 = vmul.f32 0.35355338, %v3165_v24  ;;  %v8152_v26 = vpop.f32.mrb[29].mxu0 }
 0xdbb   :  { %v3170_v27 = vsel %vm243_vm2, %v3169_v25, -inf }
 0xdbc   :  { %3171 = vmax.xlane.f32.xlu0 %v3170_v27  ;;  %v3336_v28 = vpop.f32.mrb[30].mxu0 }
 0xdbd   :  { %v8162_v29 = vpop.f32.mrb[31].mxu0  ;;  %v3340_v30 = vmul.f32 0.35355338, %v3336_v28 }
 0xdbf   :  { %v3341_v31 = vsel %vm243_vm2, %v3340_v30, -inf }
 0xdc9   :  { %2164 = vrot.lane.b32.xlu1 %v9426_v48, %s10286_s14 }
 0xded   :  { %3342 = vmax.xlane.f32.xlu1 %v3341_v31 }
 0xdfe   :  { %2502 = vrot.lane.b32.xlu1 %v9426_v48, %s10284_s15 }
 0xe02   :  { %2673 = vrot.lane.b32.xlu1 %v9426_v48, %s10280_s0 }
 0xe06   :  { %2843 = vrot.lane.b32.xlu1 %v9440_v49, %s10286_s14 }
 0xe31   :  { %v2155_v32 = vpop.xlane.xlu0 %2154 }
 0xe32   :  { %v2156_v33 = vsub.f32 %v2152_v2, %v2155_v32  ;;  %v2322_v34 = vpop.xlane.xlu1 %2321 }
 0xe33   :  { %v2323_v35 = vsub.f32 %v2319_v5, %v2322_v34 }
 0xe34   :  { %v2157_v37 = vmul.f32 1.442695, %v2156_v33 }
 0xe35   :  { %v2324_v38 = vmul.f32 1.442695, %v2323_v35 }
 0xe36   :  { %8700 = vpow2.f32 %v2157_v37 }
 0xe37   :  { %8702 = vpow2.f32 %v2324_v38 }
 0xe39   :  { %v2493_v39 = vpop.xlane.xlu0 %2492 }
 0xe3a   :  { %v2494_v55 = vsub.f32 %v9499_v14, %v2493_v39 }
 0xe3c   :  { %v2495_v57 = vmul.f32 1.442695, %v2494_v55 }
 0xe3d   :  { %v2664_v42 = vpop.xlane.xlu0 %2663 }
 0xe3e   :  { %v2665_v43 = vsub.f32 %v2661_v17, %v2664_v42 }
 0xe40   :  { %v8701_v44 = vpop.eup %8700  ;;  %v2666_v45 = vmul.f32 1.442695, %v2665_v43 }
 0xe41   :  { %v9516_v46 = vpop.eup %8702  ;;  %v2159_v47 = vsel %vm243_vm2, %v8701_v44, 0.0  ;;  %v2834_v56 = vpop.xlane.xlu0 %2833 }
 0xe42   :  { %8704 = vpow2.f32 %v2666_v45  ;;  %2160 = vadd.xlane.f32.xlu0 %v2159_v47  ;;  %v2326_v50 = vsel %vm243_vm2, %v9516_v46, 0.0  ;;  %v2835_v40 = vsub.f32 %v2831_v1, %v2834_v56  ;;  %v7546_v56 = vld [vmem:[%s10264_s5 + $0x20] sm:$0xff] }
 0xe43   :  { %2327 = vadd.xlane.f32.xlu1 %v2326_v50  ;;  %8706 = vpow2.f32 %v2495_v57  ;;  %v7547_v57 = vld [vmem:[%s10264_s5 + $0x28] sm:$0xff] }
 0xe44   :  { %v2836_v59 = vmul.f32 1.442695, %v2835_v40  ;;  %v8521_v40 = vpack.c.bf16 %v7547_v57, %v7546_v56  ;;  %v7555_v56 = vld [vmem:[%s10266_s7 + $0x1] ss:$0 sm:$0xff] }
 0xe45   :  { %v3001_v51 = vpop.xlane.xlu1 %3000 }
 0xe46   :  { %8708 = vpow2.f32 %v2836_v59  ;;  %v3002_v61 = vsub.f32 %v2998_v21, %v3001_v51  ;;  %v7548_v59 = vld [vmem:[%s10264_s5 + $0x30] sm:$0xff]  ;;  %8522 = vmatprep.subr.bf16.mxu0 %v8521_v40 }
 0xe47   :  { %8524 = vmatpush3.bf16.msra.mxu0 %v8521_v40  ;;  %v7556_v40 = vld [vmem:[%s10267_s8 + $0x1] ss:$0 sm:$0xff] }
 0xe48   :  { %v3003_v63 = vmul.f32 1.442695, %v3002_v61 }
 0xe49   :  { %v2165_v52 = vpop.permute.xlu1 %2164  ;;  %v3172_v58 = vpop.xlane.xlu0 %3171 }
 0xe4a   :  { %8094 = vmatpush3.msra.mxu1 %v2165_v52  ;;  %v3173_v60 = vsub.f32 %v3169_v25, %v3172_v58 }
 0xe4b   :  { %8103 = vmatprep.subr.mxu1 %v8942_v36 }
 0xe4c   :  { %v9522_v53 = vpop.eup %8704  ;;  %v3174_v62 = vmul.f32 1.442695, %v3173_v60  ;;  %v7549_v60 = vld [vmem:[%s10264_s5 + $0x38] sm:$0xff] }
 0xe4d   :  { %v2668_v54 = vsel %vm243_vm2, %v9522_v53, 0.0  ;;  %v8707_v2 = vpop.eup %8706 }
 0xe4e   :  { %2669 = vadd.xlane.f32.xlu1 %v2668_v54  ;;  %8710 = vpow2.f32 %v3174_v62  ;;  %v8525_v62 = vpack.c.bf16 %v7549_v60, %v7548_v59 }
 0xe4f   :  { %8712 = vpow2.f32 %v3003_v63 }
 0xe50   :  { %v9532_v3 = vpop.eup %8708  ;;  %8526 = vmatprep.subr.bf16.mxu0 %v8525_v62 }
 0xe51   :  { %v2838_v5 = vsel %vm243_vm2, %v9532_v3, 0.0  ;;  %8528 = vmatpush3.bf16.msra.mxu0 %v8525_v62 }
 0xe58   :  { %2331 = vrot.lane.b32.xlu0 %v9426_v48, %s10292_s17  ;;  %v2497_v48 = vsel %vm243_vm2, %v8707_v2, 0.0  ;;  %v9536_v6 = vpop.eup %8710 }
 0xe59   :  { %v3176_v11 = vsel %vm243_vm2, %v9536_v6, 0.0  ;;  %v9540_v14 = vpop.eup %8712 }
 0xe5a   :  { %v3005_v15 = vsel %vm243_vm2, %v9540_v14, 0.0 }
 0xe5f   :  { %3010 = vrot.lane.b32.xlu1 %v9440_v49, %s10292_s17 }
 0xe77   :  { %2498 = vadd.xlane.f32.xlu0 %v2497_v48 }
 0xe7a   :  { %v3343_v4 = vpop.xlane.xlu1 %3342 }
 0xe7b   :  { %v3344_v7 = vsub.f32 %v3340_v30, %v3343_v4  ;;  %2839 = vadd.xlane.f32.xlu0 %v2838_v5 }
 0xe7d   :  { %v3345_v8 = vmul.f32 1.442695, %v3344_v7 }
 0xe7e   :  { %v2503_v17 = vpop.permute.xlu1 %2502 }
 0xe7f   :  { %8714 = vpow2.f32 %v3345_v8  ;;  %3177 = vadd.xlane.f32.xlu0 %v3176_v11 }
 0xe82   :  { %v2674_v18 = vpop.permute.xlu1 %2673 }
 0xe83   :  { %3006 = vadd.xlane.f32.xlu1 %v3005_v15 }
 0xe86   :  { %v2844_v12 = vpop.permute.xlu1 %2843 }
 0xe89   :  { %v9544_v41 = vpop.eup %8714 }
 0xe8a   :  { %v3347_v16 = vsel %vm243_vm2, %v9544_v41, 0.0 }
 0xe8b   :  { %3348 = vadd.xlane.f32.xlu0 %v3347_v16 }
 0xe94   :  { %3352 = vrot.lane.b32.xlu1 %v9440_v49, %s10280_s0 }
 0xea1   :  { %3181 = vrot.lane.b32.xlu0 %v9440_v49, %s10284_s15 }
 0xecf   :  { %v2161_v19 = vpop.xlane.xlu0 %2160 }
 0xed0   :  { %8716 = vrcp.f32 %v2161_v19  ;;  %v2328_v1 = vpop.xlane.xlu1 %2327 }
 0xed1   :  { %8718 = vrcp.f32 %v2328_v1 }
 0xed3   :  { %v2332_v21 = vpop.permute.xlu0 %2331 }
 0xeda   :  { %v8717_v13 = vpop.eup %8716 }
 0xedb   :  { %v2163_v20 = vmul.f32 %v8717_v13, %v8701_v44  ;;  %v8719_v0 = vpop.eup %8718  ;;  %v2670_v22 = vpop.xlane.xlu1 %2669 }
 0xedc   :  { %v2330_v49 = vmul.f32 %v8719_v0, %v9516_v46 }
 0xedd   :  { %8096 = vmatmul.mubr.msk.f32.vlgmr.msra.gmra.mrb[26].mxu1 %vm243_vm2, %v2163_v20 }
 0xede   :  { %8104 = vmatpush3.msra.mxu1 %v2332_v21  ;;  %8105 = vmatprep.mubr.msk.f32.mxu1 %vm8943_vm1, %v8942_v36 }
 0xedf   :  { %8113 = vmatprep.subr.mxu1 %v8942_v36  ;;  %v3011_v25 = vpop.permute.xlu1 %3010 }
 0xee1   :  { %8106 = vmatmul.mubr.msk.f32.vlgmr.msra.gmra.mrb[28].mxu1 %vm243_vm2, %v2330_v49 }
 0xee2   :  { %8114 = vmatpush3.msra.mxu1 %v2503_v17  ;;  %8115 = vmatprep.mubr.msk.f32.mxu1 %vm8943_vm1, %v8942_v36  ;;  %v7550_v17 = vld [vmem:[#allocation6 + $0x1] ss:$0 sm:$0xff] }
 0xee3   :  { %8123 = vmatprep.subr.mxu1 %v8942_v36 }
 0xf04   :  { %v2499_v23 = vpop.xlane.xlu0 %2498 }
 0xf05   :  { %8720 = vrcp.f32 %v2499_v23 }
 0xf06   :  { %8722 = vrcp.f32 %v2670_v22 }
 0xf08   :  { %v2840_v24 = vpop.xlane.xlu0 %2839 }
 0xf09   :  { %8724 = vrcp.f32 %v2840_v24 }
 0xf0c   :  { %v3178_v27 = vpop.xlane.xlu0 %3177 }
 0xf0f   :  { %v8721_v26 = vpop.eup %8720 }
 0xf10   :  { %v3007_v28 = vpop.xlane.xlu1 %3006  ;;  %v2501_v29 = vmul.f32 %v8721_v26, %v8707_v2  ;;  %v8723_v30 = vpop.eup %8722 }
 0xf11   :  { %8726 = vrcp.f32 %v3007_v28  ;;  %v2672_v31 = vmul.f32 %v8723_v30, %v9522_v53  ;;  %v7558_v30 = vld [vmem:[%s10268_s9 + $0x28] sm:$0xff] }
 0xf12   :  { %8116 = vmatmul.mubr.msk.f32.vlgmr.msra.gmra.mrb[30].mxu1 %vm243_vm2, %v2501_v29  ;;  %8728 = vrcp.f32 %v3178_v27  ;;  %v7557_v29 = vld [vmem:[%s10268_s9 + $0x20] sm:$0xff] }
 0xf13   :  { %8124 = vmatpush3.msra.mxu1 %v2674_v18  ;;  %8125 = vmatprep.mubr.msk.f32.mxu1 %vm8943_vm1, %v8942_v36  ;;  %v8725_v32 = vpop.eup %8724 }
 0xf14   :  { %8133 = vmatprep.subr.mxu1 %v8942_v36  ;;  %v2842_v34 = vmul.f32 %v8725_v32, %v9532_v3  ;;  %v3353_v43 = vpop.permute.xlu1 %3352  ;;  %v8529_v32 = vpack.c.bf16 %v7558_v30, %v7557_v29  ;;  %v7582_v30 = vld [vmem:[%s10262_s3 + $0x58] sm:$0xff] }
 0xf16   :  { %8126 = vmatmul.mubr.msk.f32.vlgmr.msra.gmra.mrb[32].mxu1 %vm243_vm2, %v2672_v31  ;;  %v7559_v31 = vld [vmem:[%s10268_s9 + $0x30] sm:$0xff] }
 0xf17   :  { %8134 = vmatpush3.msra.mxu1 %v2844_v12  ;;  %8135 = vmatprep.mubr.msk.f32.mxu1 %vm8943_vm1, %v8942_v36 }
 0xf18   :  { %v3349_v33 = vpop.xlane.xlu0 %3348  ;;  %8143 = vmatprep.subr.mxu1 %v8942_v36 }
 0xf19   :  { %8730 = vrcp.f32 %v3349_v33  ;;  %v7560_v33 = vld [vmem:[%s10268_s9 + $0x38] sm:$0xff] }
 0xf1a   :  { %8136 = vmatmul.mubr.msk.f32.vlgmr.msra.gmra.mrb[34].mxu1 %vm243_vm2, %v2842_v34  ;;  %v8533_v34 = vpack.c.bf16 %v7560_v33, %v7559_v31 }
 0xf1b   :  { %v8727_v35 = vpop.eup %8726  ;;  %8144 = vmatpush3.msra.mxu1 %v3011_v25  ;;  %8145 = vmatprep.mubr.msk.f32.mxu1 %vm8943_vm1, %v8942_v36 }
 0xf1c   :  { %v3182_v37 = vpop.permute.xlu0 %3181  ;;  %8153 = vmatprep.subr.mxu1 %v8942_v36  ;;  %v3009_v38 = vmul.f32 %v8727_v35, %v9540_v14  ;;  %v8729_v39 = vpop.eup %8728  ;;  %v7564_v35 = vld [vmem:[%s10270_s11 + $0x40] sm:$0xff] }
 0xf1d   :  { %v3180_v42 = vmul.f32 %v8729_v39, %v9536_v6 }
 0xf1e   :  { %8146 = vmatmul.mubr.msk.f32.vlgmr.msra.gmra.mrb[36].mxu1 %vm243_vm2, %v3009_v38  ;;  %v7566_v38 = vld [vmem:[%s10270_s11 + $0x50] sm:$0xff] }
 0xf1f   :  { %8154 = vmatpush3.msra.mxu1 %v3182_v37  ;;  %8155 = vmatprep.mubr.msk.f32.mxu1 %vm8943_vm1, %v8942_v36  ;;  %v7565_v37 = vld [vmem:[%s10270_s11 + $0x48] sm:$0xff] }
 0xf20   :  { %8163 = vmatprep.subr.mxu1 %v8942_v36  ;;  %v8537_v39 = vpack.c.bf16 %v7565_v37, %v7564_v35 }
 0xf22   :  { %8156 = vmatmul.mubr.msk.f32.vlgmr.msra.gmra.mrb[38].mxu1 %vm243_vm2, %v3180_v42  ;;  %v7567_v42 = vld [vmem:[%s10270_s11 + $0x58] sm:$0xff]  ;;  %8538 = vmatprep.subr.bf16.mxu0 %v8537_v39 }
 0xf23   :  { %v8731_v44 = vpop.eup %8730  ;;  %8164 = vmatpush3.msra.mxu1 %v3353_v43  ;;  %8165 = vmatprep.mubr.msk.f32.mxu1 %vm8943_vm1, %v8942_v36  ;;  %v8541_v43 = vpack.c.bf16 %v7567_v42, %v7566_v38  ;;  %v7577_v42 = vld [vmem:[%s10260_s1 + $0x2] ss:$0 sm:$0xff] }
 0xf24   :  { %v3351_v45 = vmul.f32 %v8731_v44, %v9544_v41  ;;  %8530 = vmatprep.subr.bf16.mxu1 %v8529_v32  ;;  %v7568_v44 = vld [vmem:[%s10270_s11 + $0x60] sm:$0xff] }
 0xf26   :  { %8166 = vmatmul.mubr.msk.f32.vlgmr.msra.gmra.mrb[40].mxu1 %vm243_vm2, %v3351_v45  ;;  %v7569_v45 = vld [vmem:[%s10270_s11 + $0x68] sm:$0xff] }
 0xf27   :  { %8532 = vmatpush3.bf16.msra.mxu1 %v8529_v32 }
 0xf28   :  { %8534 = vmatprep.subr.bf16.mxu1 %v8533_v34 }
 0xf2b   :  { %8536 = vmatpush3.bf16.msra.mxu1 %v8533_v34 }
 0xfb0   :  { %v2236_v46 = vpop.f32.mrb[26].mxu1 }
 0xfb1   :  { %2240 = vst.msk [vmem:[#allocation2] sm:$0xff] %vm243_vm2, %v2236_v46  ;;  %v8097_v47 = vpop.f32.mrb[27].mxu1  ;;  %v8545_v46 = vpack.c.bf16 %v7569_v45, %v7568_v44 }
 0xfb4   :  { %v2403_v50 = vpop.f32.mrb[28].mxu1 }
 0xfb5   :  { %2408 = vrot.lane.b32.xlu0 %v2403_v50, %s10282_s26  ;;  %v8107_v51 = vpop.f32.mrb[29].mxu1 }
 0xfe5   :  { %v2574_v52 = vpop.f32.mrb[30].mxu1 }
 0xfe6   :  { %2579 = vrot.lane.b32.xlu1 %v2574_v52, %s10293_s20  ;;  %v8117_v53 = vpop.f32.mrb[31].mxu1 }
 0xfe9   :  { %v2745_v54 = vpop.f32.mrb[32].mxu1 }
 0xfea   :  { %2750 = vrot.lane.b32.xlu1 %v2745_v54, %s10294_s22  ;;  %v8127_v55 = vpop.f32.mrb[33].mxu1 }
 0xfed   :  { %v2915_v58 = vpop.f32.mrb[34].mxu1 }
 0xfee   :  { %2919 = vst.msk [vmem:[#allocation2 + $0x8] sm:$0xff] %vm243_vm2, %v2915_v58  ;;  %v8137_v61 = vpop.f32.mrb[35].mxu1 }
 0xff1   :  { %v3082_v63 = vpop.f32.mrb[36].mxu1 }
 0xff2   :  { %3087 = vrot.lane.b32.xlu0 %v3082_v63, %s10282_s26  ;;  %v8147_v2 = vpop.f32.mrb[37].mxu1 }
 0xff3   :  { %v7570_v2 = vld [vmem:[%s10270_s11 + $0x70] sm:$0xff] }
 0xff5   :  { %v3253_v48 = vpop.f32.mrb[38].mxu1 }
 0xff6   :  { %3258 = vrot.lane.b32.xlu0 %v3253_v48, %s10293_s20  ;;  %v8157_v3 = vpop.f32.mrb[39].mxu1  ;;  %v7571_v48 = vld [vmem:[%s10270_s11 + $0x78] sm:$0xff] }
 0xff7   :  { %v8549_v3 = vpack.c.bf16 %v7571_v48, %v7570_v2 }
 0xff9   :  { %v3424_v4 = vpop.f32.mrb[40].mxu1 }
 0xffa   :  { %3429 = vrot.lane.b32.xlu1 %v3424_v4, %s10294_s22  ;;  %v8167_v5 = vpop.f32.mrb[41].mxu1  ;;  %v7561_v4 = vld [vmem:[#allocation8 + $0x1] ss:$0 sm:$0xff] }
0x1027   :  { %v2409_v6 = vpop.permute.xlu0 %2408 }
0x1028   :  { %2411 = vst.msk [vmem:[#allocation2] sm:$0xff] %vm577_vm3, %v2409_v6 }
0x1058   :  { %v2580_v7 = vpop.permute.xlu1 %2579 }
0x1059   :  { %2582 = vst.msk [vmem:[#allocation2] sm:$0xff] %vm749_vm4, %v2580_v7 }
0x105c   :  { %v2751_v8 = vpop.permute.xlu1 %2750 }
0x105d   :  { %2753 = vst.msk [vmem:[#allocation2] sm:$0xff] %vm921_vm5, %v2751_v8 }
0x1064   :  { %v3088_v11 = vpop.permute.xlu0 %3087  ;;  %v3433_v14 = vld [vmem:[#allocation2] sm:$0xff] }
0x1065   :  { %3090 = vst.msk [vmem:[#allocation2 + $0x8] sm:$0xff] %vm577_vm3, %v3088_v11  ;;  %8176 = vmatprep.mubr.msk.f32.mxu0 %vm104_vm0, %v3433_v14 }
0x1068   :  { %v3259_v15 = vpop.permute.xlu0 %3258 }
0x1069   :  { %3261 = vst.msk [vmem:[#allocation2 + $0x8] sm:$0xff] %vm749_vm4, %v3259_v15  ;;  %v7572_v15 = vld [vmem:[#allocation9 + $0x1] ss:$0 sm:$0xff] }
0x106c   :  { %v3430_v41 = vpop.permute.xlu1 %3429 }
0x106d   :  { %3432 = vst.msk [vmem:[#allocation2 + $0x8] sm:$0xff] %vm921_vm5, %v3430_v41 }
0x1074   :  { %v3434_v16 = vld [vmem:[#allocation2 + $0x8] sm:$0xff] }
0x1075   :  { %8177 = vmatmul.mubr.msk.f32.vlgmr.msra.gmra.mrb[32].mxu0 %vm104_vm0, %v3434_v16 }
0x1076   :  { %8540 = vmatpush3.bf16.msra.mxu0 %v8537_v39 }
0x1077   :  { %8542 = vmatprep.subr.bf16.mxu0 %v8541_v43 }
0x107a   :  { %8544 = vmatpush3.bf16.msra.mxu0 %v8541_v43 }
0x107b   :  { %8546 = vmatprep.subr.bf16.mxu0 %v8545_v46 }
0x107e   :  { %8548 = vmatpush3.bf16.msra.mxu0 %v8545_v46  ;;  %v7578_v46 = vld [vmem:[%s10261_s2 + $0x2] ss:$0 sm:$0xff] }
0x107f   :  { %8550 = vmatprep.subr.bf16.mxu0 %v8549_v3 }
0x1082   :  { %8552 = vmatpush3.bf16.msra.mxu0 %v8549_v3 }
0x1083   :  { %8230 = vmatprep.subr.mxu0 %v8942_v36 }
0x1148   :  { %v8178_v18 = vpop.f32.mrb[32].mxu0 }
0x1149   :  { %v3526_v12 = vadd.f32 %v8178_v18, %v7550_v17  ;;  %v3520_v19 = vpop.f32.mrb[33].mxu0 }
0x114a   :  { %v3521_v1 = vadd.f32 %v7550_v17, %v3520_v19 }
0x114b   :  { %v9615_v13 = vadd.f32 %v3526_v12, %v9387_v9 }
0x114c   :  { %v9618_v20 = vadd.f32 %v3521_v1, %v9390_v10 }
0x114d   :  { %v3538_v0 = vsel %vm104_vm0, %v9615_v13, 0.0 }
0x114e   :  { %3539 = vadd.xlane.f32.xlu1 %v3538_v0  ;;  %v3535_v21 = vsel %vm104_vm0, %v9618_v20, 0.0 }
0x114f   :  { %3536 = vadd.xlane.f32.xlu0 %v3535_v21 }
0x11db   :  { %v3540_v49 = vpop.xlane.xlu1 %3539 }
0x11dc   :  { %v3542_v22 = vmul.f32 0.03125, %v3540_v49  ;;  %v3537_v23 = vpop.xlane.xlu0 %3536 }
0x11dd   :  { %v3541_v24 = vmul.f32 0.03125, %v3537_v23 }
0x11de   :  { %v3544_v25 = vsub.f32 %v9615_v13, %v3542_v22 }
0x11df   :  { %v3543_v9 = vsub.f32 %v9618_v20, %v3541_v24 }
0x11e0   :  { %v3546_v27 = vmul.f32 %v3544_v25, %v3544_v25 }
0x11e1   :  { %v3545_v26 = vmul.f32 %v3543_v9, %v3543_v9 }
0x11e2   :  { %v3550_v28 = vsel %vm104_vm0, %v3546_v27, 0.0  ;;  %v7580_v27 = vld [vmem:[%s10262_s3 + $0x48] sm:$0xff] }
0x11e3   :  { %v3547_v10 = vsel %vm104_vm0, %v3545_v26, 0.0 }
0x11e4   :  { %3548 = vadd.xlane.f32.xlu0 %v3547_v10  ;;  %v7579_v10 = vld [vmem:[%s10262_s3 + $0x40] sm:$0xff] }
0x11e5   :  { %v8553_v29 = vpack.c.bf16 %v7580_v27, %v7579_v10 }
0x11e7   :  { %8554 = vmatprep.subr.bf16.mxu1 %v8553_v29 }
0x11e8   :  { %3551 = vadd.xlane.f32.xlu0 %v3550_v28  ;;  %v7581_v28 = vld [vmem:[%s10262_s3 + $0x50] sm:$0xff] }
0x11e9   :  { %v8557_v31 = vpack.c.bf16 %v7582_v30, %v7581_v28 }
0x1271   :  { %v3549_v47 = vpop.xlane.xlu0 %3548 }
0x1272   :  { %v3553_v50 = vmul.f32 0.03125, %v3549_v47 }
0x1274   :  { %v3555_v51 = vadd.f32 1e-06, %v3553_v50 }
0x1275   :  { %v3552_v52 = vpop.xlane.xlu0 %3551 }
0x1276   :  { %8732 = vrsqrt.f32 %v3555_v51  ;;  %v3554_v53 = vmul.f32 0.03125, %v3552_v52 }
0x1278   :  { %v3556_v54 = vadd.f32 1e-06, %v3554_v53  ;;  %v7584_v53 = vld [vmem:[%s10263_s4 + $0x2] ss:$0 sm:$0xff] }
0x127a   :  { %8734 = vrsqrt.f32 %v3556_v54 }
0x1280   :  { %v8733_v55 = vpop.eup %8732 }
0x1281   :  { %v3559_v57 = vmul.f32 %v8733_v55, %v3543_v9 }
0x1283   :  { %v3567_v58 = vmul.f32 %v7555_v56, %v3559_v57 }
0x1284   :  { %v8735_v59 = vpop.eup %8734 }
0x1285   :  { %v3560_v60 = vmul.f32 %v8735_v59, %v3544_v25  ;;  %v3575_v61 = vadd.f32 %v7556_v40, %v3567_v58 }
0x1287   :  { %v3568_v62 = vmul.f32 %v7555_v56, %v3560_v60  ;;  %8187 = vmatprep.mubr.msk.f32.mxu1 %vm104_vm0, %v3575_v61 }
0x1289   :  { %v3576_v63 = vadd.f32 %v7556_v40, %v3568_v62 }
0x128b   :  { %8188 = vmatmul.mubr.msk.f32.vlgmr.msra.gmra.mrb[42].mxu1 %vm104_vm0, %v3576_v63 }
0x128c   :  { %8556 = vmatpush3.bf16.msra.mxu1 %v8553_v29 }
0x128d   :  { %8558 = vmatprep.subr.bf16.mxu1 %v8557_v31 }
0x1290   :  { %8560 = vmatpush3.bf16.msra.mxu1 %v8557_v31 }
0x1291   :  { %8220 = vmatprep.subr.mxu1 %v8942_v36 }
0x135e   :  { %v8189_v5 = vpop.f32.mrb[42].mxu1 }
0x135f   :  { %v3668_v6 = vadd.f32 %v8189_v5, %v7561_v4  ;;  %v3662_v7 = vpop.f32.mrb[43].mxu1 }
0x1360   :  { %v3663_v8 = vadd.f32 %v7561_v4, %v3662_v7 }
0x1361   :  { %v3672_v14 = vmax.f32 %v3668_v6, 0.0 }
0x1362   :  { %v3671_v11 = vmax.f32 %v3663_v8, 0.0 }
0x1364   :  { %8206 = vmatprep.mubr.msk.f32.mxu0 %vm1851_vm6, %v3671_v11 }
0x1365   :  { %8207 = vmatmul.mubr.msk.f32.vlgmr.msra.gmra.mrb[34].mxu0 %vm1851_vm6, %v3672_v14 }
0x1366   :  { %8232 = vmatprep.mubr.msk.f32.mxu0 %vm8943_vm1, %v8942_v36 }
0x1438   :  { %v8208_v41 = vpop.f32.mrb[34].mxu0 }
0x1439   :  { %v3768_v16 = vadd.f32 %v8208_v41, %v7572_v15  ;;  %v3762_v17 = vpop.f32.mrb[35].mxu0 }
0x143a   :  { %v3763_v18 = vadd.f32 %v7572_v15, %v3762_v17 }
0x143b   :  { %v9678_v12 = vadd.f32 %v3768_v16, %v9615_v13 }
0x143c   :  { %v9681_v19 = vadd.f32 %v3763_v18, %v9618_v20 }
0x143d   :  { %v3780_v1 = vsel %vm104_vm0, %v9678_v12, 0.0 }
0x143e   :  { %3781 = vadd.xlane.f32.xlu1 %v3780_v1  ;;  %v3777_v0 = vsel %vm104_vm0, %v9681_v19, 0.0 }
0x143f   :  { %3778 = vadd.xlane.f32.xlu0 %v3777_v0 }
0x14cb   :  { %v3782_v21 = vpop.xlane.xlu1 %3781 }
0x14cc   :  { %v3784_v49 = vmul.f32 0.03125, %v3782_v21  ;;  %v3779_v22 = vpop.xlane.xlu0 %3778 }
0x14cd   :  { %v3783_v23 = vmul.f32 0.03125, %v3779_v22 }
0x14ce   :  { %v3786_v24 = vsub.f32 %v9678_v12, %v3784_v49 }
0x14cf   :  { %v3785_v13 = vsub.f32 %v9681_v19, %v3783_v23 }
0x14d0   :  { %v3788_v25 = vmul.f32 %v3786_v24, %v3786_v24 }
0x14d1   :  { %v3787_v9 = vmul.f32 %v3785_v13, %v3785_v13 }
0x14d2   :  { %v3792_v20 = vsel %vm104_vm0, %v3788_v25, 0.0 }
0x14d3   :  { %3793 = vadd.xlane.f32.xlu1 %v3792_v20  ;;  %v3789_v26 = vsel %vm104_vm0, %v3787_v9, 0.0 }
0x14d4   :  { %3790 = vadd.xlane.f32.xlu0 %v3789_v26 }
0x1560   :  { %v3794_v32 = vpop.xlane.xlu1 %3793 }
0x1561   :  { %v3796_v33 = vmul.f32 0.03125, %v3794_v32  ;;  %v3791_v34 = vpop.xlane.xlu0 %3790 }
0x1562   :  { %v3795_v35 = vmul.f32 0.03125, %v3791_v34 }
0x1563   :  { %v3798_v37 = vadd.f32 1e-06, %v3796_v33 }
0x1564   :  { %v3797_v38 = vadd.f32 1e-06, %v3795_v35 }
0x1565   :  { %8736 = vrsqrt.f32 %v3798_v37 }
0x1566   :  { %8738 = vrsqrt.f32 %v3797_v38 }
0x156f   :  { %v8737_v39 = vpop.eup %8736 }
0x1570   :  { %v8739_v43 = vpop.eup %8738  ;;  %v3802_v44 = vmul.f32 %v8737_v39, %v3786_v24 }
0x1571   :  { %v3801_v45 = vmul.f32 %v8739_v43, %v3785_v13 }
0x1572   :  { %v3810_v47 = vmul.f32 %v7577_v42, %v3802_v44 }
0x1573   :  { %v3809_v50 = vmul.f32 %v7577_v42, %v3801_v45 }
0x1574   :  { %v3818_v52 = vadd.f32 %v7578_v46, %v3810_v47 }
0x1575   :  { %v3817_v51 = vadd.f32 %v7578_v46, %v3809_v50 }
0x1577   :  { %8217 = vmatprep.mubr.msk.f32.mxu1 %vm104_vm0, %v3817_v51 }
0x1578   :  { %8218 = vmatmul.mubr.msk.f32.vlgmr.msra.gmra.mrb[44].mxu1 %vm104_vm0, %v3818_v52 }
0x1579   :  { %8222 = vmatprep.mubr.msk.f32.mxu1 %vm8943_vm1, %v8942_v36 }
0x164b   :  { %v8219_v54 = vpop.f32.mrb[44].mxu1 }
0x164c   :  { %v3904_v55 = vpop.f32.mrb[45].mxu1  ;;  %v9731_v57 = vadd.f32 %v8219_v54, %v7584_v53 }
0x164d   :  { %v9717_v56 = vadd.f32 %v7584_v53, %v3904_v55 }
0x164f   :  { %4081 = vrot.lane.b32.xlu1 %v9717_v56, %s8944_s29  ;;  %3914 = vrot.lane.b32.xlu0 %v9717_v56, %s8945_s30 }
0x1653   :  { %4079 = vrot.lane.b32.xlu1 %v9717_v56, %s8946_s10  ;;  %4250 = vrot.lane.b32.xlu0 %v9717_v56, %s8947_s21 }
0x1657   :  { %4252 = vrot.lane.b32.xlu1 %v9717_v56, %s8948_s12  ;;  %4421 = vrot.lane.b32.xlu0 %v9717_v56, %s10290_s19 }
0x165b   :  { %4423 = vrot.lane.b32.xlu1 %v9717_v56, %s10288_s24  ;;  %4760 = vrot.lane.b32.xlu0 %v9731_v57, %s8944_s29 }
0x165f   :  { %4593 = vrot.lane.b32.xlu1 %v9731_v57, %s8945_s30  ;;  %4931 = vrot.lane.b32.xlu0 %v9731_v57, %s8948_s12 }
0x1663   :  { %4758 = vrot.lane.b32.xlu1 %v9731_v57, %s8946_s10  ;;  %5102 = vrot.lane.b32.xlu0 %v9731_v57, %s10288_s24 }
0x1667   :  { %4929 = vrot.lane.b32.xlu1 %v9731_v57, %s8947_s21 }
0x166b   :  { %5100 = vrot.lane.b32.xlu1 %v9731_v57, %s10290_s19 }
0x16c1   :  { %v4082_v40 = vpop.permute.xlu1 %4081  ;;  %v3915_v58 = vpop.permute.xlu0 %3914 }
0x16c2   :  { %8221 = vmatpush3.xpose.msk.msra.mxu1 %vm243_vm2, %v3915_v58  ;;  %8231 = vmatpush3.xpose.msk.msra.mxu0 %vm243_vm2, %v4082_v40 }
0x16c3   :  { %8240 = vmatprep.subr.mxu0 %v8942_v36  ;;  %8225 = vmatprep.subr.mxu1 %v8942_v36 }
0x16c5   :  { %v4080_v59 = vpop.permute.xlu1 %4079  ;;  %8223 = vmatmul.mubr.msk.f32.vlgmr.msra.gmra.mrb[46].mxu1 %vm243_vm2, %v9717_v56  ;;  %v4251_v60 = vpop.permute.xlu0 %4250 }
0x16c6   :  { %8233 = vmatmul.mubr.msk.f32.vlgmr.msra.gmra.mrb[36].mxu0 %vm243_vm2, %v4080_v59  ;;  %8227 = vmatprep.mubr.msk.f32.mxu1 %vm8943_vm1, %v8942_v36 }
0x16c7   :  { %8242 = vmatprep.mubr.msk.f32.mxu0 %vm8943_vm1, %v8942_v36 }
0x16c9   :  { %v4253_v61 = vpop.permute.xlu1 %4252  ;;  %v4422_v62 = vpop.permute.xlu0 %4421 }
0x16ca   :  { %8241 = vmatpush3.xpose.msk.msra.mxu0 %vm243_vm2, %v4253_v61 }
0x16cb   :  { %8250 = vmatprep.subr.mxu0 %v8942_v36 }
0x16cd   :  { %v4424_v63 = vpop.permute.xlu1 %4423  ;;  %8243 = vmatmul.mubr.msk.f32.vlgmr.msra.gmra.mrb[38].mxu0 %vm243_vm2, %v4251_v60  ;;  %v4761_v2 = vpop.permute.xlu0 %4760 }
0x16ce   :  { %8251 = vmatpush3.xpose.msk.msra.mxu0 %vm243_vm2, %v4424_v63  ;;  %8252 = vmatprep.mubr.msk.f32.mxu0 %vm8943_vm1, %v8942_v36 }
0x16cf   :  { %8260 = vmatprep.subr.mxu0 %v8942_v36 }
0x16d1   :  { %v4594_v48 = vpop.permute.xlu1 %4593  ;;  %8253 = vmatmul.mubr.msk.f32.vlgmr.msra.gmra.mrb[40].mxu0 %vm243_vm2, %v4422_v62  ;;  %v4932_v4 = vpop.permute.xlu0 %4931 }
0x16d2   :  { %8261 = vmatpush3.xpose.msk.msra.mxu0 %vm243_vm2, %v4594_v48  ;;  %8262 = vmatprep.mubr.msk.f32.mxu0 %vm8943_vm1, %v8942_v36 }
0x16d3   :  { %8270 = vmatprep.subr.mxu0 %v8942_v36 }
0x16d5   :  { %v4759_v3 = vpop.permute.xlu1 %4758  ;;  %8263 = vmatmul.mubr.msk.f32.vlgmr.msra.gmra.mrb[42].mxu0 %vm243_vm2, %v9731_v57  ;;  %v5103_v6 = vpop.permute.xlu0 %5102 }
0x16d6   :  { %8271 = vmatpush3.xpose.msk.msra.mxu0 %vm243_vm2, %v4761_v2  ;;  %8272 = vmatprep.mubr.msk.f32.mxu0 %vm8943_vm1, %v8942_v36 }
0x16d7   :  { %8280 = vmatprep.subr.mxu0 %v8942_v36 }
0x16d9   :  { %8273 = vmatmul.mubr.msk.f32.vlgmr.msra.gmra.mrb[44].mxu0 %vm243_vm2, %v4759_v3  ;;  %v4930_v5 = vpop.permute.xlu1 %4929 }
0x16da   :  { %8281 = vmatpush3.xpose.msk.msra.mxu0 %vm243_vm2, %v4932_v4  ;;  %8282 = vmatprep.mubr.msk.f32.mxu0 %vm8943_vm1, %v8942_v36 }
0x16db   :  { %8290 = vmatprep.subr.mxu0 %v8942_v36 }
0x16dd   :  { %8283 = vmatmul.mubr.msk.f32.vlgmr.msra.gmra.mrb[46].mxu0 %vm243_vm2, %v4930_v5  ;;  %v5101_v7 = vpop.permute.xlu1 %5100 }
0x16de   :  { %8291 = vmatpush3.xpose.msk.msra.mxu0 %vm243_vm2, %v5103_v6  ;;  %8292 = vmatprep.mubr.msk.f32.mxu0 %vm8943_vm1, %v8942_v36 }
0x16e1   :  { %8293 = vmatmul.mubr.msk.f32.vlgmr.msra.gmra.mrb[48].mxu0 %vm243_vm2, %v5101_v7 }
0x1798   :  { %v3986_v8 = vpop.f32.mrb[46].mxu1 }
0x1799   :  { %v3990_v11 = vmul.f32 0.35355338, %v3986_v8  ;;  %v8224_v14 = vpop.f32.mrb[47].mxu1  ;;  %v4153_v15 = vpop.f32.mrb[36].mxu0 }
0x179a   :  { %v4157_v41 = vmul.f32 0.35355338, %v4153_v15  ;;  %v8234_v16 = vpop.f32.mrb[37].mxu0 }
0x179b   :  { %v3991_v17 = vsel %vm243_vm2, %v3990_v11, -inf }
0x179c   :  { %3992 = vmax.xlane.f32.xlu0 %v3991_v17  ;;  %v4158_v18 = vsel %vm243_vm2, %v4157_v41, -inf }
0x179d   :  { %4159 = vmax.xlane.f32.xlu1 %v4158_v18 }
0x17a0   :  { %v4324_v1 = vpop.f32.mrb[38].mxu0 }
0x17a1   :  { %v9790_v0 = vmul.f32 0.35355338, %v4324_v1  ;;  %v8244_v21 = vpop.f32.mrb[39].mxu0 }
0x17a3   :  { %v4329_v49 = vsel %vm243_vm2, %v9790_v0, -inf }
0x17a4   :  { %4330 = vmax.xlane.f32.xlu0 %v4329_v49  ;;  %v4495_v22 = vpop.f32.mrb[40].mxu0 }
0x17a5   :  { %v4499_v23 = vmul.f32 0.35355338, %v4495_v22  ;;  %v8254_v24 = vpop.f32.mrb[41].mxu0 }
0x17a7   :  { %v4500_v13 = vsel %vm243_vm2, %v4499_v23, -inf }
0x17a8   :  { %4501 = vmax.xlane.f32.xlu0 %v4500_v13  ;;  %v4665_v25 = vpop.f32.mrb[42].mxu0 }
0x17a9   :  { %v4669_v9 = vmul.f32 0.35355338, %v4665_v25  ;;  %v8264_v20 = vpop.f32.mrb[43].mxu0 }
0x17ab   :  { %v4670_v26 = vsel %vm243_vm2, %v4669_v9, -inf }
0x17ac   :  { %4671 = vmax.xlane.f32.xlu0 %v4670_v26  ;;  %v4832_v10 = vpop.f32.mrb[44].mxu0 }
0x17ad   :  { %v4836_v27 = vmul.f32 0.35355338, %v4832_v10  ;;  %v8274_v28 = vpop.f32.mrb[45].mxu0 }
0x17af   :  { %v4837_v29 = vsel %vm243_vm2, %v4836_v27, -inf }
0x17b0   :  { %4838 = vmax.xlane.f32.xlu1 %v4837_v29  ;;  %v5003_v30 = vpop.f32.mrb[46].mxu0 }
0x17b1   :  { %v5007_v31 = vmul.f32 0.35355338, %v5003_v30  ;;  %v8284_v32 = vpop.f32.mrb[47].mxu0 }
0x17b3   :  { %v5008_v33 = vsel %vm243_vm2, %v5007_v31, -inf }
0x17b4   :  { %5009 = vmax.xlane.f32.xlu0 %v5008_v33  ;;  %v5174_v34 = vpop.f32.mrb[48].mxu0 }
0x17b5   :  { %v8294_v35 = vpop.f32.mrb[49].mxu0  ;;  %v5178_v37 = vmul.f32 0.35355338, %v5174_v34 }
0x17b7   :  { %v5179_v38 = vsel %vm243_vm2, %v5178_v37, -inf }
0x17c1   :  { %4002 = vrot.lane.b32.xlu1 %v9717_v56, %s10286_s14 }
0x17e5   :  { %5180 = vmax.xlane.f32.xlu1 %v5179_v38 }
0x17f6   :  { %4340 = vrot.lane.b32.xlu1 %v9717_v56, %s10295_s27 }
0x17fa   :  { %4511 = vrot.lane.b32.xlu1 %v9717_v56, %s10296_s28 }
0x17fe   :  { %4681 = vrot.lane.b32.xlu1 %v9731_v57, %s10286_s14 }
0x1829   :  { %v3993_v39 = vpop.xlane.xlu0 %3992 }
0x182a   :  { %v3994_v42 = vsub.f32 %v3990_v11, %v3993_v39  ;;  %v4160_v43 = vpop.xlane.xlu1 %4159 }
0x182b   :  { %v4161_v44 = vsub.f32 %v4157_v41, %v4160_v43 }
0x182c   :  { %v3995_v45 = vmul.f32 1.442695, %v3994_v42 }
0x182d   :  { %v4162_v46 = vmul.f32 1.442695, %v4161_v44 }
0x182e   :  { %8740 = vpow2.f32 %v3995_v45 }
0x182f   :  { %8742 = vpow2.f32 %v4162_v46 }
0x1831   :  { %v4331_v47 = vpop.xlane.xlu0 %4330 }
0x1832   :  { %v4332_v62 = vsub.f32 %v9790_v0, %v4331_v47 }
0x1834   :  { %v4333_v2 = vmul.f32 1.442695, %v4332_v62 }
0x1835   :  { %v4502_v50 = vpop.xlane.xlu0 %4501 }
0x1836   :  { %v4503_v51 = vsub.f32 %v4499_v23, %v4502_v50 }
0x1838   :  { %v8741_v52 = vpop.eup %8740  ;;  %v4504_v53 = vmul.f32 1.442695, %v4503_v51 }
0x1839   :  { %v9807_v54 = vpop.eup %8742  ;;  %v3997_v55 = vsel %vm243_vm2, %v8741_v52, 0.0  ;;  %v4672_v63 = vpop.xlane.xlu0 %4671 }
0x183a   :  { %8744 = vpow2.f32 %v4504_v53  ;;  %3998 = vadd.xlane.f32.xlu0 %v3997_v55  ;;  %v4164_v40 = vsel %vm243_vm2, %v9807_v54, 0.0  ;;  %v4673_v48 = vsub.f32 %v4669_v9, %v4672_v63  ;;  %v7611_v63 = vld [vmem:[%s10264_s5 + $0x40] sm:$0xff] }
0x183b   :  { %4165 = vadd.xlane.f32.xlu1 %v4164_v40  ;;  %8746 = vpow2.f32 %v4333_v2  ;;  %v7612_v2 = vld [vmem:[%s10264_s5 + $0x48] sm:$0xff] }
0x183c   :  { %v4674_v4 = vmul.f32 1.442695, %v4673_v48  ;;  %v8561_v48 = vpack.c.bf16 %v7612_v2, %v7611_v63  ;;  %v7620_v63 = vld [vmem:[%s10266_s7 + $0x2] ss:$0 sm:$0xff] }
0x183d   :  { %v4839_v58 = vpop.xlane.xlu1 %4838 }
0x183e   :  { %8748 = vpow2.f32 %v4674_v4  ;;  %v4840_v6 = vsub.f32 %v4836_v27, %v4839_v58  ;;  %v7613_v4 = vld [vmem:[%s10264_s5 + $0x50] sm:$0xff]  ;;  %8562 = vmatprep.subr.bf16.mxu0 %v8561_v48 }
0x183f   :  { %8564 = vmatpush3.bf16.msra.mxu0 %v8561_v48  ;;  %v7621_v48 = vld [vmem:[%s10267_s8 + $0x2] ss:$0 sm:$0xff] }
0x1840   :  { %v4841_v8 = vmul.f32 1.442695, %v4840_v6 }
0x1841   :  { %v4003_v59 = vpop.permute.xlu1 %4002  ;;  %v5010_v3 = vpop.xlane.xlu0 %5009 }
0x1842   :  { %8226 = vmatpush3.msra.mxu1 %v4003_v59  ;;  %v5011_v5 = vsub.f32 %v5007_v31, %v5010_v3 }
0x1843   :  { %8235 = vmatprep.subr.mxu1 %v8942_v36 }
0x1844   :  { %v9813_v60 = vpop.eup %8744  ;;  %v5012_v7 = vmul.f32 1.442695, %v5011_v5  ;;  %v7614_v5 = vld [vmem:[%s10264_s5 + $0x58] sm:$0xff] }
0x1845   :  { %v4506_v61 = vsel %vm243_vm2, %v9813_v60, 0.0  ;;  %v8747_v11 = vpop.eup %8746 }
0x1846   :  { %4507 = vadd.xlane.f32.xlu1 %v4506_v61  ;;  %8750 = vpow2.f32 %v5012_v7  ;;  %v8565_v7 = vpack.c.bf16 %v7614_v5, %v7613_v4 }
0x1847   :  { %8752 = vpow2.f32 %v4841_v8 }
0x1848   :  { %v8749_v14 = vpop.eup %8748  ;;  %8566 = vmatprep.subr.bf16.mxu0 %v8565_v7 }
0x1849   :  { %v4676_v41 = vsel %vm243_vm2, %v8749_v14, 0.0  ;;  %8568 = vmatpush3.bf16.msra.mxu0 %v8565_v7 }
0x1850   :  { %4169 = vrot.lane.b32.xlu0 %v9717_v56, %s10292_s17  ;;  %v4335_v56 = vsel %vm243_vm2, %v8747_v11, 0.0  ;;  %v9824_v16 = vpop.eup %8750 }
0x1851   :  { %v5014_v1 = vsel %vm243_vm2, %v9824_v16, 0.0  ;;  %v8753_v0 = vpop.eup %8752 }
0x1852   :  { %v4843_v21 = vsel %vm243_vm2, %v8753_v0, 0.0 }
0x1857   :  { %4848 = vrot.lane.b32.xlu1 %v9731_v57, %s10292_s17 }
0x186f   :  { %4336 = vadd.xlane.f32.xlu0 %v4335_v56 }
0x1872   :  { %v5181_v15 = vpop.xlane.xlu1 %5180 }
0x1873   :  { %v5182_v17 = vsub.f32 %v5178_v37, %v5181_v15  ;;  %4677 = vadd.xlane.f32.xlu0 %v4676_v41 }
0x1875   :  { %v5183_v18 = vmul.f32 1.442695, %v5182_v17 }
0x1876   :  { %v4341_v23 = vpop.permute.xlu1 %4340 }
0x1877   :  { %8754 = vpow2.f32 %v5183_v18  ;;  %5015 = vadd.xlane.f32.xlu0 %v5014_v1 }
0x187a   :  { %v4512_v24 = vpop.permute.xlu1 %4511 }
0x187b   :  { %4844 = vadd.xlane.f32.xlu1 %v4843_v21 }
0x187e   :  { %v4682_v13 = vpop.permute.xlu1 %4681 }
0x1881   :  { %v9829_v49 = vpop.eup %8754 }
0x1882   :  { %v5185_v22 = vsel %vm243_vm2, %v9829_v49, 0.0 }
0x1883   :  { %5186 = vadd.xlane.f32.xlu0 %v5185_v22 }
0x188c   :  { %5190 = vrot.lane.b32.xlu1 %v9731_v57, %s10296_s28 }
0x1899   :  { %5019 = vrot.lane.b32.xlu0 %v9731_v57, %s10295_s27 }
0x18c7   :  { %v3999_v25 = vpop.xlane.xlu0 %3998 }
0x18c8   :  { %8756 = vrcp.f32 %v3999_v25  ;;  %v4166_v9 = vpop.xlane.xlu1 %4165 }
0x18c9   :  { %8758 = vrcp.f32 %v4166_v9 }
0x18cb   :  { %v4170_v27 = vpop.permute.xlu0 %4169 }
0x18d2   :  { %v8757_v20 = vpop.eup %8756 }
0x18d3   :  { %v4001_v26 = vmul.f32 %v8757_v20, %v8741_v52  ;;  %v8759_v10 = vpop.eup %8758  ;;  %v4508_v57 = vpop.xlane.xlu1 %4507 }
0x18d4   :  { %v4168_v28 = vmul.f32 %v8759_v10, %v9807_v54 }
0x18d5   :  { %8228 = vmatmul.mubr.msk.f32.vlgmr.msra.gmra.mrb[48].mxu1 %vm243_vm2, %v4001_v26 }
0x18d6   :  { %8236 = vmatpush3.msra.mxu1 %v4170_v27  ;;  %8237 = vmatprep.mubr.msk.f32.mxu1 %vm8943_vm1, %v8942_v36 }
0x18d7   :  { %8245 = vmatprep.subr.mxu1 %v8942_v36  ;;  %v4849_v31 = vpop.permute.xlu1 %4848 }
0x18d9   :  { %8238 = vmatmul.mubr.msk.f32.vlgmr.msra.gmra.mrb[50].mxu1 %vm243_vm2, %v4168_v28 }
0x18da   :  { %8246 = vmatpush3.msra.mxu1 %v4341_v23  ;;  %8247 = vmatprep.mubr.msk.f32.mxu1 %vm8943_vm1, %v8942_v36  ;;  %v7615_v23 = vld [vmem:[#allocation6 + $0x2] ss:$0 sm:$0xff] }
0x18db   :  { %8255 = vmatprep.subr.mxu1 %v8942_v36 }
0x18fc   :  { %v4337_v29 = vpop.xlane.xlu0 %4336 }
0x18fd   :  { %8760 = vrcp.f32 %v4337_v29 }
0x18fe   :  { %8762 = vrcp.f32 %v4508_v57 }
0x1900   :  { %v4678_v30 = vpop.xlane.xlu0 %4677 }
0x1901   :  { %8764 = vrcp.f32 %v4678_v30 }
0x1904   :  { %v5016_v34 = vpop.xlane.xlu0 %5015 }
0x1907   :  { %v8761_v32 = vpop.eup %8760 }
0x1908   :  { %v4339_v33 = vmul.f32 %v8761_v32, %v8747_v11  ;;  %v4845_v35 = vpop.xlane.xlu1 %4844  ;;  %v8763_v37 = vpop.eup %8762 }
0x1909   :  { %8766 = vrcp.f32 %v4845_v35  ;;  %v4510_v38 = vmul.f32 %v8763_v37, %v9813_v60  ;;  %v7622_v35 = vld [vmem:[%s10268_s9 + $0x40] sm:$0xff]  ;;  %v7623_v37 = vld [vmem:[%s10268_s9 + $0x48] sm:$0xff] }
0x190a   :  { %8248 = vmatmul.mubr.msk.f32.vlgmr.msra.gmra.mrb[52].mxu1 %vm243_vm2, %v4339_v33  ;;  %8768 = vrcp.f32 %v5016_v34 }
0x190b   :  { %8256 = vmatpush3.msra.mxu1 %v4512_v24  ;;  %8257 = vmatprep.mubr.msk.f32.mxu1 %vm8943_vm1, %v8942_v36  ;;  %v8765_v39 = vpop.eup %8764 }
0x190c   :  { %8265 = vmatprep.subr.mxu1 %v8942_v36  ;;  %v4680_v42 = vmul.f32 %v8765_v39, %v8749_v14  ;;  %v5191_v51 = vpop.permute.xlu1 %5190  ;;  %v7624_v39 = vld [vmem:[%s10268_s9 + $0x50] sm:$0xff] }
0x190e   :  { %8258 = vmatmul.mubr.msk.f32.vlgmr.msra.gmra.mrb[54].mxu1 %vm243_vm2, %v4510_v38  ;;  %v8569_v38 = vpack.c.bf16 %v7623_v37, %v7622_v35  ;;  %v7646_v35 = vld [vmem:[%s10262_s3 + $0x70] sm:$0xff]  ;;  %v7647_v37 = vld [vmem:[%s10262_s3 + $0x78] sm:$0xff] }
0x190f   :  { %8266 = vmatpush3.msra.mxu1 %v4682_v13  ;;  %8267 = vmatprep.mubr.msk.f32.mxu1 %vm8943_vm1, %v8942_v36 }
0x1910   :  { %v5187_v43 = vpop.xlane.xlu0 %5186  ;;  %8275 = vmatprep.subr.mxu1 %v8942_v36 }
0x1911   :  { %8770 = vrcp.f32 %v5187_v43 }
0x1912   :  { %8268 = vmatmul.mubr.msk.f32.vlgmr.msra.gmra.mrb[56].mxu1 %vm243_vm2, %v4680_v42  ;;  %v7625_v42 = vld [vmem:[%s10268_s9 + $0x58] sm:$0xff] }
0x1913   :  { %v8767_v44 = vpop.eup %8766  ;;  %8276 = vmatpush3.msra.mxu1 %v4849_v31  ;;  %8277 = vmatprep.mubr.msk.f32.mxu1 %vm8943_vm1, %v8942_v36  ;;  %v8573_v43 = vpack.c.bf16 %v7625_v42, %v7624_v39 }
0x1914   :  { %v4847_v45 = vmul.f32 %v8767_v44, %v8753_v0  ;;  %v5020_v46 = vpop.permute.xlu0 %5019  ;;  %8285 = vmatprep.subr.mxu1 %v8942_v36  ;;  %v8769_v47 = vpop.eup %8768  ;;  %v7629_v44 = vld [vmem:[%s10270_s11 + $0x80] sm:$0xff] }
0x1915   :  { %v5018_v50 = vmul.f32 %v8769_v47, %v9824_v16 }
0x1916   :  { %8278 = vmatmul.mubr.msk.f32.vlgmr.msra.gmra.mrb[58].mxu1 %vm243_vm2, %v4847_v45  ;;  %v7630_v45 = vld [vmem:[%s10270_s11 + $0x88] sm:$0xff] }
0x1917   :  { %8286 = vmatpush3.msra.mxu1 %v5020_v46  ;;  %8287 = vmatprep.mubr.msk.f32.mxu1 %vm8943_vm1, %v8942_v36  ;;  %v7631_v46 = vld [vmem:[%s10270_s11 + $0x90] sm:$0xff]  ;;  %v8577_v47 = vpack.c.bf16 %v7630_v45, %v7629_v44 }
0x1918   :  { %8295 = vmatprep.subr.mxu1 %v8942_v36 }
0x1919   :  { %8578 = vmatprep.subr.bf16.mxu0 %v8577_v47 }
0x191a   :  { %8288 = vmatmul.mubr.msk.f32.vlgmr.msra.gmra.mrb[60].mxu1 %vm243_vm2, %v5018_v50  ;;  %v7632_v50 = vld [vmem:[%s10270_s11 + $0x98] sm:$0xff] }
0x191b   :  { %v8771_v52 = vpop.eup %8770  ;;  %8296 = vmatpush3.msra.mxu1 %v5191_v51  ;;  %8297 = vmatprep.mubr.msk.f32.mxu1 %vm8943_vm1, %v8942_v36  ;;  %v8581_v51 = vpack.c.bf16 %v7632_v50, %v7631_v46  ;;  %v7642_v50 = vld [vmem:[%s10260_s1 + $0x3] ss:$0 sm:$0xff] }
0x191c   :  { %v5189_v53 = vmul.f32 %v8771_v52, %v9829_v49  ;;  %8570 = vmatprep.subr.bf16.mxu1 %v8569_v38  ;;  %v7633_v52 = vld [vmem:[%s10270_s11 + $0xa0] sm:$0xff] }
0x191e   :  { %8298 = vmatmul.mubr.msk.f32.vlgmr.msra.gmra.mrb[62].mxu1 %vm243_vm2, %v5189_v53  ;;  %v7634_v53 = vld [vmem:[%s10270_s11 + $0xa8] sm:$0xff] }
0x191f   :  { %8572 = vmatpush3.bf16.msra.mxu1 %v8569_v38  ;;  %v8597_v38 = vpack.c.bf16 %v7647_v37, %v7646_v35 }
0x1920   :  { %8574 = vmatprep.subr.bf16.mxu1 %v8573_v43 }
0x1923   :  { %8576 = vmatpush3.bf16.msra.mxu1 %v8573_v43 }
0x19a8   :  { %v4074_v54 = vpop.f32.mrb[48].mxu1 }
0x19a9   :  { %4078 = vst.msk [vmem:[#allocation2] sm:$0xff] %vm243_vm2, %v4074_v54  ;;  %v8229_v55 = vpop.f32.mrb[49].mxu1  ;;  %v8585_v54 = vpack.c.bf16 %v7634_v53, %v7633_v52 }
0x19ac   :  { %v4241_v40 = vpop.f32.mrb[50].mxu1 }
0x19ad   :  { %4246 = vrot.lane.b32.xlu0 %v4241_v40, %s10297_s6  ;;  %v8239_v58 = vpop.f32.mrb[51].mxu1 }
0x19dd   :  { %v4412_v59 = vpop.f32.mrb[52].mxu1 }
0x19de   :  { %4417 = vrot.lane.b32.xlu1 %v4412_v59, %s10293_s20  ;;  %v8249_v60 = vpop.f32.mrb[53].mxu1 }
0x19e1   :  { %v4583_v61 = vpop.f32.mrb[54].mxu1 }
0x19e2   :  { %4588 = vrot.lane.b32.xlu1 %v4583_v61, %s10294_s22  ;;  %v8259_v62 = vpop.f32.mrb[55].mxu1 }
0x19e5   :  { %v4753_v3 = vpop.f32.mrb[56].mxu1 }
0x19e6   :  { %4757 = vst.msk [vmem:[#allocation2 + $0x8] sm:$0xff] %vm243_vm2, %v4753_v3  ;;  %v8269_v6 = vpop.f32.mrb[57].mxu1 }
0x19e9   :  { %v4920_v8 = vpop.f32.mrb[58].mxu1 }
0x19ea   :  { %4925 = vrot.lane.b32.xlu0 %v4920_v8, %s10297_s6  ;;  %v8279_v11 = vpop.f32.mrb[59].mxu1 }
0x19eb   :  { %v7635_v11 = vld [vmem:[%s10270_s11 + $0xb0] sm:$0xff] }
0x19ed   :  { %v5091_v56 = vpop.f32.mrb[60].mxu1 }
0x19ee   :  { %5096 = vrot.lane.b32.xlu0 %v5091_v56, %s10293_s20  ;;  %v8289_v14 = vpop.f32.mrb[61].mxu1  ;;  %v7636_v56 = vld [vmem:[%s10270_s11 + $0xb8] sm:$0xff] }
0x19ef   :  { %v8589_v14 = vpack.c.bf16 %v7636_v56, %v7635_v11 }
0x19f1   :  { %v5262_v15 = vpop.f32.mrb[62].mxu1 }
0x19f2   :  { %5267 = vrot.lane.b32.xlu1 %v5262_v15, %s10294_s22  ;;  %v8299_v41 = vpop.f32.mrb[63].mxu1  ;;  %v7626_v15 = vld [vmem:[#allocation8 + $0x2] ss:$0 sm:$0xff] }
0x1a1f   :  { %v4247_v16 = vpop.permute.xlu0 %4246 }
0x1a20   :  { %4249 = vst.msk [vmem:[#allocation2] sm:$0xff] %vm577_vm3, %v4247_v16 }
0x1a50   :  { %v4418_v17 = vpop.permute.xlu1 %4417 }
0x1a51   :  { %4420 = vst.msk [vmem:[#allocation2] sm:$0xff] %vm749_vm4, %v4418_v17 }
0x1a54   :  { %v4589_v18 = vpop.permute.xlu1 %4588 }
0x1a55   :  { %4591 = vst.msk [vmem:[#allocation2] sm:$0xff] %vm921_vm5, %v4589_v18 }
0x1a5c   :  { %v4926_v1 = vpop.permute.xlu0 %4925  ;;  %v5271_v0 = vld [vmem:[#allocation2] sm:$0xff] }
0x1a5d   :  { %4928 = vst.msk [vmem:[#allocation2 + $0x8] sm:$0xff] %vm577_vm3, %v4926_v1  ;;  %8308 = vmatprep.mubr.msk.f32.mxu0 %vm104_vm0, %v5271_v0 }
0x1a60   :  { %v5097_v21 = vpop.permute.xlu0 %5096 }
0x1a61   :  { %5099 = vst.msk [vmem:[#allocation2 + $0x8] sm:$0xff] %vm749_vm4, %v5097_v21  ;;  %v7637_v21 = vld [vmem:[#allocation9 + $0x2] ss:$0 sm:$0xff] }
0x1a64   :  { %v5268_v49 = vpop.permute.xlu1 %5267 }
0x1a65   :  { %5270 = vst.msk [vmem:[#allocation2 + $0x8] sm:$0xff] %vm921_vm5, %v5268_v49 }
0x1a6c   :  { %v5272_v22 = vld [vmem:[#allocation2 + $0x8] sm:$0xff] }
0x1a6d   :  { %8309 = vmatmul.mubr.msk.f32.vlgmr.msra.gmra.mrb[50].mxu0 %vm104_vm0, %v5272_v22 }
0x1a6e   :  { %8580 = vmatpush3.bf16.msra.mxu0 %v8577_v47 }
0x1a6f   :  { %8582 = vmatprep.subr.bf16.mxu0 %v8581_v51 }
0x1a72   :  { %8584 = vmatpush3.bf16.msra.mxu0 %v8581_v51 }
0x1a73   :  { %8586 = vmatprep.subr.bf16.mxu0 %v8585_v54 }
0x1a76   :  { %8588 = vmatpush3.bf16.msra.mxu0 %v8585_v54  ;;  %v7643_v54 = vld [vmem:[%s10261_s2 + $0x3] ss:$0 sm:$0xff]  ;;  %s10298_s2 = smov 104  }
0x1a77   :  { %8590 = vmatprep.subr.bf16.mxu0 %v8589_v14 }
0x1a7a   :  { %8592 = vmatpush3.bf16.msra.mxu0 %v8589_v14 }
0x1a7b   :  { %8362 = vmatprep.subr.mxu0 %v8942_v36 }
0x1b40   :  { %v8310_v24 = vpop.f32.mrb[50].mxu0 }
0x1b41   :  { %v5364_v13 = vadd.f32 %v8310_v24, %v7615_v23  ;;  %v5358_v25 = vpop.f32.mrb[51].mxu0 }
0x1b42   :  { %v5359_v9 = vadd.f32 %v7615_v23, %v5358_v25 }
0x1b43   :  { %v9898_v20 = vadd.f32 %v5364_v13, %v9678_v12 }
0x1b44   :  { %v9901_v26 = vadd.f32 %v5359_v9, %v9681_v19 }
0x1b45   :  { %v5376_v10 = vsel %vm104_vm0, %v9898_v20, 0.0 }
0x1b46   :  { %5377 = vadd.xlane.f32.xlu1 %v5376_v10  ;;  %v5373_v27 = vsel %vm104_vm0, %v9901_v26, 0.0 }
0x1b47   :  { %5374 = vadd.xlane.f32.xlu0 %v5373_v27 }
0x1bd3   :  { %v5378_v28 = vpop.xlane.xlu1 %5377 }
0x1bd4   :  { %v5380_v57 = vmul.f32 0.03125, %v5378_v28  ;;  %v5375_v29 = vpop.xlane.xlu0 %5374 }
0x1bd5   :  { %v5379_v30 = vmul.f32 0.03125, %v5375_v29 }
0x1bd6   :  { %v5382_v31 = vsub.f32 %v9898_v20, %v5380_v57 }
0x1bd7   :  { %v5381_v12 = vsub.f32 %v9901_v26, %v5379_v30 }
0x1bd8   :  { %v5384_v33 = vmul.f32 %v5382_v31, %v5382_v31 }
0x1bd9   :  { %v5383_v32 = vmul.f32 %v5381_v12, %v5381_v12 }
0x1bda   :  { %v5388_v34 = vsel %vm104_vm0, %v5384_v33, 0.0  ;;  %v7645_v33 = vld [vmem:[%s10262_s3 + $0x68] sm:$0xff] }
0x1bdb   :  { %v5385_v19 = vsel %vm104_vm0, %v5383_v32, 0.0 }
0x1bdc   :  { %5386 = vadd.xlane.f32.xlu0 %v5385_v19  ;;  %v7644_v19 = vld [vmem:[%s10262_s3 + $0x60] sm:$0xff] }
0x1be0   :  { %5389 = vadd.xlane.f32.xlu0 %v5388_v34  ;;  %v8593_v34 = vpack.c.bf16 %v7645_v33, %v7644_v19 }
0x1be2   :  { %8594 = vmatprep.subr.bf16.mxu1 %v8593_v34 }
0x1c69   :  { %v5387_v55 = vpop.xlane.xlu0 %5386 }
0x1c6a   :  { %v5391_v40 = vmul.f32 0.03125, %v5387_v55 }
0x1c6c   :  { %v5393_v58 = vadd.f32 1e-06, %v5391_v40 }
0x1c6d   :  { %v5390_v59 = vpop.xlane.xlu0 %5389 }
0x1c6e   :  { %8772 = vrsqrt.f32 %v5393_v58  ;;  %v5392_v60 = vmul.f32 0.03125, %v5390_v59 }
0x1c70   :  { %v5394_v61 = vadd.f32 1e-06, %v5392_v60  ;;  %v7649_v60 = vld [vmem:[%s10263_s4 + $0x3] ss:$0 sm:$0xff]  ;;  %s10299_s4 = smov 72  }
0x1c72   :  { %8774 = vrsqrt.f32 %v5394_v61 }
0x1c78   :  { %v8773_v62 = vpop.eup %8772 }
0x1c79   :  { %v5397_v2 = vmul.f32 %v8773_v62, %v5381_v12 }
0x1c7b   :  { %v5405_v3 = vmul.f32 %v7620_v63, %v5397_v2 }
0x1c7c   :  { %v8775_v4 = vpop.eup %8774 }
0x1c7d   :  { %v5398_v5 = vmul.f32 %v8775_v4, %v5382_v31  ;;  %v5413_v6 = vadd.f32 %v7621_v48, %v5405_v3 }
0x1c7f   :  { %v5406_v7 = vmul.f32 %v7620_v63, %v5398_v5  ;;  %8319 = vmatprep.mubr.msk.f32.mxu1 %vm104_vm0, %v5413_v6 }
0x1c81   :  { %v5414_v8 = vadd.f32 %v7621_v48, %v5406_v7 }
0x1c83   :  { %8320 = vmatmul.mubr.msk.f32.vlgmr.msra.gmra.mrb[64].mxu1 %vm104_vm0, %v5414_v8 }
0x1c84   :  { %8596 = vmatpush3.bf16.msra.mxu1 %v8593_v34 }
0x1c85   :  { %8598 = vmatprep.subr.bf16.mxu1 %v8597_v38 }
0x1c88   :  { %8600 = vmatpush3.bf16.msra.mxu1 %v8597_v38 }
0x1c89   :  { %8352 = vmatprep.subr.mxu1 %v8942_v36 }
0x1d56   :  { %v8321_v41 = vpop.f32.mrb[64].mxu1 }
0x1d57   :  { %v5506_v16 = vadd.f32 %v8321_v41, %v7626_v15  ;;  %v5500_v17 = vpop.f32.mrb[65].mxu1 }
0x1d58   :  { %v5501_v18 = vadd.f32 %v7626_v15, %v5500_v17 }
0x1d59   :  { %v5510_v0 = vmax.f32 %v5506_v16, 0.0 }
0x1d5a   :  { %v5509_v1 = vmax.f32 %v5501_v18, 0.0 }
0x1d5c   :  { %8338 = vmatprep.mubr.msk.f32.mxu0 %vm1851_vm6, %v5509_v1 }
0x1d5d   :  { %8339 = vmatmul.mubr.msk.f32.vlgmr.msra.gmra.mrb[52].mxu0 %vm1851_vm6, %v5510_v0 }
0x1d5e   :  { %8364 = vmatprep.mubr.msk.f32.mxu0 %vm8943_vm1, %v8942_v36 }
0x1e30   :  { %v8340_v49 = vpop.f32.mrb[52].mxu0 }
0x1e31   :  { %v5606_v22 = vadd.f32 %v8340_v49, %v7637_v21  ;;  %v5600_v23 = vpop.f32.mrb[53].mxu0 }
0x1e32   :  { %v5601_v24 = vadd.f32 %v7637_v21, %v5600_v23 }
0x1e33   :  { %v9961_v13 = vadd.f32 %v5606_v22, %v9898_v20 }
0x1e34   :  { %v9964_v25 = vadd.f32 %v5601_v24, %v9901_v26 }
0x1e35   :  { %v5618_v9 = vsel %vm104_vm0, %v9961_v13, 0.0 }
0x1e36   :  { %5619 = vadd.xlane.f32.xlu1 %v5618_v9  ;;  %v5615_v10 = vsel %vm104_vm0, %v9964_v25, 0.0 }
0x1e37   :  { %5616 = vadd.xlane.f32.xlu0 %v5615_v10 }
0x1ec3   :  { %v5620_v27 = vpop.xlane.xlu1 %5619 }
0x1ec4   :  { %v5622_v28 = vmul.f32 0.03125, %v5620_v27  ;;  %v5617_v57 = vpop.xlane.xlu0 %5616 }
0x1ec5   :  { %v5621_v29 = vmul.f32 0.03125, %v5617_v57 }
0x1ec6   :  { %v5624_v30 = vsub.f32 %v9961_v13, %v5622_v28 }
0x1ec7   :  { %v5623_v20 = vsub.f32 %v9964_v25, %v5621_v29 }
0x1ec8   :  { %v5626_v31 = vmul.f32 %v5624_v30, %v5624_v30 }
0x1ec9   :  { %v5625_v12 = vmul.f32 %v5623_v20, %v5623_v20 }
0x1eca   :  { %v5630_v26 = vsel %vm104_vm0, %v5626_v31, 0.0 }
0x1ecb   :  { %5631 = vadd.xlane.f32.xlu1 %v5630_v26  ;;  %v5627_v32 = vsel %vm104_vm0, %v5625_v12, 0.0 }
0x1ecc   :  { %5628 = vadd.xlane.f32.xlu0 %v5627_v32 }
0x1f58   :  { %v5632_v39 = vpop.xlane.xlu1 %5631 }
0x1f59   :  { %v5634_v42 = vmul.f32 0.03125, %v5632_v39  ;;  %v5629_v43 = vpop.xlane.xlu0 %5628 }
0x1f5a   :  { %v5633_v44 = vmul.f32 0.03125, %v5629_v43 }
0x1f5b   :  { %v5636_v45 = vadd.f32 1e-06, %v5634_v42 }
0x1f5c   :  { %v5635_v46 = vadd.f32 1e-06, %v5633_v44 }
0x1f5d   :  { %8776 = vrsqrt.f32 %v5636_v45 }
0x1f5e   :  { %8778 = vrsqrt.f32 %v5635_v46 }
0x1f67   :  { %v8777_v47 = vpop.eup %8776 }
0x1f68   :  { %v8779_v51 = vpop.eup %8778  ;;  %v5640_v52 = vmul.f32 %v8777_v47, %v5624_v30 }
0x1f69   :  { %v5639_v53 = vmul.f32 %v8779_v51, %v5623_v20 }
0x1f6a   :  { %v5648_v55 = vmul.f32 %v7642_v50, %v5640_v52 }
0x1f6b   :  { %v5647_v40 = vmul.f32 %v7642_v50, %v5639_v53 }
0x1f6c   :  { %v5656_v59 = vadd.f32 %v7643_v54, %v5648_v55 }
0x1f6d   :  { %v5655_v58 = vadd.f32 %v7643_v54, %v5647_v40 }
0x1f6f   :  { %8349 = vmatprep.mubr.msk.f32.mxu1 %vm104_vm0, %v5655_v58 }
0x1f70   :  { %8350 = vmatmul.mubr.msk.f32.vlgmr.msra.gmra.mrb[66].mxu1 %vm104_vm0, %v5656_v59 }
0x1f71   :  { %8354 = vmatprep.mubr.msk.f32.mxu1 %vm8943_vm1, %v8942_v36 }
0x2043   :  { %v8351_v61 = vpop.f32.mrb[66].mxu1 }
0x2044   :  { %v5742_v62 = vpop.f32.mrb[67].mxu1  ;;  %v10014_v2 = vadd.f32 %v8351_v61, %v7649_v60 }
0x2045   :  { %v10000_v63 = vadd.f32 %v7649_v60, %v5742_v62 }
0x2047   :  { %5919 = vrot.lane.b32.xlu1 %v10000_v63, %s8944_s29  ;;  %5752 = vrot.lane.b32.xlu0 %v10000_v63, %s8945_s30 }
0x204b   :  { %5917 = vrot.lane.b32.xlu1 %v10000_v63, %s8946_s10  ;;  %6088 = vrot.lane.b32.xlu0 %v10000_v63, %s8947_s21 }
0x204f   :  { %6090 = vrot.lane.b32.xlu1 %v10000_v63, %s8948_s12  ;;  %6259 = vrot.lane.b32.xlu0 %v10000_v63, %s10298_s2 }
0x2053   :  { %6261 = vrot.lane.b32.xlu1 %v10000_v63, %s10299_s4  ;;  %6598 = vrot.lane.b32.xlu0 %v10014_v2, %s8944_s29  ;;  %s10300_s29 = smov 64  }
0x2057   :  { %6431 = vrot.lane.b32.xlu1 %v10014_v2, %s8945_s30  ;;  %6769 = vrot.lane.b32.xlu0 %v10014_v2, %s8948_s12 }
0x205b   :  { %6596 = vrot.lane.b32.xlu1 %v10014_v2, %s8946_s10  ;;  %6940 = vrot.lane.b32.xlu0 %v10014_v2, %s10299_s4 }
0x205f   :  { %6767 = vrot.lane.b32.xlu1 %v10014_v2, %s8947_s21 }
0x2063   :  { %6938 = vrot.lane.b32.xlu1 %v10014_v2, %s10298_s2 }
0x20b9   :  { %v5920_v48 = vpop.permute.xlu1 %5919  ;;  %v5753_v3 = vpop.permute.xlu0 %5752 }
0x20ba   :  { %8353 = vmatpush3.xpose.msk.msra.mxu1 %vm243_vm2, %v5753_v3  ;;  %8363 = vmatpush3.xpose.msk.msra.mxu0 %vm243_vm2, %v5920_v48 }
0x20bb   :  { %8372 = vmatprep.subr.mxu0 %v8942_v36  ;;  %8357 = vmatprep.subr.mxu1 %v8942_v36 }
0x20bd   :  { %v5918_v4 = vpop.permute.xlu1 %5917  ;;  %8355 = vmatmul.mubr.msk.f32.vlgmr.msra.gmra.mrb[68].mxu1 %vm243_vm2, %v10000_v63  ;;  %v6089_v5 = vpop.permute.xlu0 %6088 }
0x20be   :  { %8365 = vmatmul.mubr.msk.f32.vlgmr.msra.gmra.mrb[54].mxu0 %vm243_vm2, %v5918_v4  ;;  %8359 = vmatprep.mubr.msk.f32.mxu1 %vm8943_vm1, %v8942_v36 }
0x20bf   :  { %8374 = vmatprep.mubr.msk.f32.mxu0 %vm8943_vm1, %v8942_v36 }
0x20c1   :  { %v6091_v6 = vpop.permute.xlu1 %6090  ;;  %v6260_v7 = vpop.permute.xlu0 %6259 }
0x20c2   :  { %8373 = vmatpush3.xpose.msk.msra.mxu0 %vm243_vm2, %v6091_v6 }
0x20c3   :  { %8382 = vmatprep.subr.mxu0 %v8942_v36 }
0x20c5   :  { %v6262_v8 = vpop.permute.xlu1 %6261  ;;  %8375 = vmatmul.mubr.msk.f32.vlgmr.msra.gmra.mrb[56].mxu0 %vm243_vm2, %v6089_v5  ;;  %v6599_v11 = vpop.permute.xlu0 %6598 }
0x20c6   :  { %8383 = vmatpush3.xpose.msk.msra.mxu0 %vm243_vm2, %v6262_v8  ;;  %8384 = vmatprep.mubr.msk.f32.mxu0 %vm8943_vm1, %v8942_v36 }
0x20c7   :  { %8392 = vmatprep.subr.mxu0 %v8942_v36 }
0x20c9   :  { %v6432_v56 = vpop.permute.xlu1 %6431  ;;  %8385 = vmatmul.mubr.msk.f32.vlgmr.msra.gmra.mrb[58].mxu0 %vm243_vm2, %v6260_v7  ;;  %v6770_v15 = vpop.permute.xlu0 %6769 }
0x20ca   :  { %8393 = vmatpush3.xpose.msk.msra.mxu0 %vm243_vm2, %v6432_v56  ;;  %8394 = vmatprep.mubr.msk.f32.mxu0 %vm8943_vm1, %v8942_v36 }
0x20cb   :  { %8402 = vmatprep.subr.mxu0 %v8942_v36 }
0x20cd   :  { %v6597_v14 = vpop.permute.xlu1 %6596  ;;  %8395 = vmatmul.mubr.msk.f32.vlgmr.msra.gmra.mrb[60].mxu0 %vm243_vm2, %v10014_v2  ;;  %v6941_v16 = vpop.permute.xlu0 %6940 }
0x20ce   :  { %8403 = vmatpush3.xpose.msk.msra.mxu0 %vm243_vm2, %v6599_v11  ;;  %8404 = vmatprep.mubr.msk.f32.mxu0 %vm8943_vm1, %v8942_v36 }
0x20cf   :  { %8412 = vmatprep.subr.mxu0 %v8942_v36 }
0x20d1   :  { %8405 = vmatmul.mubr.msk.f32.vlgmr.msra.gmra.mrb[62].mxu0 %vm243_vm2, %v6597_v14  ;;  %v6768_v41 = vpop.permute.xlu1 %6767 }
0x20d2   :  { %8413 = vmatpush3.xpose.msk.msra.mxu0 %vm243_vm2, %v6770_v15  ;;  %8414 = vmatprep.mubr.msk.f32.mxu0 %vm8943_vm1, %v8942_v36 }
0x20d3   :  { %8422 = vmatprep.subr.mxu0 %v8942_v36 }
0x20d5   :  { %8415 = vmatmul.mubr.msk.f32.vlgmr.msra.gmra.mrb[64].mxu0 %vm243_vm2, %v6768_v41  ;;  %v6939_v17 = vpop.permute.xlu1 %6938 }
0x20d6   :  { %8423 = vmatpush3.xpose.msk.msra.mxu0 %vm243_vm2, %v6941_v16  ;;  %8424 = vmatprep.mubr.msk.f32.mxu0 %vm8943_vm1, %v8942_v36 }
0x20d9   :  { %8425 = vmatmul.mubr.msk.f32.vlgmr.msra.gmra.mrb[66].mxu0 %vm243_vm2, %v6939_v17 }
0x2190   :  { %v5824_v18 = vpop.f32.mrb[68].mxu1 }
0x2191   :  { %v5828_v1 = vmul.f32 0.35355338, %v5824_v18  ;;  %v8356_v0 = vpop.f32.mrb[69].mxu1  ;;  %v5991_v21 = vpop.f32.mrb[54].mxu0 }
0x2192   :  { %v5995_v49 = vmul.f32 0.35355338, %v5991_v21  ;;  %v8366_v22 = vpop.f32.mrb[55].mxu0 }
0x2193   :  { %v5829_v23 = vsel %vm243_vm2, %v5828_v1, -inf }
0x2194   :  { %5830 = vmax.xlane.f32.xlu0 %v5829_v23  ;;  %v5996_v24 = vsel %vm243_vm2, %v5995_v49, -inf }
0x2195   :  { %5997 = vmax.xlane.f32.xlu1 %v5996_v24 }
0x2198   :  { %v6162_v9 = vpop.f32.mrb[56].mxu0 }
0x2199   :  { %v10073_v10 = vmul.f32 0.35355338, %v6162_v9  ;;  %v8376_v27 = vpop.f32.mrb[57].mxu0 }
0x219b   :  { %v6167_v28 = vsel %vm243_vm2, %v10073_v10, -inf }
0x219c   :  { %6168 = vmax.xlane.f32.xlu0 %v6167_v28  ;;  %v6333_v57 = vpop.f32.mrb[58].mxu0 }
0x219d   :  { %v6337_v29 = vmul.f32 0.35355338, %v6333_v57  ;;  %v8386_v30 = vpop.f32.mrb[59].mxu0 }
0x219f   :  { %v6338_v20 = vsel %vm243_vm2, %v6337_v29, -inf }
0x21a0   :  { %6339 = vmax.xlane.f32.xlu0 %v6338_v20  ;;  %v6503_v31 = vpop.f32.mrb[60].mxu0 }
0x21a1   :  { %v6507_v12 = vmul.f32 0.35355338, %v6503_v31  ;;  %v8396_v26 = vpop.f32.mrb[61].mxu0 }
0x21a3   :  { %v6508_v32 = vsel %vm243_vm2, %v6507_v12, -inf }
0x21a4   :  { %6509 = vmax.xlane.f32.xlu0 %v6508_v32  ;;  %v6670_v19 = vpop.f32.mrb[62].mxu0 }
0x21a5   :  { %v6674_v33 = vmul.f32 0.35355338, %v6670_v19  ;;  %v8406_v34 = vpop.f32.mrb[63].mxu0 }
0x21a7   :  { %v6675_v35 = vsel %vm243_vm2, %v6674_v33, -inf }
0x21a8   :  { %6676 = vmax.xlane.f32.xlu1 %v6675_v35  ;;  %v6841_v37 = vpop.f32.mrb[64].mxu0 }
0x21a9   :  { %v6845_v38 = vmul.f32 0.35355338, %v6841_v37  ;;  %v8416_v39 = vpop.f32.mrb[65].mxu0 }
0x21ab   :  { %v6846_v42 = vsel %vm243_vm2, %v6845_v38, -inf }
0x21ac   :  { %6847 = vmax.xlane.f32.xlu0 %v6846_v42  ;;  %v7012_v43 = vpop.f32.mrb[66].mxu0 }
0x21ad   :  { %v8426_v44 = vpop.f32.mrb[67].mxu0  ;;  %v7016_v45 = vmul.f32 0.35355338, %v7012_v43 }
0x21af   :  { %v7017_v46 = vsel %vm243_vm2, %v7016_v45, -inf }
0x21b9   :  { %5840 = vrot.lane.b32.xlu1 %v10000_v63, %s10300_s29 }
0x21dd   :  { %7018 = vmax.xlane.f32.xlu1 %v7017_v46 }
0x21ee   :  { %6178 = vrot.lane.b32.xlu1 %v10000_v63, %s10295_s27 }
0x21f2   :  { %6349 = vrot.lane.b32.xlu1 %v10000_v63, %s10296_s28 }
0x21f6   :  { %6519 = vrot.lane.b32.xlu1 %v10014_v2, %s10300_s29 }
0x2221   :  { %v5831_v47 = vpop.xlane.xlu0 %5830 }
0x2222   :  { %v5832_v50 = vsub.f32 %v5828_v1, %v5831_v47  ;;  %v5998_v51 = vpop.xlane.xlu1 %5997 }
0x2223   :  { %v5999_v52 = vsub.f32 %v5995_v49, %v5998_v51 }
0x2224   :  { %v5833_v53 = vmul.f32 1.442695, %v5832_v50 }
0x2225   :  { %v6000_v54 = vmul.f32 1.442695, %v5999_v52 }
0x2226   :  { %8780 = vpow2.f32 %v5833_v53 }
0x2227   :  { %8782 = vpow2.f32 %v6000_v54 }
0x2229   :  { %v6169_v55 = vpop.xlane.xlu0 %6168 }
0x222a   :  { %v6170_v7 = vsub.f32 %v10073_v10, %v6169_v55 }
0x222c   :  { %v6171_v11 = vmul.f32 1.442695, %v6170_v7  ;;  %v7676_v7 = vld [vmem:[%s10264_s5 + $0x60] sm:$0xff] }
0x222d   :  { %v6340_v40 = vpop.xlane.xlu0 %6339 }
0x222e   :  { %v6341_v58 = vsub.f32 %v6337_v29, %v6340_v40 }
0x2230   :  { %v8781_v59 = vpop.eup %8780  ;;  %v6342_v60 = vmul.f32 1.442695, %v6341_v58 }
0x2231   :  { %v10090_v61 = vpop.eup %8782  ;;  %v5835_v62 = vsel %vm243_vm2, %v8781_v59, 0.0  ;;  %v6510_v8 = vpop.xlane.xlu0 %6509 }
0x2232   :  { %8784 = vpow2.f32 %v6342_v60  ;;  %5836 = vadd.xlane.f32.xlu0 %v5835_v62  ;;  %v6002_v48 = vsel %vm243_vm2, %v10090_v61, 0.0  ;;  %v6511_v56 = vsub.f32 %v6507_v12, %v6510_v8  ;;  %v7677_v8 = vld [vmem:[%s10264_s5 + $0x68] sm:$0xff] }
0x2233   :  { %6003 = vadd.xlane.f32.xlu1 %v6002_v48  ;;  %8786 = vpow2.f32 %v6171_v11  ;;  %v8601_v11 = vpack.c.bf16 %v7677_v8, %v7676_v7  ;;  %v7686_v8 = vld [vmem:[%s10267_s8 + $0x3] ss:$0 sm:$0xff]  ;;  %s8956_s8 = smov [#allocation11]  }
0x2234   :  { %v6512_v15 = vmul.f32 1.442695, %v6511_v56 }
0x2235   :  { %v6677_v3 = vpop.xlane.xlu1 %6676  ;;  %8602 = vmatprep.subr.bf16.mxu0 %v8601_v11 }
0x2236   :  { %8788 = vpow2.f32 %v6512_v15  ;;  %v6678_v16 = vsub.f32 %v6674_v33, %v6677_v3  ;;  %v7679_v15 = vld [vmem:[%s10264_s5 + $0x78] sm:$0xff]  ;;  %8604 = vmatpush3.bf16.msra.mxu0 %v8601_v11 }
0x2238   :  { %v6679_v18 = vmul.f32 1.442695, %v6678_v16 }
0x2239   :  { %v5841_v4 = vpop.permute.xlu1 %5840  ;;  %v6848_v14 = vpop.xlane.xlu0 %6847 }
0x223a   :  { %8358 = vmatpush3.msra.mxu1 %v5841_v4  ;;  %v6849_v41 = vsub.f32 %v6845_v38, %v6848_v14  ;;  %v7678_v14 = vld [vmem:[%s10264_s5 + $0x70] sm:$0xff] }
0x223b   :  { %8367 = vmatprep.subr.mxu1 %v8942_v36  ;;  %v8605_v16 = vpack.c.bf16 %v7679_v15, %v7678_v14 }
0x223c   :  { %v10096_v5 = vpop.eup %8784  ;;  %v6850_v17 = vmul.f32 1.442695, %v6849_v41 }
0x223d   :  { %v6344_v6 = vsel %vm243_vm2, %v10096_v5, 0.0  ;;  %v8787_v1 = vpop.eup %8786  ;;  %8606 = vmatprep.subr.bf16.mxu0 %v8605_v16 }
0x223e   :  { %6345 = vadd.xlane.f32.xlu1 %v6344_v6  ;;  %8790 = vpow2.f32 %v6850_v17  ;;  %8608 = vmatpush3.bf16.msra.mxu0 %v8605_v16 }
0x223f   :  { %8792 = vpow2.f32 %v6679_v18 }
0x2240   :  { %v8789_v0 = vpop.eup %8788 }
0x2241   :  { %v6514_v49 = vsel %vm243_vm2, %v8789_v0, 0.0 }
0x2248   :  { %6007 = vrot.lane.b32.xlu0 %v10000_v63, %s10292_s17  ;;  %v6173_v63 = vsel %vm243_vm2, %v8787_v1, 0.0  ;;  %v10107_v22 = vpop.eup %8790 }
0x2249   :  { %v6852_v9 = vsel %vm243_vm2, %v10107_v22, 0.0  ;;  %v8793_v10 = vpop.eup %8792 }
0x224a   :  { %v6681_v27 = vsel %vm243_vm2, %v8793_v10, 0.0 }
0x224f   :  { %6686 = vrot.lane.b32.xlu1 %v10014_v2, %s10292_s17 }
0x2267   :  { %6174 = vadd.xlane.f32.xlu0 %v6173_v63 }
0x226a   :  { %v7019_v21 = vpop.xlane.xlu1 %7018 }
0x226b   :  { %v7020_v23 = vsub.f32 %v7016_v45, %v7019_v21  ;;  %6515 = vadd.xlane.f32.xlu0 %v6514_v49 }
0x226d   :  { %v7021_v24 = vmul.f32 1.442695, %v7020_v23 }
0x226e   :  { %v6179_v29 = vpop.permute.xlu1 %6178 }
0x226f   :  { %8794 = vpow2.f32 %v7021_v24  ;;  %6853 = vadd.xlane.f32.xlu0 %v6852_v9 }
0x2272   :  { %v6350_v30 = vpop.permute.xlu1 %6349 }
0x2273   :  { %6682 = vadd.xlane.f32.xlu1 %v6681_v27 }
0x2276   :  { %v6520_v20 = vpop.permute.xlu1 %6519 }
0x2279   :  { %v10112_v28 = vpop.eup %8794 }
0x227a   :  { %v7023_v57 = vsel %vm243_vm2, %v10112_v28, 0.0 }
0x227b   :  { %7024 = vadd.xlane.f32.xlu0 %v7023_v57  ;;  %v7680_v57 = vld [vmem:[#allocation6 + $0x3] ss:$0 sm:$0xff] }
0x2284   :  { %7028 = vrot.lane.b32.xlu1 %v10014_v2, %s10296_s28 }
0x2291   :  { %6857 = vrot.lane.b32.xlu0 %v10014_v2, %s10295_s27 }
0x22bf   :  { %v5837_v31 = vpop.xlane.xlu0 %5836 }
0x22c0   :  { %8796 = vrcp.f32 %v5837_v31  ;;  %v6004_v12 = vpop.xlane.xlu1 %6003 }
0x22c1   :  { %8798 = vrcp.f32 %v6004_v12 }
0x22c3   :  { %v6008_v33 = vpop.permute.xlu0 %6007 }
0x22ca   :  { %v8797_v26 = vpop.eup %8796 }
0x22cb   :  { %v5839_v32 = vmul.f32 %v8797_v26, %v8781_v59  ;;  %v8799_v19 = vpop.eup %8798  ;;  %v6346_v2 = vpop.xlane.xlu1 %6345 }
0x22cc   :  { %v6006_v34 = vmul.f32 %v8799_v19, %v10090_v61 }
0x22cd   :  { %8360 = vmatmul.mubr.msk.f32.vlgmr.msra.gmra.mrb[70].mxu1 %vm243_vm2, %v5839_v32 }
0x22ce   :  { %8368 = vmatpush3.msra.mxu1 %v6008_v33  ;;  %8369 = vmatprep.mubr.msk.f32.mxu1 %vm8943_vm1, %v8942_v36 }
0x22cf   :  { %8377 = vmatprep.subr.mxu1 %v8942_v36  ;;  %v6687_v38 = vpop.permute.xlu1 %6686 }
0x22d1   :  { %8370 = vmatmul.mubr.msk.f32.vlgmr.msra.gmra.mrb[72].mxu1 %vm243_vm2, %v6006_v34 }
0x22d2   :  { %8378 = vmatpush3.msra.mxu1 %v6179_v29  ;;  %8379 = vmatprep.mubr.msk.f32.mxu1 %vm8943_vm1, %v8942_v36 }
0x22d3   :  { %8387 = vmatprep.subr.mxu1 %v8942_v36 }
0x22f4   :  { %v6175_v35 = vpop.xlane.xlu0 %6174 }
0x22f5   :  { %8800 = vrcp.f32 %v6175_v35 }
0x22f6   :  { %8802 = vrcp.f32 %v6346_v2 }
0x22f8   :  { %v6516_v37 = vpop.xlane.xlu0 %6515 }
0x22f9   :  { %8804 = vrcp.f32 %v6516_v37 }
0x22fc   :  { %v6854_v43 = vpop.xlane.xlu0 %6853 }
0x22ff   :  { %v8801_v39 = vpop.eup %8800 }
0x2300   :  { %v6177_v42 = vmul.f32 %v8801_v39, %v8787_v1  ;;  %v6683_v44 = vpop.xlane.xlu1 %6682  ;;  %v8803_v45 = vpop.eup %8802 }
0x2301   :  { %8806 = vrcp.f32 %v6683_v44  ;;  %v6348_v46 = vmul.f32 %v8803_v45, %v10096_v5  ;;  %v7688_v44 = vld [vmem:[%s10268_s9 + $0x68] sm:$0xff] }
0x2302   :  { %8380 = vmatmul.mubr.msk.f32.vlgmr.msra.gmra.mrb[74].mxu1 %vm243_vm2, %v6177_v42  ;;  %8808 = vrcp.f32 %v6854_v43  ;;  %v7687_v43 = vld [vmem:[%s10268_s9 + $0x60] sm:$0xff] }
0x2303   :  { %8388 = vmatpush3.msra.mxu1 %v6350_v30  ;;  %8389 = vmatprep.mubr.msk.f32.mxu1 %vm8943_vm1, %v8942_v36  ;;  %v8805_v47 = vpop.eup %8804  ;;  %v8609_v45 = vpack.c.bf16 %v7688_v44, %v7687_v43 }
0x2304   :  { %8397 = vmatprep.subr.mxu1 %v8942_v36  ;;  %v6518_v50 = vmul.f32 %v8805_v47, %v8789_v0  ;;  %v7029_v58 = vpop.permute.xlu1 %7028  ;;  %v7690_v47 = vld [vmem:[%s10268_s9 + $0x78] sm:$0xff] }
0x2306   :  { %8390 = vmatmul.mubr.msk.f32.vlgmr.msra.gmra.mrb[76].mxu1 %vm243_vm2, %v6348_v46  ;;  %v7689_v46 = vld [vmem:[%s10268_s9 + $0x70] sm:$0xff] }
0x2307   :  { %8398 = vmatpush3.msra.mxu1 %v6520_v20  ;;  %8399 = vmatprep.mubr.msk.f32.mxu1 %vm8943_vm1, %v8942_v36 }
0x2308   :  { %v7025_v51 = vpop.xlane.xlu0 %7024  ;;  %8407 = vmatprep.subr.mxu1 %v8942_v36 }
0x2309   :  { %8810 = vrcp.f32 %v7025_v51  ;;  %v7694_v51 = vld [vmem:[%s10270_s11 + $0xc0] sm:$0xff] }
0x230a   :  { %8400 = vmatmul.mubr.msk.f32.vlgmr.msra.gmra.mrb[78].mxu1 %vm243_vm2, %v6518_v50  ;;  %v8613_v50 = vpack.c.bf16 %v7690_v47, %v7689_v46 }
0x230b   :  { %v8807_v52 = vpop.eup %8806  ;;  %8408 = vmatpush3.msra.mxu1 %v6687_v38  ;;  %8409 = vmatprep.mubr.msk.f32.mxu1 %vm8943_vm1, %v8942_v36 }
0x230c   :  { %v6685_v53 = vmul.f32 %v8807_v52, %v8793_v10  ;;  %v6858_v54 = vpop.permute.xlu0 %6857  ;;  %8417 = vmatprep.subr.mxu1 %v8942_v36  ;;  %v8809_v55 = vpop.eup %8808  ;;  %v7695_v52 = vld [vmem:[%s10270_s11 + $0xc8] sm:$0xff] }
0x230d   :  { %v6856_v40 = vmul.f32 %v8809_v55, %v10107_v22  ;;  %v7697_v55 = vld [vmem:[%s10270_s11 + $0xd8] sm:$0xff] }
0x230e   :  { %8410 = vmatmul.mubr.msk.f32.vlgmr.msra.gmra.mrb[80].mxu1 %vm243_vm2, %v6685_v53  ;;  %v7696_v53 = vld [vmem:[%s10270_s11 + $0xd0] sm:$0xff] }
0x230f   :  { %8418 = vmatpush3.msra.mxu1 %v6858_v54  ;;  %8419 = vmatprep.mubr.msk.f32.mxu1 %vm8943_vm1, %v8942_v36  ;;  %v8617_v54 = vpack.c.bf16 %v7695_v52, %v7694_v51 }
0x2310   :  { %8427 = vmatprep.subr.mxu1 %v8942_v36 }
0x2311   :  { %8618 = vmatprep.subr.bf16.mxu0 %v8617_v54 }
0x2312   :  { %8420 = vmatmul.mubr.msk.f32.vlgmr.msra.gmra.mrb[82].mxu1 %vm243_vm2, %v6856_v40  ;;  %v8621_v40 = vpack.c.bf16 %v7697_v55, %v7696_v53 }
0x2313   :  { %v8811_v59 = vpop.eup %8810  ;;  %8428 = vmatpush3.msra.mxu1 %v7029_v58  ;;  %8429 = vmatprep.mubr.msk.f32.mxu1 %vm8943_vm1, %v8942_v36  ;;  %v7698_v58 = vld [vmem:[%s10270_s11 + $0xe0] sm:$0xff] }
0x2314   :  { %v7027_v60 = vmul.f32 %v8811_v59, %v10112_v28  ;;  %8610 = vmatprep.subr.bf16.mxu1 %v8609_v45  ;;  %v7699_v59 = vld [vmem:[%s10270_s11 + $0xe8] sm:$0xff] }
0x2316   :  { %8430 = vmatmul.mubr.msk.f32.vlgmr.msra.gmra.mrb[84].mxu1 %vm243_vm2, %v7027_v60  ;;  %v8625_v60 = vpack.c.bf16 %v7699_v59, %v7698_v58 }
0x2317   :  { %8612 = vmatpush3.bf16.msra.mxu1 %v8609_v45 }
0x2318   :  { %8614 = vmatprep.subr.bf16.mxu1 %v8613_v50 }
0x231b   :  { %8616 = vmatpush3.bf16.msra.mxu1 %v8613_v50 }
0x23a0   :  { %v5912_v61 = vpop.f32.mrb[70].mxu1 }
0x23a1   :  { %5916 = vst.msk [vmem:[#allocation2] sm:$0xff] %vm243_vm2, %v5912_v61  ;;  %v8361_v62 = vpop.f32.mrb[71].mxu1 }
0x23a4   :  { %v6079_v48 = vpop.f32.mrb[72].mxu1 }
0x23a5   :  { %6084 = vrot.lane.b32.xlu0 %v6079_v48, %s10297_s6  ;;  %v8371_v3 = vpop.f32.mrb[73].mxu1 }
0x23d5   :  { %v6250_v4 = vpop.f32.mrb[74].mxu1 }
0x23d6   :  { %6255 = vrot.lane.b32.xlu1 %v6250_v4, %s10293_s20  ;;  %v8381_v5 = vpop.f32.mrb[75].mxu1 }
0x23d9   :  { %v6421_v6 = vpop.f32.mrb[76].mxu1 }
0x23da   :  { %6426 = vrot.lane.b32.xlu1 %v6421_v6, %s10294_s22  ;;  %v8391_v36 = vpop.f32.mrb[77].mxu1 }
0x23db   :  { %v7685_v36 = vld [vmem:[%s10266_s7 + $0x3] ss:$0 sm:$0xff] }
0x23dd   :  { %v6591_v56 = vpop.f32.mrb[78].mxu1 }
0x23de   :  { %6595 = vst.msk [vmem:[#allocation2 + $0x8] sm:$0xff] %vm243_vm2, %v6591_v56  ;;  %v8401_v41 = vpop.f32.mrb[79].mxu1 }
0x23e1   :  { %v6758_v17 = vpop.f32.mrb[80].mxu1 }
0x23e2   :  { %6763 = vrot.lane.b32.xlu0 %v6758_v17, %s10297_s6  ;;  %v8411_v18 = vpop.f32.mrb[81].mxu1  ;;  %v7700_v17 = vld [vmem:[%s10270_s11 + $0xf0] sm:$0xff] }
0x23e3   :  { %v7701_v18 = vld [vmem:[%s10270_s11 + $0xf8] sm:$0xff]  ;;  %s7456_s11 = sshll.u32 %s8956_s8, 4  ;;  %s7457_s11 = int_to_ptr.vmem [resolvable:$true] %s7456_s11 }
0x23e4   :  { %p8909_p5 = scmp.lt.s32.totalorder %s7457_s11, %s7457_s11 }
0x23e5   :  { %v6929_v1 = vpop.f32.mrb[82].mxu1 }
0x23e6   :  { %6934 = vrot.lane.b32.xlu0 %v6929_v1, %s10293_s20  ;;  %v8421_v63 = vpop.f32.mrb[83].mxu1  ;;  %v8629_v1 = vpack.c.bf16 %v7701_v18, %v7700_v17  ;;  %s8904_s20 = scalar_lea.vmem %s7457_s11, 256 }
0x23e7   :  { %v7691_v63 = vld [vmem:[#allocation8 + $0x3] ss:$0 sm:$0xff]  ;;  %p8905_p4 = scmp.ne.s32.totalorder %s7457_s11, %s8904_s20  ;;  %p8910_p6 = scmp.lt.s32.totalorder %s8904_s20, %s8904_s20 }
0x23e9   :  { %v7100_v0 = vpop.f32.mrb[84].mxu1  ;;  %p8911_p7 = por %p8910_p6, %p8909_p5 }
0x23ea   :  { %7105 = vrot.lane.b32.xlu1 %v7100_v0, %s10294_s22  ;;  %v8431_v21 = vpop.f32.mrb[85].mxu1 }
0x23eb   :  { %p8912_p8 = pnand %p8911_p7, %p8905_p4 }
0x2417   :  { %v6085_v49 = vpop.permute.xlu0 %6084 }
0x2418   :  { %6087 = vst.msk [vmem:[#allocation2] sm:$0xff] %vm577_vm3, %v6085_v49 }
0x2448   :  { %v6256_v22 = vpop.permute.xlu1 %6255 }
0x2449   :  { %6258 = vst.msk [vmem:[#allocation2] sm:$0xff] %vm749_vm4, %v6256_v22 }
0x244c   :  { %v6427_v23 = vpop.permute.xlu1 %6426 }
0x244d   :  { %6429 = vst.msk [vmem:[#allocation2] sm:$0xff] %vm921_vm5, %v6427_v23 }
0x2454   :  { %v6764_v24 = vpop.permute.xlu0 %6763  ;;  %v7109_v9 = vld [vmem:[#allocation2] sm:$0xff] }
0x2455   :  { %6766 = vst.msk [vmem:[#allocation2 + $0x8] sm:$0xff] %vm577_vm3, %v6764_v24  ;;  %8440 = vmatprep.mubr.msk.f32.mxu0 %vm104_vm0, %v7109_v9  ;;  %v7702_v9 = vld [vmem:[#allocation9 + $0x3] ss:$0 sm:$0xff] }
0x2458   :  { %v6935_v10 = vpop.permute.xlu0 %6934 }
0x2459   :  { %6937 = vst.msk [vmem:[#allocation2 + $0x8] sm:$0xff] %vm749_vm4, %v6935_v10 }
0x245c   :  { %v7106_v27 = vpop.permute.xlu1 %7105 }
0x245d   :  { %7108 = vst.msk [vmem:[#allocation2 + $0x8] sm:$0xff] %vm921_vm5, %v7106_v27 }
0x2464   :  { %v7110_v28 = vld [vmem:[#allocation2 + $0x8] sm:$0xff] }
0x2465   :  { %8441 = vmatmul.mubr.msk.f32.vlgmr.msra.gmra.mrb[68].mxu0 %vm104_vm0, %v7110_v28 }
0x2466   :  { %8620 = vmatpush3.bf16.msra.mxu0 %v8617_v54 }
0x2467   :  { %8622 = vmatprep.subr.bf16.mxu0 %v8621_v40 }
0x246a   :  { %8624 = vmatpush3.bf16.msra.mxu0 %v8621_v40 }
0x246b   :  { %8626 = vmatprep.subr.bf16.mxu0 %v8625_v60 }
0x246e   :  { %8628 = vmatpush3.bf16.msra.mxu0 %v8625_v60 }
0x246f   :  { %8630 = vmatprep.subr.bf16.mxu0 %v8629_v1 }
0x2472   :  { %8632 = vmatpush3.bf16.msra.mxu0 %v8629_v1 }
0x2538   :  { %v8442_v29 = vpop.f32.mrb[68].mxu0 }
0x2539   :  { %v7202_v30 = vadd.f32 %v8442_v29, %v7680_v57  ;;  %v7196_v20 = vpop.f32.mrb[69].mxu0 }
0x253a   :  { %v7197_v31 = vadd.f32 %v7680_v57, %v7196_v20 }
0x253b   :  { %v10181_v12 = vadd.f32 %v7202_v30, %v9961_v13 }
0x253c   :  { %v10184_v26 = vadd.f32 %v7197_v31, %v9964_v25 }
0x253d   :  { %v7214_v32 = vsel %vm104_vm0, %v10181_v12, 0.0 }
0x253e   :  { %7215 = vadd.xlane.f32.xlu1 %v7214_v32  ;;  %v7211_v19 = vsel %vm104_vm0, %v10184_v26, 0.0 }
0x253f   :  { %7212 = vadd.xlane.f32.xlu0 %v7211_v19 }
0x25cb   :  { %v7216_v33 = vpop.xlane.xlu1 %7215 }
0x25cc   :  { %v7218_v34 = vmul.f32 0.03125, %v7216_v33  ;;  %v7213_v2 = vpop.xlane.xlu0 %7212 }
0x25cd   :  { %v7217_v35 = vmul.f32 0.03125, %v7213_v2 }
0x25ce   :  { %v7220_v37 = vsub.f32 %v10181_v12, %v7218_v34 }
0x25cf   :  { %v7219_v13 = vsub.f32 %v10184_v26, %v7217_v35 }
0x25d0   :  { %v7222_v39 = vmul.f32 %v7220_v37, %v7220_v37 }
0x25d1   :  { %v7221_v38 = vmul.f32 %v7219_v13, %v7219_v13 }
0x25d2   :  { %v7226_v42 = vsel %vm104_vm0, %v7222_v39, 0.0 }
0x25d3   :  { %v7223_v25 = vsel %vm104_vm0, %v7221_v38, 0.0 }
0x25d4   :  { %7224 = vadd.xlane.f32.xlu0 %v7223_v25 }
0x25d8   :  { %7227 = vadd.xlane.f32.xlu0 %v7226_v42 }
0x2661   :  { %v7225_v61 = vpop.xlane.xlu0 %7224 }
0x2662   :  { %v7229_v62 = vmul.f32 0.03125, %v7225_v61 }
0x2664   :  { %v7231_v48 = vadd.f32 1e-06, %v7229_v62 }
0x2665   :  { %v7228_v3 = vpop.xlane.xlu0 %7227 }
0x2666   :  { %8812 = vrsqrt.f32 %v7231_v48  ;;  %v7230_v4 = vmul.f32 0.03125, %v7228_v3 }
0x2668   :  { %v7232_v5 = vadd.f32 1e-06, %v7230_v4 }
0x266a   :  { %8814 = vrsqrt.f32 %v7232_v5 }
0x2670   :  { %v8813_v6 = vpop.eup %8812 }
0x2671   :  { %v7235_v7 = vmul.f32 %v8813_v6, %v7219_v13 }
0x2673   :  { %v7243_v11 = vmul.f32 %v7685_v36, %v7235_v7 }
0x2674   :  { %v8815_v56 = vpop.eup %8814 }
0x2675   :  { %v7236_v14 = vmul.f32 %v8815_v56, %v7220_v37  ;;  %v7251_v15 = vadd.f32 %v7686_v8, %v7243_v11 }
0x2677   :  { %v7244_v41 = vmul.f32 %v7685_v36, %v7236_v14  ;;  %8451 = vmatprep.mubr.msk.f32.mxu1 %vm104_vm0, %v7251_v15 }
0x2679   :  { %v7252_v16 = vadd.f32 %v7686_v8, %v7244_v41 }
0x267b   :  { %8452 = vmatmul.mubr.msk.f32.vlgmr.msra.gmra.mrb[86].mxu1 %vm104_vm0, %v7252_v16 }
0x274e   :  { %v8453_v0 = vpop.f32.mrb[86].mxu1 }
0x274f   :  { %v7344_v21 = vadd.f32 %v8453_v0, %v7691_v63  ;;  %v7338_v49 = vpop.f32.mrb[87].mxu1 }
0x2750   :  { %v7339_v22 = vadd.f32 %v7691_v63, %v7338_v49 }
0x2751   :  { %v7348_v24 = vmax.f32 %v7344_v21, 0.0 }
0x2752   :  { %v7347_v23 = vmax.f32 %v7339_v22, 0.0 }
0x2754   :  { %8470 = vmatprep.mubr.msk.f32.mxu0 %vm1851_vm6, %v7347_v23 }
0x2755   :  { %8471 = vmatmul.mubr.msk.f32.vlgmr.msra.gmra.mrb[70].mxu0 %vm1851_vm6, %v7348_v24 }
0x2828   :  { %v8472_v10 = vpop.f32.mrb[70].mxu0 }
0x2829   :  { %v7444_v27 = vadd.f32 %v8472_v10, %v7702_v9  ;;  %v7438_v28 = vpop.f32.mrb[71].mxu0 }
0x282a   :  { %v7439_v57 = vadd.f32 %v7702_v9, %v7438_v28 }
0x282b   :  { %v7448_v29 = vadd.f32 %v7444_v27, %v10181_v12 }
0x282c   :  { %v7447_v30 = vadd.f32 %v7439_v57, %v10184_v26 }
0x282d   :  { %7450 = vst.msk [vmem:[#allocation11 + $0x8] sm:$0xff] %vm104_vm0, %v7448_v29 }
0x282e   :  { %7449 = vst.msk [vmem:[#allocation11] sm:$0xff] %vm104_vm0, %v7447_v30 }
0x282f   :  { %8915 = shalt.err (!%p8912_p8)
}
0x2830   :  { %s8916_s18 = scalar_lea.hbm %s10272_s13, 256 }
0x2831   :  { %p8917_p9 = scmp.ne.s32.totalorder %s10272_s13, %s8916_s18  ;;  %p8920_p10 = scmp.lt.u32.totalorder %s8916_s18, %s10272_s13 }
0x2833   :  { %p8922_p11 = pnand %p8920_p10, %p8917_p9 }
0x2835   :  { %8925 = shalt.err (!%p8922_p11)
}
0x2836   :  { %s10301_s15 = smov 128  }
0x2837   :  { %7462 = dma.vmem_to_hbm [thread:$0]  %s7457_s11, 256, %s10272_s13, [#allocation5], %s10301_s15, %s10301_s15, %s10297_s6  }
0x2838   :  { %8932 = dma.done.wait [#allocation5], 256  }
0x2839   :  { %8933 = vsyncadd [#allocation5], 4294967040 }
0x283a   :  { %7466 = vsyncpa [#allocation4], 1 }
0x283b   :  { %7467 = vsyncpa [#allocation7], 1 }
0x283c   :  { %7468 = vsyncpa [#allocation10], 1 }
0x283d   :  { %7469 = vsyncpa [#allocation5], 1 }

</bundles_post_ra>
